<compile_context>
chip_gen: v5e
topology: v5e:2x2
jax: 0.10.0
libtpu: 0.0.40
codegen_flags: <defaults>
</compile_context>

<pallas_src>
import functools
import math

import jax
import jax.numpy as jnp
import numpy as np
from jax import lax
from jax.experimental import pallas as pl
from jax.experimental.pallas import tpu as pltpu


def _make_mha_kernel(n_head, block_b, with_score):
    def kernel(xq_ref, xk_ref, xv_ref,
               wq_ref, bq_ref, wk_ref, bk_ref, wvo_ref, bvo_ref,
               out_ref, *maybe_score):
        score_ref = maybe_score[0] if with_score else None
        tq = xq_ref.shape[1]
        d_model = xq_ref.shape[2]

        for b in range(block_b):                       # static, unrolled
            xq = xq_ref[b]                             # (Tq, D)
            xk = xk_ref[b]                             # (Nk, D)
            xv = xv_ref[b]                             # (Nk, D)

            out_acc = jnp.zeros((tq, d_model), jnp.float32)

            for h in range(n_head):                    # static, unrolled
                # Per-head projections (scale already folded into wq/bq).
                qh = jnp.dot(xq, wq_ref[h],
                             preferred_element_type=jnp.float32) + bq_ref[h]
                kh = jnp.dot(xk, wk_ref[h],
                             preferred_element_type=jnp.float32) + bk_ref[h]

                # scores[n, m] = sum_d qh[n, d] * kh[m, d]   (already scaled)
                scores = lax.dot_general(
                    qh, kh, (((1,), (1,)), ((), ())),
                    preferred_element_type=jnp.float32)      # (Tq, Nk)
                if score_ref is not None:
                    score_ref[b, h] = scores.astype(score_ref.dtype)

                # Numerically stable softmax over the key axis (f32).
                m = jnp.max(scores, axis=-1, keepdims=True)
                e = jnp.exp(scores - m)
                inv_l = pl.reciprocal(jnp.sum(e, axis=-1, keepdims=True),
                                      approx=True)
                attn = e * inv_l
                # Dropout is identity (eval mode).

                # Fused V-projection + fc_concat slice: (Nk, D) @ (D, D).
                vo = jnp.dot(xv, wvo_ref[h],
                             preferred_element_type=jnp.float32)
                out_acc = out_acc + jnp.dot(
                    attn, vo, preferred_element_type=jnp.float32)

            out_ref[b] = (out_acc + bvo_ref[...]).astype(out_ref.dtype)

    return kernel


def _prepare_fused_params(params, n_head):
    """One-time transform of nn.Linear-style params into kernel layout."""
    d_model = params["wq"].shape[0]
    dh = d_model // n_head
    inv_scale = 1.0 / math.sqrt(dh)

    # (n_head, D, dh) per-head stacks; 1/sqrt(dh) folded into the Q path.
    wq = (params["wq"] * inv_scale).reshape(d_model, n_head, dh).transpose(1, 0, 2)
    bq = (params["bq"] * inv_scale).reshape(n_head, 1, dh)
    wk = params["wk"].reshape(d_model, n_head, dh).transpose(1, 0, 2)
    bk = params["bk"].reshape(n_head, 1, dh)

    # Fuse fc_concat into the V path.
    wv_h = params["wv"].reshape(d_model, n_head, dh).transpose(1, 0, 2)  # (H, D, dh)
    wc_h = params["wc"].reshape(n_head, dh, d_model)                     # (H, dh, D)
    wvo = jnp.einsum("hij,hjk->hik", wv_h, wc_h)                         # (H, D, D)
    bvo = (params["bv"] @ params["wc"] + params["bc"]).reshape(1, d_model)
    return wq, bq, wk, bk, wvo, bvo


def _pick_block_b(batch):
    # Largest batch-block that still leaves >=2 grid steps (v7x megacore),
    # while amortizing per-step overhead on single-TC v5e/v6e.
    for cand in (8, 4, 2):
        if batch % cand == 0 and batch // cand >= 2:
            return cand
    return 1


def multi_head_attention(q, k, v, params, *, n_head, mask=None,
                         return_score=True, score_dtype=jnp.float32,
                         block_b=None, block_q=None):
    """Pallas forward of the PyTorch MultiHeadAttention (dropout off)."""
    # TODO(synk): attention-mask path (mask is not None) is not implemented.
    assert mask is None, "mask path not implemented in the Pallas kernel"

    B, Nq, D = q.shape
    Nk = k.shape[1]
    dh = D // n_head
    assert D % n_head == 0

    wq, bq, wk, bk, wvo, bvo = _prepare_fused_params(params, n_head)

    if block_b is None:
        block_b = _pick_block_b(B)
    if B % block_b != 0:
        block_b = 1
    if block_q is None:
        block_q = Nq if Nq <= 512 else 512
    if Nq % block_q != 0:
        block_q = Nq

    n_b_blocks = B // block_b
    n_q_blocks = Nq // block_q

    kernel = _make_mha_kernel(n_head, block_b, return_score)

    full3 = lambda shape: pl.BlockSpec(shape, lambda bi, qi: (0, 0, 0))
    in_specs = [
        pl.BlockSpec((block_b, block_q, D), lambda bi, qi: (bi, qi, 0)),  # Q
        pl.BlockSpec((block_b, Nk, D), lambda bi, qi: (bi, 0, 0)),        # K
        pl.BlockSpec((block_b, Nk, D), lambda bi, qi: (bi, 0, 0)),        # V
        full3((n_head, D, dh)),                                           # wq
        full3((n_head, 1, dh)),                                           # bq
        full3((n_head, D, dh)),                                           # wk
        full3((n_head, 1, dh)),                                           # bk
        full3((n_head, D, D)),                                            # wvo
        pl.BlockSpec((1, D), lambda bi, qi: (0, 0)),                      # bvo
    ]

    out_shapes = [jax.ShapeDtypeStruct((B, Nq, D), q.dtype)]
    out_specs = [pl.BlockSpec((block_b, block_q, D), lambda bi, qi: (bi, qi, 0))]
    if return_score:
        out_shapes.append(jax.ShapeDtypeStruct((B, n_head, Nq, Nk), score_dtype))
        out_specs.append(pl.BlockSpec((block_b, n_head, block_q, Nk),
                                      lambda bi, qi: (bi, 0, qi, 0)))

    results = pl.pallas_call(
        kernel,
        grid=(n_b_blocks, n_q_blocks),
        in_specs=in_specs,
        out_specs=tuple(out_specs),
        out_shape=tuple(out_shapes),
        compiler_params=pltpu.CompilerParams(
            dimension_semantics=("parallel", "parallel")),
    )(q, k, v, wq, bq, wk, bk, wvo, bvo)

    if return_score:
        out, attn_score = results
        return out, attn_score
    return results[0]


def reference_forward(q, k, v, params, *, n_head):
    """Pure-JAX mirror of the PyTorch forward (mask=None, dropout off)."""
    B, Nq, D = q.shape
    Nk = k.shape[1]
    dh = D // n_head
    scale = math.sqrt(dh)
    Q = q @ params["wq"] + params["bq"]
    K = k @ params["wk"] + params["bk"]
    V = v @ params["wv"] + params["bv"]
    Q = Q.reshape(B, Nq, n_head, dh).transpose(0, 2, 1, 3)
    K = K.reshape(B, Nk, n_head, dh).transpose(0, 2, 1, 3)
    V = V.reshape(B, Nk, n_head, dh).transpose(0, 2, 1, 3)
    attn_score = jnp.einsum("bhnd,bhmd->bhnm", Q, K) / scale
    attn = jax.nn.softmax(attn_score, axis=-1)
    out = jnp.einsum("bhnm,bhmd->bhnd", attn, V)
    out = out.transpose(0, 2, 1, 3).reshape(B, Nq, D)
    out = out @ params["wc"] + params["bc"]
    return out, attn_score


def make_params(key, d_model):
    ks = jax.random.split(key, 8)
    std = 1.0 / math.sqrt(d_model)
    uni = lambda kk, shape: jax.random.uniform(
        kk, shape, jnp.float32, minval=-std, maxval=std)
    return {
        # Stored as (in, out); equivalent to nn.Linear weight.T.
        "wq": uni(ks[0], (d_model, d_model)), "bq": uni(ks[1], (d_model,)),
        "wk": uni(ks[2], (d_model, d_model)), "bk": uni(ks[3], (d_model,)),
        "wv": uni(ks[4], (d_model, d_model)), "bv": uni(ks[5], (d_model,)),
        "wc": uni(ks[6], (d_model, d_model)), "bc": uni(ks[7], (d_model,)),
    }


if __name__ == "__main__":
    d_model = 32
    n_head = 4
    seq = 128
    batch = 2

    key = jax.random.PRNGKey(0)
    kq, kk, kv, kp = jax.random.split(key, 4)
    q_in = jax.random.normal(kq, (batch, seq, d_model), jnp.float32)
    k_in = jax.random.normal(kk, (batch, seq, d_model), jnp.float32)
    v_in = jax.random.normal(kv, (batch, seq, d_model), jnp.float32)
    params = make_params(kp, d_model)

    # Full contract: (out, attn_score) like the PyTorch module.
    out, attn_score = multi_head_attention(q_in, k_in, v_in, params,
                                           n_head=n_head)
    out = jax.block_until_ready(out)
    attn_score = jax.block_until_ready(attn_score)

    ref_out, ref_score = reference_forward(q_in, k_in, v_in, params,
                                           n_head=n_head)
    np.testing.assert_allclose(np.asarray(out), np.asarray(ref_out),
                               rtol=1e-2, atol=1e-2)
    np.testing.assert_allclose(np.asarray(attn_score), np.asarray(ref_score),
                               rtol=1e-2, atol=1e-2)

    # Fast path: drop the (large) score output when the caller doesn't need it.
    out_only = multi_head_attention(q_in, k_in, v_in, params,
                                    n_head=n_head, return_score=False)
    out_only = jax.block_until_ready(out_only)
    np.testing.assert_allclose(np.asarray(out_only), np.asarray(ref_out),
                               rtol=1e-2, atol=1e-2)

    print("KERNEL_OK")
</pallas_src>

<mosaic_0001>
module attributes {stable_mosaic.version = 11 : i64} {
  func.func @kernel(%arg0: i32, %arg1: i32, %arg2: memref<1x128x32xf32, #tpu.memory_space<vmem>>, %arg3: memref<1x128x32xf32, #tpu.memory_space<vmem>>, %arg4: memref<1x128x32xf32, #tpu.memory_space<vmem>>, %arg5: memref<4x32x8xf32, #tpu.memory_space<vmem>>, %arg6: memref<4x1x8xf32, #tpu.memory_space<vmem>>, %arg7: memref<4x32x8xf32, #tpu.memory_space<vmem>>, %arg8: memref<4x1x8xf32, #tpu.memory_space<vmem>>, %arg9: memref<4x32x32xf32, #tpu.memory_space<vmem>>, %arg10: memref<1x32xf32, #tpu.memory_space<vmem>>, %arg11: memref<1x128x32xf32, #tpu.memory_space<vmem>>, %arg12: memref<1x4x128x128xf32, #tpu.memory_space<vmem>>) attributes {dimension_semantics = [#tpu.dimension_semantics<parallel>, #tpu.dimension_semantics<parallel>], iteration_bounds = array<i64: 2, 1>, scalar_prefetch = 0 : i64, scratch_operands = 0 : i64, tpu.core_type = #tpu.core_type<tc>, window_params = [{transform_indices = @transform_0, window_bounds = array<i64: 1, 128, 32>}, {transform_indices = @transform_1, window_bounds = array<i64: 1, 128, 32>}, {transform_indices = @transform_2, window_bounds = array<i64: 1, 128, 32>}, {pipeline_mode = #tpu.pipeline_mode<synchronous>, transform_indices = @transform_3, window_bounds = array<i64: 4, 32, 8>}, {pipeline_mode = #tpu.pipeline_mode<synchronous>, transform_indices = @transform_4, window_bounds = array<i64: 4, 1, 8>}, {pipeline_mode = #tpu.pipeline_mode<synchronous>, transform_indices = @transform_5, window_bounds = array<i64: 4, 32, 8>}, {pipeline_mode = #tpu.pipeline_mode<synchronous>, transform_indices = @transform_6, window_bounds = array<i64: 4, 1, 8>}, {pipeline_mode = #tpu.pipeline_mode<synchronous>, transform_indices = @transform_7, window_bounds = array<i64: 4, 32, 32>}, {pipeline_mode = #tpu.pipeline_mode<synchronous>, transform_indices = @transform_8, window_bounds = array<i64: 1, 32>}, {transform_indices = @transform_9, window_bounds = array<i64: 1, 128, 32>}, {transform_indices = @transform_10, window_bounds = array<i64: 1, 4, 128, 128>}]} {
    %c0 = arith.constant 0 : index
    %c0_0 = arith.constant 0 : index
    %c0_1 = arith.constant 0 : index
    %0 = vector.load %arg2[%c0, %c0_0, %c0_1] : memref<1x128x32xf32, #tpu.memory_space<vmem>>, vector<1x128x32xf32>
    %1 = vector.shape_cast %0 : vector<1x128x32xf32> to vector<128x32xf32>
    %c0_2 = arith.constant 0 : index
    %c0_3 = arith.constant 0 : index
    %c0_4 = arith.constant 0 : index
    %2 = vector.load %arg3[%c0_2, %c0_3, %c0_4] : memref<1x128x32xf32, #tpu.memory_space<vmem>>, vector<1x128x32xf32>
    %3 = vector.shape_cast %2 : vector<1x128x32xf32> to vector<128x32xf32>
    %c0_5 = arith.constant 0 : index
    %c0_6 = arith.constant 0 : index
    %c0_7 = arith.constant 0 : index
    %4 = vector.load %arg4[%c0_5, %c0_6, %c0_7] : memref<1x128x32xf32, #tpu.memory_space<vmem>>, vector<1x128x32xf32>
    %5 = vector.shape_cast %4 : vector<1x128x32xf32> to vector<128x32xf32>
    %cst = arith.constant 0.000000e+00 : f32
    %6 = vector.broadcast %cst : f32 to vector<128x32xf32>
    %c0_8 = arith.constant 0 : index
    %c0_9 = arith.constant 0 : index
    %c0_10 = arith.constant 0 : index
    %7 = vector.load %arg5[%c0_8, %c0_9, %c0_10] : memref<4x32x8xf32, #tpu.memory_space<vmem>>, vector<1x32x8xf32>
    %8 = vector.shape_cast %7 : vector<1x32x8xf32> to vector<32x8xf32>
    %cst_11 = arith.constant dense<0.000000e+00> : vector<128x8xf32>
    %9 = tpu.matmul %1, %8, %cst_11 {dimension_numbers = #tpu.dot_dimension_numbers<[1], [0], [0], [1], [0, 0, 1, 1], [], []>} : vector<128x32xf32>, vector<32x8xf32>, vector<128x8xf32> -> vector<128x8xf32>
    %c0_12 = arith.constant 0 : index
    %c0_13 = arith.constant 0 : index
    %c0_14 = arith.constant 0 : index
    %10 = vector.load %arg6[%c0_12, %c0_13, %c0_14] : memref<4x1x8xf32, #tpu.memory_space<vmem>>, vector<1x1x8xf32>
    %11 = vector.shape_cast %10 : vector<1x1x8xf32> to vector<1x8xf32>
    %12 = vector.broadcast %11 : vector<1x8xf32> to vector<128x8xf32>
    %13 = arith.addf %9, %12 : vector<128x8xf32>
    %c0_15 = arith.constant 0 : index
    %c0_16 = arith.constant 0 : index
    %c0_17 = arith.constant 0 : index
    %14 = vector.load %arg7[%c0_15, %c0_16, %c0_17] : memref<4x32x8xf32, #tpu.memory_space<vmem>>, vector<1x32x8xf32>
    %15 = vector.shape_cast %14 : vector<1x32x8xf32> to vector<32x8xf32>
    %cst_18 = arith.constant dense<0.000000e+00> : vector<128x8xf32>
    %16 = tpu.matmul %3, %15, %cst_18 {dimension_numbers = #tpu.dot_dimension_numbers<[1], [0], [0], [1], [0, 0, 1, 1], [], []>} : vector<128x32xf32>, vector<32x8xf32>, vector<128x8xf32> -> vector<128x8xf32>
    %c0_19 = arith.constant 0 : index
    %c0_20 = arith.constant 0 : index
    %c0_21 = arith.constant 0 : index
    %17 = vector.load %arg8[%c0_19, %c0_20, %c0_21] : memref<4x1x8xf32, #tpu.memory_space<vmem>>, vector<1x1x8xf32>
    %18 = vector.shape_cast %17 : vector<1x1x8xf32> to vector<1x8xf32>
    %19 = vector.broadcast %18 : vector<1x8xf32> to vector<128x8xf32>
    %20 = arith.addf %16, %19 : vector<128x8xf32>
    %cst_22 = arith.constant dense<0.000000e+00> : vector<128x128xf32>
    %21 = tpu.matmul %13, %20, %cst_22 {dimension_numbers = #tpu.dot_dimension_numbers<[1], [1], [0], [0], [0, 0, 1, 0], [], []>} : vector<128x8xf32>, vector<128x8xf32>, vector<128x128xf32> -> vector<128x128xf32>
    %c0_23 = arith.constant 0 : index
    %c0_24 = arith.constant 0 : index
    %c0_25 = arith.constant 0 : index
    %c0_26 = arith.constant 0 : index
    %22 = vector.load %arg12[%c0_23, %c0_24, %c0_25, %c0_26] : memref<1x4x128x128xf32, #tpu.memory_space<vmem>>, vector<1x1x128x128xf32>
    %23 = vector.shape_cast %22 : vector<1x1x128x128xf32> to vector<128x128xf32>
    %24 = vector.shape_cast %21 : vector<128x128xf32> to vector<1x1x128x128xf32>
    tpu.vector_store %arg12[%c0_23, %c0_24, %c0_25, %c0_26], %24 {strides = array<i32>} : memref<1x4x128x128xf32, #tpu.memory_space<vmem>>, vector<1x1x128x128xf32>,
    %cst_27 = arith.constant dense<0xFF800000> : vector<128xf32>
    %25 = vector.multi_reduction <maximumf>, %21, %cst_27 [1] : vector<128x128xf32> to vector<128xf32>
    %26 = vector.shape_cast %25 : vector<128xf32> to vector<128x1xf32>
    %27 = vector.broadcast %26 : vector<128x1xf32> to vector<128x128xf32>
    %28 = arith.subf %21, %27 : vector<128x128xf32>
    %29 = math.exp %28 : vector<128x128xf32>
    %cst_28 = arith.constant dense<0.000000e+00> : vector<128xf32>
    %30 = vector.multi_reduction <add>, %29, %cst_28 [1] : vector<128x128xf32> to vector<128xf32>
    %31 = vector.shape_cast %30 : vector<128xf32> to vector<128x1xf32>
    %32 = tpu.reciprocal %31 {approx = true} : vector<128x1xf32> -> vector<128x1xf32>
    %33 = vector.broadcast %32 : vector<128x1xf32> to vector<128x128xf32>
    %34 = arith.mulf %29, %33 : vector<128x128xf32>
    %c0_29 = arith.constant 0 : index
    %c0_30 = arith.constant 0 : index
    %c0_31 = arith.constant 0 : index
    %35 = vector.load %arg9[%c0_29, %c0_30, %c0_31] : memref<4x32x32xf32, #tpu.memory_space<vmem>>, vector<1x32x32xf32>
    %36 = vector.shape_cast %35 : vector<1x32x32xf32> to vector<32x32xf32>
    %cst_32 = arith.constant dense<0.000000e+00> : vector<128x32xf32>
    %37 = tpu.matmul %5, %36, %cst_32 {dimension_numbers = #tpu.dot_dimension_numbers<[1], [0], [0], [1], [0, 0, 1, 1], [], []>} : vector<128x32xf32>, vector<32x32xf32>, vector<128x32xf32> -> vector<128x32xf32>
    %cst_33 = arith.constant dense<0.000000e+00> : vector<128x32xf32>
    %38 = tpu.matmul %34, %37, %cst_33 {dimension_numbers = #tpu.dot_dimension_numbers<[1], [0], [0], [1], [0, 0, 1, 1], [], []>} : vector<128x128xf32>, vector<128x32xf32>, vector<128x32xf32> -> vector<128x32xf32>
    %39 = arith.addf %6, %38 : vector<128x32xf32>
    %c1 = arith.constant 1 : index
    %c0_34 = arith.constant 0 : index
    %c0_35 = arith.constant 0 : index
    %40 = vector.load %arg5[%c1, %c0_34, %c0_35] : memref<4x32x8xf32, #tpu.memory_space<vmem>>, vector<1x32x8xf32>
    %41 = vector.shape_cast %40 : vector<1x32x8xf32> to vector<32x8xf32>
    %cst_36 = arith.constant dense<0.000000e+00> : vector<128x8xf32>
    %42 = tpu.matmul %1, %41, %cst_36 {dimension_numbers = #tpu.dot_dimension_numbers<[1], [0], [0], [1], [0, 0, 1, 1], [], []>} : vector<128x32xf32>, vector<32x8xf32>, vector<128x8xf32> -> vector<128x8xf32>
    %c1_37 = arith.constant 1 : index
    %c0_38 = arith.constant 0 : index
    %c0_39 = arith.constant 0 : index
    %43 = vector.load %arg6[%c1_37, %c0_38, %c0_39] : memref<4x1x8xf32, #tpu.memory_space<vmem>>, vector<1x1x8xf32>
    %44 = vector.shape_cast %43 : vector<1x1x8xf32> to vector<1x8xf32>
    %45 = vector.broadcast %44 : vector<1x8xf32> to vector<128x8xf32>
    %46 = arith.addf %42, %45 : vector<128x8xf32>
    %c1_40 = arith.constant 1 : index
    %c0_41 = arith.constant 0 : index
    %c0_42 = arith.constant 0 : index
    %47 = vector.load %arg7[%c1_40, %c0_41, %c0_42] : memref<4x32x8xf32, #tpu.memory_space<vmem>>, vector<1x32x8xf32>
    %48 = vector.shape_cast %47 : vector<1x32x8xf32> to vector<32x8xf32>
    %cst_43 = arith.constant dense<0.000000e+00> : vector<128x8xf32>
    %49 = tpu.matmul %3, %48, %cst_43 {dimension_numbers = #tpu.dot_dimension_numbers<[1], [0], [0], [1], [0, 0, 1, 1], [], []>} : vector<128x32xf32>, vector<32x8xf32>, vector<128x8xf32> -> vector<128x8xf32>
    %c1_44 = arith.constant 1 : index
    %c0_45 = arith.constant 0 : index
    %c0_46 = arith.constant 0 : index
    %50 = vector.load %arg8[%c1_44, %c0_45, %c0_46] : memref<4x1x8xf32, #tpu.memory_space<vmem>>, vector<1x1x8xf32>
    %51 = vector.shape_cast %50 : vector<1x1x8xf32> to vector<1x8xf32>
    %52 = vector.broadcast %51 : vector<1x8xf32> to vector<128x8xf32>
    %53 = arith.addf %49, %52 : vector<128x8xf32>
    %cst_47 = arith.constant dense<0.000000e+00> : vector<128x128xf32>
    %54 = tpu.matmul %46, %53, %cst_47 {dimension_numbers = #tpu.dot_dimension_numbers<[1], [1], [0], [0], [0, 0, 1, 0], [], []>} : vector<128x8xf32>, vector<128x8xf32>, vector<128x128xf32> -> vector<128x128xf32>
    %c0_48 = arith.constant 0 : index
    %c1_49 = arith.constant 1 : index
    %c0_50 = arith.constant 0 : index
    %c0_51 = arith.constant 0 : index
    %55 = vector.load %arg12[%c0_48, %c1_49, %c0_50, %c0_51] : memref<1x4x128x128xf32, #tpu.memory_space<vmem>>, vector<1x1x128x128xf32>
    %56 = vector.shape_cast %55 : vector<1x1x128x128xf32> to vector<128x128xf32>
    %57 = vector.shape_cast %54 : vector<128x128xf32> to vector<1x1x128x128xf32>
    tpu.vector_store %arg12[%c0_48, %c1_49, %c0_50, %c0_51], %57 {strides = array<i32>} : memref<1x4x128x128xf32, #tpu.memory_space<vmem>>, vector<1x1x128x128xf32>,
    %cst_52 = arith.constant dense<0xFF800000> : vector<128xf32>
    %58 = vector.multi_reduction <maximumf>, %54, %cst_52 [1] : vector<128x128xf32> to vector<128xf32>
    %59 = vector.shape_cast %58 : vector<128xf32> to vector<128x1xf32>
    %60 = vector.broadcast %59 : vector<128x1xf32> to vector<128x128xf32>
    %61 = arith.subf %54, %60 : vector<128x128xf32>
    %62 = math.exp %61 : vector<128x128xf32>
    %cst_53 = arith.constant dense<0.000000e+00> : vector<128xf32>
    %63 = vector.multi_reduction <add>, %62, %cst_53 [1] : vector<128x128xf32> to vector<128xf32>
    %64 = vector.shape_cast %63 : vector<128xf32> to vector<128x1xf32>
    %65 = tpu.reciprocal %64 {approx = true} : vector<128x1xf32> -> vector<128x1xf32>
    %66 = vector.broadcast %65 : vector<128x1xf32> to vector<128x128xf32>
    %67 = arith.mulf %62, %66 : vector<128x128xf32>
    %c1_54 = arith.constant 1 : index
    %c0_55 = arith.constant 0 : index
    %c0_56 = arith.constant 0 : index
    %68 = vector.load %arg9[%c1_54, %c0_55, %c0_56] : memref<4x32x32xf32, #tpu.memory_space<vmem>>, vector<1x32x32xf32>
    %69 = vector.shape_cast %68 : vector<1x32x32xf32> to vector<32x32xf32>
    %cst_57 = arith.constant dense<0.000000e+00> : vector<128x32xf32>
    %70 = tpu.matmul %5, %69, %cst_57 {dimension_numbers = #tpu.dot_dimension_numbers<[1], [0], [0], [1], [0, 0, 1, 1], [], []>} : vector<128x32xf32>, vector<32x32xf32>, vector<128x32xf32> -> vector<128x32xf32>
    %cst_58 = arith.constant dense<0.000000e+00> : vector<128x32xf32>
    %71 = tpu.matmul %67, %70, %cst_58 {dimension_numbers = #tpu.dot_dimension_numbers<[1], [0], [0], [1], [0, 0, 1, 1], [], []>} : vector<128x128xf32>, vector<128x32xf32>, vector<128x32xf32> -> vector<128x32xf32>
    %72 = arith.addf %39, %71 : vector<128x32xf32>
    %c2 = arith.constant 2 : index
    %c0_59 = arith.constant 0 : index
    %c0_60 = arith.constant 0 : index
    %73 = vector.load %arg5[%c2, %c0_59, %c0_60] : memref<4x32x8xf32, #tpu.memory_space<vmem>>, vector<1x32x8xf32>
    %74 = vector.shape_cast %73 : vector<1x32x8xf32> to vector<32x8xf32>
    %cst_61 = arith.constant dense<0.000000e+00> : vector<128x8xf32>
    %75 = tpu.matmul %1, %74, %cst_61 {dimension_numbers = #tpu.dot_dimension_numbers<[1], [0], [0], [1], [0, 0, 1, 1], [], []>} : vector<128x32xf32>, vector<32x8xf32>, vector<128x8xf32> -> vector<128x8xf32>
    %c2_62 = arith.constant 2 : index
    %c0_63 = arith.constant 0 : index
    %c0_64 = arith.constant 0 : index
    %76 = vector.load %arg6[%c2_62, %c0_63, %c0_64] : memref<4x1x8xf32, #tpu.memory_space<vmem>>, vector<1x1x8xf32>
    %77 = vector.shape_cast %76 : vector<1x1x8xf32> to vector<1x8xf32>
    %78 = vector.broadcast %77 : vector<1x8xf32> to vector<128x8xf32>
    %79 = arith.addf %75, %78 : vector<128x8xf32>
    %c2_65 = arith.constant 2 : index
    %c0_66 = arith.constant 0 : index
    %c0_67 = arith.constant 0 : index
    %80 = vector.load %arg7[%c2_65, %c0_66, %c0_67] : memref<4x32x8xf32, #tpu.memory_space<vmem>>, vector<1x32x8xf32>
    %81 = vector.shape_cast %80 : vector<1x32x8xf32> to vector<32x8xf32>
    %cst_68 = arith.constant dense<0.000000e+00> : vector<128x8xf32>
    %82 = tpu.matmul %3, %81, %cst_68 {dimension_numbers = #tpu.dot_dimension_numbers<[1], [0], [0], [1], [0, 0, 1, 1], [], []>} : vector<128x32xf32>, vector<32x8xf32>, vector<128x8xf32> -> vector<128x8xf32>
    %c2_69 = arith.constant 2 : index
    %c0_70 = arith.constant 0 : index
    %c0_71 = arith.constant 0 : index
    %83 = vector.load %arg8[%c2_69, %c0_70, %c0_71] : memref<4x1x8xf32, #tpu.memory_space<vmem>>, vector<1x1x8xf32>
    %84 = vector.shape_cast %83 : vector<1x1x8xf32> to vector<1x8xf32>
    %85 = vector.broadcast %84 : vector<1x8xf32> to vector<128x8xf32>
    %86 = arith.addf %82, %85 : vector<128x8xf32>
    %cst_72 = arith.constant dense<0.000000e+00> : vector<128x128xf32>
    %87 = tpu.matmul %79, %86, %cst_72 {dimension_numbers = #tpu.dot_dimension_numbers<[1], [1], [0], [0], [0, 0, 1, 0], [], []>} : vector<128x8xf32>, vector<128x8xf32>, vector<128x128xf32> -> vector<128x128xf32>
    %c0_73 = arith.constant 0 : index
    %c2_74 = arith.constant 2 : index
    %c0_75 = arith.constant 0 : index
    %c0_76 = arith.constant 0 : index
    %88 = vector.load %arg12[%c0_73, %c2_74, %c0_75, %c0_76] : memref<1x4x128x128xf32, #tpu.memory_space<vmem>>, vector<1x1x128x128xf32>
    %89 = vector.shape_cast %88 : vector<1x1x128x128xf32> to vector<128x128xf32>
    %90 = vector.shape_cast %87 : vector<128x128xf32> to vector<1x1x128x128xf32>
    tpu.vector_store %arg12[%c0_73, %c2_74, %c0_75, %c0_76], %90 {strides = array<i32>} : memref<1x4x128x128xf32, #tpu.memory_space<vmem>>, vector<1x1x128x128xf32>,
    %cst_77 = arith.constant dense<0xFF800000> : vector<128xf32>
    %91 = vector.multi_reduction <maximumf>, %87, %cst_77 [1] : vector<128x128xf32> to vector<128xf32>
    %92 = vector.shape_cast %91 : vector<128xf32> to vector<128x1xf32>
    %93 = vector.broadcast %92 : vector<128x1xf32> to vector<128x128xf32>
    %94 = arith.subf %87, %93 : vector<128x128xf32>
    %95 = math.exp %94 : vector<128x128xf32>
    %cst_78 = arith.constant dense<0.000000e+00> : vector<128xf32>
    %96 = vector.multi_reduction <add>, %95, %cst_78 [1] : vector<128x128xf32> to vector<128xf32>
    %97 = vector.shape_cast %96 : vector<128xf32> to vector<128x1xf32>
    %98 = tpu.reciprocal %97 {approx = true} : vector<128x1xf32> -> vector<128x1xf32>
    %99 = vector.broadcast %98 : vector<128x1xf32> to vector<128x128xf32>
    %100 = arith.mulf %95, %99 : vector<128x128xf32>
    %c2_79 = arith.constant 2 : index
    %c0_80 = arith.constant 0 : index
    %c0_81 = arith.constant 0 : index
    %101 = vector.load %arg9[%c2_79, %c0_80, %c0_81] : memref<4x32x32xf32, #tpu.memory_space<vmem>>, vector<1x32x32xf32>
    %102 = vector.shape_cast %101 : vector<1x32x32xf32> to vector<32x32xf32>
    %cst_82 = arith.constant dense<0.000000e+00> : vector<128x32xf32>
    %103 = tpu.matmul %5, %102, %cst_82 {dimension_numbers = #tpu.dot_dimension_numbers<[1], [0], [0], [1], [0, 0, 1, 1], [], []>} : vector<128x32xf32>, vector<32x32xf32>, vector<128x32xf32> -> vector<128x32xf32>
    %cst_83 = arith.constant dense<0.000000e+00> : vector<128x32xf32>
    %104 = tpu.matmul %100, %103, %cst_83 {dimension_numbers = #tpu.dot_dimension_numbers<[1], [0], [0], [1], [0, 0, 1, 1], [], []>} : vector<128x128xf32>, vector<128x32xf32>, vector<128x32xf32> -> vector<128x32xf32>
    %105 = arith.addf %72, %104 : vector<128x32xf32>
    %c3 = arith.constant 3 : index
    %c0_84 = arith.constant 0 : index
    %c0_85 = arith.constant 0 : index
    %106 = vector.load %arg5[%c3, %c0_84, %c0_85] : memref<4x32x8xf32, #tpu.memory_space<vmem>>, vector<1x32x8xf32>
    %107 = vector.shape_cast %106 : vector<1x32x8xf32> to vector<32x8xf32>
    %cst_86 = arith.constant dense<0.000000e+00> : vector<128x8xf32>
    %108 = tpu.matmul %1, %107, %cst_86 {dimension_numbers = #tpu.dot_dimension_numbers<[1], [0], [0], [1], [0, 0, 1, 1], [], []>} : vector<128x32xf32>, vector<32x8xf32>, vector<128x8xf32> -> vector<128x8xf32>
    %c3_87 = arith.constant 3 : index
    %c0_88 = arith.constant 0 : index
    %c0_89 = arith.constant 0 : index
    %109 = vector.load %arg6[%c3_87, %c0_88, %c0_89] : memref<4x1x8xf32, #tpu.memory_space<vmem>>, vector<1x1x8xf32>
    %110 = vector.shape_cast %109 : vector<1x1x8xf32> to vector<1x8xf32>
    %111 = vector.broadcast %110 : vector<1x8xf32> to vector<128x8xf32>
    %112 = arith.addf %108, %111 : vector<128x8xf32>
    %c3_90 = arith.constant 3 : index
    %c0_91 = arith.constant 0 : index
    %c0_92 = arith.constant 0 : index
    %113 = vector.load %arg7[%c3_90, %c0_91, %c0_92] : memref<4x32x8xf32, #tpu.memory_space<vmem>>, vector<1x32x8xf32>
    %114 = vector.shape_cast %113 : vector<1x32x8xf32> to vector<32x8xf32>
    %cst_93 = arith.constant dense<0.000000e+00> : vector<128x8xf32>
    %115 = tpu.matmul %3, %114, %cst_93 {dimension_numbers = #tpu.dot_dimension_numbers<[1], [0], [0], [1], [0, 0, 1, 1], [], []>} : vector<128x32xf32>, vector<32x8xf32>, vector<128x8xf32> -> vector<128x8xf32>
    %c3_94 = arith.constant 3 : index
    %c0_95 = arith.constant 0 : index
    %c0_96 = arith.constant 0 : index
    %116 = vector.load %arg8[%c3_94, %c0_95, %c0_96] : memref<4x1x8xf32, #tpu.memory_space<vmem>>, vector<1x1x8xf32>
    %117 = vector.shape_cast %116 : vector<1x1x8xf32> to vector<1x8xf32>
    %118 = vector.broadcast %117 : vector<1x8xf32> to vector<128x8xf32>
    %119 = arith.addf %115, %118 : vector<128x8xf32>
    %cst_97 = arith.constant dense<0.000000e+00> : vector<128x128xf32>
    %120 = tpu.matmul %112, %119, %cst_97 {dimension_numbers = #tpu.dot_dimension_numbers<[1], [1], [0], [0], [0, 0, 1, 0], [], []>} : vector<128x8xf32>, vector<128x8xf32>, vector<128x128xf32> -> vector<128x128xf32>
    %c0_98 = arith.constant 0 : index
    %c3_99 = arith.constant 3 : index
    %c0_100 = arith.constant 0 : index
    %c0_101 = arith.constant 0 : index
    %121 = vector.load %arg12[%c0_98, %c3_99, %c0_100, %c0_101] : memref<1x4x128x128xf32, #tpu.memory_space<vmem>>, vector<1x1x128x128xf32>
    %122 = vector.shape_cast %121 : vector<1x1x128x128xf32> to vector<128x128xf32>
    %123 = vector.shape_cast %120 : vector<128x128xf32> to vector<1x1x128x128xf32>
    tpu.vector_store %arg12[%c0_98, %c3_99, %c0_100, %c0_101], %123 {strides = array<i32>} : memref<1x4x128x128xf32, #tpu.memory_space<vmem>>, vector<1x1x128x128xf32>,
    %cst_102 = arith.constant dense<0xFF800000> : vector<128xf32>
    %124 = vector.multi_reduction <maximumf>, %120, %cst_102 [1] : vector<128x128xf32> to vector<128xf32>
    %125 = vector.shape_cast %124 : vector<128xf32> to vector<128x1xf32>
    %126 = vector.broadcast %125 : vector<128x1xf32> to vector<128x128xf32>
    %127 = arith.subf %120, %126 : vector<128x128xf32>
    %128 = math.exp %127 : vector<128x128xf32>
    %cst_103 = arith.constant dense<0.000000e+00> : vector<128xf32>
    %129 = vector.multi_reduction <add>, %128, %cst_103 [1] : vector<128x128xf32> to vector<128xf32>
    %130 = vector.shape_cast %129 : vector<128xf32> to vector<128x1xf32>
    %131 = tpu.reciprocal %130 {approx = true} : vector<128x1xf32> -> vector<128x1xf32>
    %132 = vector.broadcast %131 : vector<128x1xf32> to vector<128x128xf32>
    %133 = arith.mulf %128, %132 : vector<128x128xf32>
    %c3_104 = arith.constant 3 : index
    %c0_105 = arith.constant 0 : index
    %c0_106 = arith.constant 0 : index
    %134 = vector.load %arg9[%c3_104, %c0_105, %c0_106] : memref<4x32x32xf32, #tpu.memory_space<vmem>>, vector<1x32x32xf32>
    %135 = vector.shape_cast %134 : vector<1x32x32xf32> to vector<32x32xf32>
    %cst_107 = arith.constant dense<0.000000e+00> : vector<128x32xf32>
    %136 = tpu.matmul %5, %135, %cst_107 {dimension_numbers = #tpu.dot_dimension_numbers<[1], [0], [0], [1], [0, 0, 1, 1], [], []>} : vector<128x32xf32>, vector<32x32xf32>, vector<128x32xf32> -> vector<128x32xf32>
    %cst_108 = arith.constant dense<0.000000e+00> : vector<128x32xf32>
    %137 = tpu.matmul %133, %136, %cst_108 {dimension_numbers = #tpu.dot_dimension_numbers<[1], [0], [0], [1], [0, 0, 1, 1], [], []>} : vector<128x128xf32>, vector<128x32xf32>, vector<128x32xf32> -> vector<128x32xf32>
    %138 = arith.addf %105, %137 : vector<128x32xf32>
    %c0_109 = arith.constant 0 : index
    %c0_110 = arith.constant 0 : index
    %139 = vector.load %arg10[%c0_109, %c0_110] : memref<1x32xf32, #tpu.memory_space<vmem>>, vector<1x32xf32>
    %140 = vector.broadcast %139 : vector<1x32xf32> to vector<128x32xf32>
    %141 = arith.addf %138, %140 : vector<128x32xf32>
    %c0_111 = arith.constant 0 : index
    %c0_112 = arith.constant 0 : index
    %c0_113 = arith.constant 0 : index
    %142 = vector.load %arg11[%c0_111, %c0_112, %c0_113] : memref<1x128x32xf32, #tpu.memory_space<vmem>>, vector<1x128x32xf32>
    %143 = vector.shape_cast %142 : vector<1x128x32xf32> to vector<128x32xf32>
    %144 = vector.shape_cast %141 : vector<128x32xf32> to vector<1x128x32xf32>
    tpu.vector_store %arg11[%c0_111, %c0_112, %c0_113], %144 {strides = array<i32>} : memref<1x128x32xf32, #tpu.memory_space<vmem>>, vector<1x128x32xf32>,
    return
  }
  func.func @transform_0(%arg0: i32, %arg1: i32) -> (i32, i32, i32) {
    %c0_i32 = arith.constant 0 : i32
    %c0_i32_0 = arith.constant 0 : i32
    return %arg0, %arg1, %c0_i32 : i32, i32, i32
  }
  func.func @transform_1(%arg0: i32, %arg1: i32) -> (i32, i32, i32) {
    %c0_i32 = arith.constant 0 : i32
    %c0_i32_0 = arith.constant 0 : i32
    %c0_i32_1 = arith.constant 0 : i32
    return %arg0, %c0_i32, %c0_i32_0 : i32, i32, i32
  }
  func.func @transform_2(%arg0: i32, %arg1: i32) -> (i32, i32, i32) {
    %c0_i32 = arith.constant 0 : i32
    %c0_i32_0 = arith.constant 0 : i32
    %c0_i32_1 = arith.constant 0 : i32
    return %arg0, %c0_i32, %c0_i32_0 : i32, i32, i32
  }
  func.func @transform_3(%arg0: i32, %arg1: i32) -> (i32, i32, i32) {
    %c0_i32 = arith.constant 0 : i32
    %c0_i32_0 = arith.constant 0 : i32
    %c0_i32_1 = arith.constant 0 : i32
    %c0_i32_2 = arith.constant 0 : i32
    return %c0_i32, %c0_i32_0, %c0_i32_1 : i32, i32, i32
  }
  func.func @transform_4(%arg0: i32, %arg1: i32) -> (i32, i32, i32) {
    %c0_i32 = arith.constant 0 : i32
    %c0_i32_0 = arith.constant 0 : i32
    %c0_i32_1 = arith.constant 0 : i32
    %c0_i32_2 = arith.constant 0 : i32
    return %c0_i32, %c0_i32_0, %c0_i32_1 : i32, i32, i32
  }
  func.func @transform_5(%arg0: i32, %arg1: i32) -> (i32, i32, i32) {
    %c0_i32 = arith.constant 0 : i32
    %c0_i32_0 = arith.constant 0 : i32
    %c0_i32_1 = arith.constant 0 : i32
    %c0_i32_2 = arith.constant 0 : i32
    return %c0_i32, %c0_i32_0, %c0_i32_1 : i32, i32, i32
  }
  func.func @transform_6(%arg0: i32, %arg1: i32) -> (i32, i32, i32) {
    %c0_i32 = arith.constant 0 : i32
    %c0_i32_0 = arith.constant 0 : i32
    %c0_i32_1 = arith.constant 0 : i32
    %c0_i32_2 = arith.constant 0 : i32
    return %c0_i32, %c0_i32_0, %c0_i32_1 : i32, i32, i32
  }
  func.func @transform_7(%arg0: i32, %arg1: i32) -> (i32, i32, i32) {
    %c0_i32 = arith.constant 0 : i32
    %c0_i32_0 = arith.constant 0 : i32
    %c0_i32_1 = arith.constant 0 : i32
    %c0_i32_2 = arith.constant 0 : i32
    return %c0_i32, %c0_i32_0, %c0_i32_1 : i32, i32, i32
  }
  func.func @transform_8(%arg0: i32, %arg1: i32) -> (i32, i32) {
    %c0_i32 = arith.constant 0 : i32
    %c0_i32_0 = arith.constant 0 : i32
    %c0_i32_1 = arith.constant 0 : i32
    return %c0_i32, %c0_i32_0 : i32, i32
  }
  func.func @transform_9(%arg0: i32, %arg1: i32) -> (i32, i32, i32) {
    %c0_i32 = arith.constant 0 : i32
    %c0_i32_0 = arith.constant 0 : i32
    return %arg0, %arg1, %c0_i32 : i32, i32, i32
  }
  func.func @transform_10(%arg0: i32, %arg1: i32) -> (i32, i32, i32, i32) {
    %c0_i32 = arith.constant 0 : i32
    %c0_i32_0 = arith.constant 0 : i32
    %c0_i32_1 = arith.constant 0 : i32
    return %arg0, %c0_i32, %arg1, %c0_i32_0 : i32, i32, i32, i32
  }
}

</mosaic_0001>

<bundles_post_ra>
// kernel: tpu_custom_call.1
= control target key start
LH: loop header
LB: loop body
LE: loop exit
PB: predicated region body
PF: predicated region fallthrough
CT: control target
= control target key end

     0   :  { %s6559_s0 = inlined_call_operand.vmem [shape: f32[2,128,32], index: 0, kind: input, shape index: {}]   ;;  %s6560_s1 = inlined_call_operand.vmem [shape: f32[2,128,32], index: 1, kind: input, shape index: {}]   ;;  %s6561_s2 = inlined_call_operand.vmem [shape: f32[2,128,32], index: 2, kind: input, shape index: {}]   ;;  %s6562_s3 = inlined_call_operand.vmem [shape: f32[4,32,8], index: 3, kind: input, shape index: {}]   ;;  %s6563_s4 = inlined_call_operand.vmem [shape: f32[4,1,8], index: 4, kind: input, shape index: {}]   ;;  %s6564_s5 = inlined_call_operand.vmem [shape: f32[4,32,8], index: 5, kind: input, shape index: {}]   ;;  %s6565_s6 = inlined_call_operand.vmem [shape: f32[4,1,8], index: 6, kind: input, shape index: {}]   ;;  %s6566_s7 = inlined_call_operand.vmem [shape: f32[4,32,32], index: 7, kind: input, shape index: {}]   ;;  %s6567_s8 = inlined_call_operand.vmem [shape: f32[1,32], index: 8, kind: input, shape index: {}]   ;;  %s6568_s9 = inlined_call_operand.vmem [shape: f32[2,128,32], index: 9, kind: output, shape index: {0}]   ;;  %s6569_s10 = inlined_call_operand.hbm [shape: f32[2,4,128,128], index: 10, kind: output, shape index: {1}]  }
   0x1   :  { %6591 = sst [smem:[#allocation42_spill]] %s6559_s0 }
   0x2   :  { %6592 = sst [smem:[#allocation43_spill]] %s6560_s1 }
   0x3   :  { %16 = vsyncpa [#allocation3], 0 }
   0x4   :  { %18 = vsyncpa [#allocation3 + $0x1], 0  ;;  %s4275_s13 = smov 0   ;;  %s4277_s14 = smov 0  }
   0x5   :  { %s4279_s15 = smov 0   ;;  %s4281_s16 = smov 0  }
   0x6   :  { %s4283_s17 = smov 0   ;;  %s4285_s18 = smov 0  }
   0x7 LB: > { %s3308_s19 = sadd.s32 4294967295, %s4216_s18   ;;  %s3309_s20 = sadd.s32 4294967294, %s4216_s18   ;;  %s4216_s18 = sphi %s4285_s18, %s24_s18   ;;  %s4212_s17 = sphi %s4283_s17, %s6706_s17   ;;  %s4208_s16 = sphi %s4281_s16, %s6705_s16   ;;  %s4204_s15 = sphi %s4279_s15, %s6704_s15   ;;  %s4200_s14 = sphi %s4277_s14, %s6703_s14   ;;  %s4196_s13 = sphi %s4275_s13, %s6702_s13  }
   0x8   : > { %s36_s21 = sadd.s32 1, %s4212_s17  ;;  %s279_s22 = sadd.s32 1, %s4204_s15 }
   0x9   : > { %p38_p0 = scmp.ge.s32.totalorder %s36_s21, 2  ;;  %p289_p1 = scmp.ne.s32.totalorder %s4204_s15, %s4200_s14 }
   0xa   : > { %p290_p2 = scmp.eq.s32.totalorder %s3308_s19, 1  ;;  %p295_p3 = scmp.ne.s32.totalorder %s4200_s14, %s4196_s13 }
   0xb   : > { %s6708_s21 = smov (%p38_p0, %s36_s21), 0  ;;  %p296_p5 = scmp.eq.s32.totalorder %s3309_s20, 1 }
   0xc   : > { %p4315_p4 = por %p290_p2, %p289_p1  ;;  %s274_s24 = ssub.s32 %s4212_s17, %s6708_s21 }
   0xd   : > { %p3312_p6 = scmp.ge.s32.totalorder %s4216_s18, 1  ;;  %p277_p7 = scmp.eq.s32.totalorder %s274_s24, 0 }
   0xe   : > { %p4322_p8 = por %p296_p5, %p295_p3  ;;  %p361_p9 = scmp.lt.s32.totalorder %s4216_s18, 3 }
   0xf   : > { %s4328_s26 = scalar_select %p277_p7, %s4204_s15, %s279_s22  }
  0x10   : > { %p362_p10 = pnand %p3312_p6, %p361_p9 }
  0x12   : > { %365 = sbr.rel (%p362_p10) target bundleno = 2256 (0x8d0), region = 56 }
  0x17   : > { %v504_v0 = vld [vmem:[%s6562_s3 + $0x18] sm:$0xff]  ;;  %v503_v1 = vld [vmem:[%s6562_s3 + $0x10] sm:$0xff]  ;;  %p423_p11 = scmp.lt.s32.totalorder %s4208_s16, 1  ;;  %v502_v2 = vld [vmem:[%s6562_s3 + $0x8] sm:$0xff]  ;;  %vm509_vm0 = vcmask 261120   ;;  %s6595_s0 = sld [smem:[#allocation42_spill]] }
  0x18   : > { %3742 = vmatpush.msra.mxu1 %v504_v0  ;;  %570 = vmatpush.msra.mxu0 %v504_v0  ;;  %v501_v3 = vld [vmem:[%s6562_s3] sm:$0xff]  ;;  %v626_v5 = vld [vmem:[%s6564_s5 + $0x18] sm:$0xff]  ;;  %v625_v6 = vld [vmem:[%s6564_s5 + $0x10] sm:$0xff]  ;;  %s6596_s1 = sld [smem:[#allocation43_spill]]  ;;  %vm744_vm1 = vcmask 64512   ;;  %s6585_s28 = sand.u32 1, %s4200_s14  }
  0x19   : > { %s424_s19 = scalar_select %p423_p11, %s4208_s16, 1  ;;  %3743 = vmatpush.msra.mxu3 %v504_v0  ;;  %v624_v7 = vld [vmem:[%s6564_s5 + $0x8] sm:$0xff]  ;;  %v623_v8 = vld [vmem:[%s6564_s5] sm:$0xff]  ;;  %v3426_v19 = vld [vmem:[%s6564_s5 + $0x38] sm:$0xff] }
  0x1a   : > { %3744 = vmatpush.msra.mxu1 %v503_v1  ;;  %571 = vmatpush.msra.mxu0 %v503_v1  ;;  %v3425_v22 = vld [vmem:[%s6564_s5 + $0x30] sm:$0xff]  ;;  %v3424_v23 = vld [vmem:[%s6564_s5 + $0x28] sm:$0xff]  ;;  %v3423_v25 = vld [vmem:[%s6564_s5 + $0x20] sm:$0xff]  ;;  %s3313_s11 = sshll.u32 %s6585_s28, 9  ;;  %s6677_s22 = sand.u32 1, %s4200_s14  }
  0x1b   : > { %s4344_s24 = sshll.u32 %s424_s19, 7  ;;  %3745 = vmatpush.msra.mxu3 %v503_v1  ;;  %v1069_v44 = vld [vmem:[%s6566_s7 + $0x18] sm:$0xff]  ;;  %v1068_v45 = vld [vmem:[%s6566_s7 + $0x10] sm:$0xff]  ;;  %v1067_v47 = vld [vmem:[%s6566_s7 + $0x8] sm:$0xff]  ;;  %s4955_s12 = scalar_lea.vmem [#allocation2], %s3313_s11 }
  0x1c   : > { %3746 = vmatpush.msra.mxu1 %v502_v2  ;;  %572 = vmatpush.msra.mxu0 %v502_v2  ;;  %s4549_s20 = scalar_lea.vmem %s6561_s2, %s4344_s24  ;;  %v1066_v49 = vld [vmem:[%s6566_s7] sm:$0xff]  ;;  %s6423_s27 = scalar_lea.vmem %s6568_s9, %s4344_s24 }
  0x1d   : > { %s4350_s29 = scalar_lea.vmem %s6595_s0, %s4344_s24  ;;  %3747 = vmatpush.msra.mxu3 %v502_v2  ;;  %v4562_v50 = vld [vmem:[%s4549_s20] sm:$0xff]  ;;  %v4576_v53 = vld [vmem:[%s4549_s20 + $0x8] sm:$0xff]  ;;  %v4590_v56 = vld [vmem:[%s4549_s20 + $0x10] sm:$0xff]  ;;  %s3165_s11 = sshll.u32 %s4955_s12, 4  ;;  %s3166_s11 = int_to_ptr.vmem [resolvable:$true] %s3165_s11 }
  0x1e   : > { %v4353_v4 = vld [vmem:[%s4350_s29 + $0x68] sm:$0xff]  ;;  %3748 = vmatpush.msra.mxu1 %v501_v3  ;;  %573 = vmatpush.msra.mxu0 %v501_v3  ;;  %s4370_s30 = scalar_lea.vmem %s6596_s1, %s4344_s24  ;;  %v4461_v28 = vld [vmem:[%s4350_s29] sm:$0xff]  ;;  %v4482_v33 = vld [vmem:[%s4350_s29 + $0x10] sm:$0xff]  ;;  %s3741_s24 = sshll.u32 %s4208_s16, 9 }
  0x1f   : > { %3335 = vmatmul.msk.f32.vlgmr.msra.gmra.mxu1 %vm509_vm0, %v4353_v4  ;;  %3749 = vmatpush.msra.mxu3 %v501_v3  ;;  %v4376_v9 = vld [vmem:[%s4370_s30] sm:$0xff]  ;;  %v4381_v10 = vld [vmem:[%s4370_s30 + $0x8] sm:$0xff]  ;;  %v4386_v11 = vld [vmem:[%s4370_s30 + $0x10] sm:$0xff] }
  0x20   : > { %691 = vmatpush.msrb.mxu1 %v626_v5  ;;  %6597 = vst [vmem:[#allocation5_spill] sm:$0xff] %v4376_v9  ;;  %v4391_v12 = vld [vmem:[%s4370_s30 + $0x18] sm:$0xff]  ;;  %v4396_v13 = vld [vmem:[%s4370_s30 + $0x20] sm:$0xff]  ;;  %v4401_v14 = vld [vmem:[%s4370_s30 + $0x28] sm:$0xff]  ;;  %3322 = vmatmul.msk.f32.vlgmr.msra.gmra.mxu0 %vm509_vm0, %v4461_v28 }
  0x21   : > { %6598 = vst [vmem:[#allocation6_spill] sm:$0xff] %v4381_v10  ;;  %v4406_v15 = vld [vmem:[%s4370_s30 + $0x30] sm:$0xff]  ;;  %v4411_v16 = vld [vmem:[%s4370_s30 + $0x38] sm:$0xff]  ;;  %v4416_v17 = vld [vmem:[%s4370_s30 + $0x40] sm:$0xff]  ;;  %1130 = vmatpush.msrb.mxu3 %v1069_v44 }
  0x22   : > { %692 = vmatpush.msrb.mxu1 %v625_v6  ;;  %6599 = vst [vmem:[#allocation7_spill] sm:$0xff] %v4386_v11  ;;  %v4421_v18 = vld [vmem:[%s4370_s30 + $0x48] sm:$0xff]  ;;  %v4429_v20 = vld [vmem:[%s4370_s30 + $0x50] sm:$0xff]  ;;  %v4434_v21 = vld [vmem:[%s4370_s30 + $0x58] sm:$0xff] }
  0x23   : > { %6600 = vst [vmem:[#allocation8_spill] sm:$0xff] %v4391_v12  ;;  %v4445_v24 = vld [vmem:[%s4370_s30 + $0x60] sm:$0xff]  ;;  %v4453_v26 = vld [vmem:[%s4370_s30 + $0x68] sm:$0xff]  ;;  %v4458_v27 = vld [vmem:[%s4370_s30 + $0x70] sm:$0xff]  ;;  %1131 = vmatpush.msrb.mxu3 %v1068_v45 }
  0x24   : > { %693 = vmatpush.msrb.mxu1 %v624_v7  ;;  %6601 = vst [vmem:[#allocation9_spill] sm:$0xff] %v4396_v13  ;;  %v4470_v30 = vld [vmem:[%s4370_s30 + $0x78] sm:$0xff]  ;;  %v4473_v31 = vld [vmem:[%s4350_s29 + $0x8] sm:$0xff]  ;;  %v4500_v37 = vld [vmem:[%s4350_s29 + $0x20] sm:$0xff] }
  0x25   : > { %6602 = vst [vmem:[#allocation10_spill] sm:$0xff] %v4401_v14  ;;  %v4491_v35 = vld [vmem:[%s4350_s29 + $0x18] sm:$0xff]  ;;  %v4509_v39 = vld [vmem:[%s4350_s29 + $0x28] sm:$0xff]  ;;  %v4516_v40 = vld [vmem:[%s4350_s29 + $0x70] sm:$0xff]  ;;  %1132 = vmatpush.msrb.mxu3 %v1067_v47 }
  0x26   : > { %694 = vmatpush.msrb.mxu1 %v623_v8  ;;  %6603 = vst [vmem:[#allocation11_spill] sm:$0xff] %v4406_v15  ;;  %3336 = vmatmul.msk.f32.vlgmr.msra.gmra.mxu3 %vm509_vm0, %v4516_v40  ;;  %v4523_v42 = vld [vmem:[%s4350_s29 + $0x30] sm:$0xff]  ;;  %v4530_v43 = vld [vmem:[%s4350_s29 + $0x78] sm:$0xff]  ;;  %v4569_v52 = vld [vmem:[%s4350_s29 + $0x40] sm:$0xff] }
  0x27   : > { %3338 = vmatmul.msk.f32.vlgmr.msrb.gmra.mxu1 %vm509_vm0, %v4376_v9  ;;  %6604 = vst [vmem:[#allocation12_spill] sm:$0xff] %v4411_v16  ;;  %v4552_v48 = vld [vmem:[%s4350_s29 + $0x38] sm:$0xff]  ;;  %1133 = vmatpush.msrb.mxu3 %v1066_v49  ;;  %v4583_v55 = vld [vmem:[%s4350_s29 + $0x48] sm:$0xff]  ;;  %v4597_v58 = vld [vmem:[%s4350_s29 + $0x50] sm:$0xff] }
  0x28   : > { %6605 = vst [vmem:[#allocation13_spill] sm:$0xff] %v4416_v17  ;;  %1280 = vmatpush.msra.mxu1 %v3426_v19  ;;  %3323 = vmatmul.msk.f32.gmra.mxu0 %vm509_vm0, %v4473_v31  ;;  %v4604_v59 = vld [vmem:[%s4549_s20 + $0x18] sm:$0xff]  ;;  %v4616_v62 = vld [vmem:[%s4549_s20 + $0x20] sm:$0xff]  ;;  %v4628_v1 = vld [vmem:[%s4549_s20 + $0x28] sm:$0xff] }
  0x29   : > { %6606 = vst [vmem:[#allocation14_spill] sm:$0xff] %v4421_v18  ;;  %v4609_v61 = vld [vmem:[%s4350_s29 + $0x58] sm:$0xff]  ;;  %v4621_v0 = vld [vmem:[%s4350_s29 + $0x60] sm:$0xff]  ;;  %v4635_v3 = vld [vmem:[%s4549_s20 + $0x30] sm:$0xff] }
  0x2a   : > { %6607 = vst [vmem:[#allocation15_spill] sm:$0xff] %v4429_v20  ;;  %1281 = vmatpush.msra.mxu1 %v3425_v22  ;;  %v4642_v6 = vld [vmem:[%s4549_s20 + $0x38] sm:$0xff]  ;;  %v4649_v8 = vld [vmem:[%s4549_s20 + $0x40] sm:$0xff] }
  0x2b   : > { %6608 = vst [vmem:[#allocation16_spill] sm:$0xff] %v4434_v21 }
  0x2c   : > { %6609 = vst [vmem:[#allocation17_spill] sm:$0xff] %v4445_v24  ;;  %1282 = vmatpush.msra.mxu1 %v3424_v23  ;;  %v4658_v23 = vld [vmem:[%s4549_s20 + $0x48] sm:$0xff] }
  0x2d   : > { %6610 = vst [vmem:[#allocation18_spill] sm:$0xff] %v4453_v26 }
  0x2e   : > { %1283 = vmatpush.msra.mxu1 %v3423_v25  ;;  %3337 = vmatmul.msk.f32.gmra.mxu3 %vm509_vm0, %v4530_v43  ;;  %v4665_v25 = vld [vmem:[%s6565_s6] ss:$0 sm:$0xff] }
  0x2f   : > { %3339 = vmatmul.msk.f32.gmra.mxu1 %vm509_vm0, %v4381_v10 }
  0x30   : > { %3324 = vmatmul.msk.f32.gmra.mxu0 %vm509_vm0, %v4482_v33 }
  0x36   : > { %3386 = vmatmul.msk.f32.vlgmr.msrb.gmra.mxu3 %vm509_vm0, %v4562_v50 }
  0x37   : > { %3340 = vmatmul.msk.f32.gmra.mxu1 %vm509_vm0, %v4386_v11 }
  0x38   : > { %3325 = vmatmul.msk.f32.gmra.mxu0 %vm509_vm0, %v4491_v35 }
  0x3e   : > { %3387 = vmatmul.msk.f32.gmra.mxu3 %vm509_vm0, %v4576_v53 }
  0x3f   : > { %3341 = vmatmul.msk.f32.gmra.mxu1 %vm509_vm0, %v4391_v12 }
  0x40   : > { %3326 = vmatmul.msk.f32.gmra.mxu0 %vm509_vm0, %v4500_v37 }
  0x46   : > { %3388 = vmatmul.msk.f32.gmra.mxu3 %vm509_vm0, %v4590_v56 }
  0x47   : > { %3342 = vmatmul.msk.f32.gmra.mxu1 %vm509_vm0, %v4396_v13 }
  0x48   : > { %3327 = vmatmul.msk.f32.gmra.mxu0 %vm509_vm0, %v4509_v39 }
  0x4e   : > { %3389 = vmatmul.msk.f32.gmra.mxu3 %vm509_vm0, %v4604_v59 }
  0x4f   : > { %3343 = vmatmul.msk.f32.gmra.mxu1 %vm509_vm0, %v4401_v14 }
  0x50   : > { %3328 = vmatmul.msk.f32.gmra.mxu0 %vm509_vm0, %v4523_v42 }
  0x56   : > { %3390 = vmatmul.msk.f32.gmra.mxu3 %vm509_vm0, %v4616_v62 }
  0x57   : > { %3344 = vmatmul.msk.f32.gmra.mxu1 %vm509_vm0, %v4406_v15 }
  0x58   : > { %3329 = vmatmul.msk.f32.gmra.mxu0 %vm509_vm0, %v4552_v48 }
  0x5e   : > { %3391 = vmatmul.msk.f32.gmra.mxu3 %vm509_vm0, %v4628_v1 }
  0x5f   : > { %3345 = vmatmul.msk.f32.gmra.mxu1 %vm509_vm0, %v4411_v16 }
  0x60   : > { %3330 = vmatmul.msk.f32.gmra.mxu0 %vm509_vm0, %v4569_v52 }
  0x66   : > { %3392 = vmatmul.msk.f32.gmra.mxu3 %vm509_vm0, %v4635_v3 }
  0x67   : > { %3346 = vmatmul.msk.f32.gmra.mxu1 %vm509_vm0, %v4416_v17 }
  0x68   : > { %3331 = vmatmul.msk.f32.gmra.mxu0 %vm509_vm0, %v4583_v55 }
  0x6e   : > { %3393 = vmatmul.msk.f32.gmra.mxu3 %vm509_vm0, %v4642_v6 }
  0x6f   : > { %3347 = vmatmul.msk.f32.gmra.mxu1 %vm509_vm0, %v4421_v18 }
  0x70   : > { %3332 = vmatmul.msk.f32.gmra.mxu0 %vm509_vm0, %v4597_v58 }
  0x76   : > { %3394 = vmatmul.msk.f32.gmra.mxu3 %vm509_vm0, %v4649_v8 }
  0x77   : > { %3348 = vmatmul.msk.f32.gmra.mxu1 %vm509_vm0, %v4429_v20 }
  0x78   : > { %3333 = vmatmul.msk.f32.gmra.mxu0 %vm509_vm0, %v4609_v61 }
  0x7e   : > { %3395 = vmatmul.msk.f32.gmra.mxu3 %vm509_vm0, %v4658_v23 }
  0x7f   : > { %3349 = vmatmul.msk.f32.gmra.mxu1 %vm509_vm0, %v4434_v21 }
  0x80   : > { %3334 = vmatmul.msk.f32.gmra.mxu0 %vm509_vm0, %v4621_v0 }
  0x87   : > { %3350 = vmatmul.msk.f32.gmra.mxu1 %vm509_vm0, %v4445_v24 }
  0x8f   : > { %3351 = vmatmul.msk.f32.gmra.mxu1 %vm509_vm0, %v4453_v26 }
  0x97   : > { %3352 = vmatmul.msk.f32.gmra.mxu1 %vm509_vm0, %v4458_v27 }
  0x9c   : > { %v4467_v29 = vpop.f32.mrf.mxu1 }
  0x9d   : > { %v4655_v22 = vpop.f32.mrf.mxu0 }
  0x9f   : > { %3353 = vmatmul.msk.f32.gmra.mxu1 %vm509_vm0, %v4470_v30 }
  0xa4   : > { %v4479_v32 = vpop.f32.mrf.mxu1 }
  0xa5   : > { %v4676_v49 = vpop.f32.mrf.mxu0 }
  0xa7   : > { %3428 = vmatmul.msk.f32.vlgmr.msra.gmra.mxu1 %vm509_vm0, %v4376_v9 }
  0xac   : > { %v4488_v34 = vpop.f32.mrf.mxu1 }
  0xaf   : > { %3429 = vmatmul.msk.f32.gmra.mxu1 %vm509_vm0, %v4381_v10 }
  0xb4   : > { %v4497_v36 = vpop.f32.mrf.mxu1 }
  0xb7   : > { %3430 = vmatmul.msk.f32.gmra.mxu1 %vm509_vm0, %v4386_v11 }
  0xbc   : > { %v4506_v38 = vpop.f32.mrf.mxu1 }
  0xbf   : > { %3431 = vmatmul.msk.f32.gmra.mxu1 %vm509_vm0, %v4391_v12 }
  0xc4   : > { %v4520_v41 = vpop.f32.mrf.mxu1 }
  0xc7   : > { %3432 = vmatmul.msk.f32.gmra.mxu1 %vm509_vm0, %v4396_v13  ;;  %v3402_v13 = vld [vmem:[%s6562_s3 + $0x20] sm:$0xff] }
  0xcc   : > { %v4540_v46 = vpop.f32.mrf.mxu1 }
  0xcf   : > { %3433 = vmatmul.msk.f32.gmra.mxu1 %vm509_vm0, %v4401_v14 }
  0xd4   : > { %v4566_v51 = vpop.f32.mrf.mxu1 }
  0xd7   : > { %3434 = vmatmul.msk.f32.gmra.mxu1 %vm509_vm0, %v4406_v15  ;;  %v700_v15 = vadd.f32 %v4665_v25, %v4488_v34 }
  0xdc   : > { %v4580_v54 = vpop.f32.mrf.mxu1 }
  0xdf   : > { %3435 = vmatmul.msk.f32.gmra.mxu1 %vm509_vm0, %v4411_v16 }
  0xe4   : > { %v4594_v57 = vpop.f32.mrf.mxu1 }
  0xe7   : > { %3436 = vmatmul.msk.f32.gmra.mxu1 %vm509_vm0, %v4416_v17  ;;  %v706_v17 = vadd.f32 %v4665_v25, %v4506_v38 }
  0xec   : > { %v723_v60 = vpop.f32.mrf.mxu1 }
  0xef   : > { %3437 = vmatmul.msk.f32.gmra.mxu1 %vm509_vm0, %v4421_v18 }
  0xf4   : > { %v726_v63 = vpop.f32.mrf.mxu1 }
  0xf7   : > { %3438 = vmatmul.msk.f32.gmra.mxu1 %vm509_vm0, %v4429_v20  ;;  %v712_v20 = vadd.f32 %v4665_v25, %v4540_v46 }
  0xfc   : > { %v729_v2 = vpop.f32.mrf.mxu1 }
  0xff   : > { %3439 = vmatmul.msk.f32.gmra.mxu1 %vm509_vm0, %v4434_v21  ;;  %v4731_v21 = vld [vmem:[%s4549_s20 + $0x70] sm:$0xff] }
 0x104   : > { %v732_v5 = vpop.f32.mrf.mxu1 }
 0x107   : > { %3440 = vmatmul.msk.f32.gmra.mxu1 %vm509_vm0, %v4445_v24 }
 0x10c   : > { %v735_v7 = vpop.f32.mrf.mxu1 }
 0x10f   : > { %3441 = vmatmul.msk.f32.gmra.mxu1 %vm509_vm0, %v4453_v26 }
 0x114   : > { %v738_v19 = vpop.f32.mrf.mxu1 }
 0x115   : > { %v739_v47 = vadd.f32 %v4665_v25, %v738_v19  ;;  %v733_v19 = vadd.f32 %v4665_v25, %v732_v5  ;;  %v727_v5 = vadd.f32 %v4665_v25, %v726_v63  ;;  %v721_v63 = vadd.f32 %v4665_v25, %v4594_v57 }
 0x117   : > { %3442 = vmatmul.msk.f32.gmra.mxu1 %vm509_vm0, %v4458_v27  ;;  %v4671_v27 = vld [vmem:[%s4549_s20 + $0x50] sm:$0xff] }
 0x118   : > { %3396 = vmatmul.msk.f32.gmra.mxu3 %vm509_vm0, %v4671_v27 }
 0x11c   : > { %v741_v44 = vpop.f32.mrf.mxu1 }
 0x11d   : > { %v742_v45 = vadd.f32 %v4665_v25, %v741_v44 }
 0x11f   : > { %3354 = vmatpush.xpose.msk.msrb.mxu0 %vm744_vm1, %v742_v45  ;;  %3750 = vmatpush.xpose.msk.msra.mxu2 %vm744_vm1, %v742_v45  ;;  %v736_v45 = vadd.f32 %v4665_v25, %v735_v7  ;;  %v730_v7 = vadd.f32 %v4665_v25, %v729_v2  ;;  %v724_v2 = vadd.f32 %v4665_v25, %v723_v60 }
 0x120   : > { %3443 = vmatmul.msk.f32.gmra.mxu1 %vm509_vm0, %v4470_v30  ;;  %v4688_v30 = vld [vmem:[%s4549_s20 + $0x58] sm:$0xff] }
 0x121   : > { %3397 = vmatmul.msk.f32.gmra.mxu3 %vm509_vm0, %v4688_v30 }
 0x123   : > { %3355 = vmatpush.xpose.msk.msrb.mxu0 %vm744_vm1, %v739_v47  ;;  %3751 = vmatpush.xpose.msk.msra.mxu2 %vm744_vm1, %v739_v47  ;;  %v4695_v47 = vpop.f32.mrf.mxu0 }
 0x124   : > { %v4682_v44 = vpop.f32.mrf.mxu1 }
 0x127   : > { %3356 = vmatpush.xpose.msk.msrb.mxu0 %vm744_vm1, %v736_v45  ;;  %3752 = vmatpush.xpose.msk.msra.mxu2 %vm744_vm1, %v736_v45  ;;  %v4703_v45 = vld [vmem:[%s4549_s20 + $0x60] sm:$0xff] }
 0x129   : > { %3398 = vmatmul.msk.f32.gmra.mxu3 %vm509_vm0, %v4703_v45 }
 0x12b   : > { %3357 = vmatpush.xpose.msk.msrb.mxu0 %vm744_vm1, %v733_v19  ;;  %3753 = vmatpush.xpose.msk.msra.mxu2 %vm744_vm1, %v733_v19  ;;  %v4713_v24 = vpop.f32.mrf.mxu0 }
 0x12c   : > { %v4697_v26 = vpop.f32.mrf.mxu1 }
 0x12f   : > { %3358 = vmatpush.xpose.msk.msrb.mxu0 %vm744_vm1, %v730_v7  ;;  %3754 = vmatpush.xpose.msk.msra.mxu2 %vm744_vm1, %v730_v7  ;;  %v4718_v7 = vld [vmem:[%s4549_s20 + $0x68] sm:$0xff] }
 0x131   : > { %3399 = vmatmul.msk.f32.gmra.mxu3 %vm509_vm0, %v4718_v7 }
 0x133   : > { %3359 = vmatpush.xpose.msk.msrb.mxu0 %vm744_vm1, %v727_v5  ;;  %3755 = vmatpush.xpose.msk.msra.mxu2 %vm744_vm1, %v727_v5  ;;  %v718_v5 = vadd.f32 %v4665_v25, %v4580_v54  ;;  %v4735_v57 = vpop.f32.mrf.mxu0 }
 0x134   : > { %v4710_v19 = vpop.f32.mrf.mxu1 }
 0x137   : > { %3360 = vmatpush.xpose.msk.msrb.mxu0 %vm744_vm1, %v724_v2  ;;  %3756 = vmatpush.xpose.msk.msra.mxu2 %vm744_vm1, %v724_v2  ;;  %v715_v2 = vadd.f32 %v4665_v25, %v4566_v51  ;;  %v709_v51 = vadd.f32 %v4665_v25, %v4520_v41 }
 0x139   : > { %3400 = vmatmul.msk.f32.gmra.mxu3 %vm509_vm0, %v4731_v21 }
 0x13b   : > { %3361 = vmatpush.xpose.msk.msrb.mxu0 %vm744_vm1, %v721_v63  ;;  %3757 = vmatpush.xpose.msk.msra.mxu2 %vm744_vm1, %v721_v63  ;;  %v4743_v63 = vpop.f32.mrf.mxu3  ;;  %v590_v18 = vpop.f32.mrf.mxu0 }
 0x13c   : > { %v4726_v60 = vpop.f32.mrf.mxu1 }
 0x13f   : > { %3362 = vmatpush.xpose.msk.msrb.mxu0 %vm744_vm1, %v718_v5  ;;  %3758 = vmatpush.xpose.msk.msra.mxu2 %vm744_vm1, %v718_v5  ;;  %v4750_v5 = vld [vmem:[%s4549_s20 + $0x78] sm:$0xff] }
 0x140   : > { %6611 = vst [vmem:[#allocation19_spill] sm:$0xff] %v4750_v5 }
 0x141   : > { %3401 = vmatmul.msk.f32.gmra.mxu3 %vm509_vm0, %v4750_v5 }
 0x143   : > { %3363 = vmatpush.xpose.msk.msrb.mxu0 %vm744_vm1, %v715_v2  ;;  %3759 = vmatpush.xpose.msk.msra.mxu2 %vm744_vm1, %v715_v2  ;;  %v4760_v2 = vpop.f32.mrf.mxu3  ;;  %v593_v41 = vpop.f32.mrf.mxu0 }
 0x144   : > { %v4745_v54 = vpop.f32.mrf.mxu1 }
 0x147   : > { %3364 = vmatpush.xpose.msk.msrb.mxu0 %vm744_vm1, %v712_v20  ;;  %3760 = vmatpush.xpose.msk.msra.mxu2 %vm744_vm1, %v712_v20  ;;  %v703_v20 = vadd.f32 %v4665_v25, %v4497_v36  ;;  %v697_v36 = vadd.f32 %v4665_v25, %v4479_v32  ;;  %v3405_v32 = vld [vmem:[%s6562_s3 + $0x38] sm:$0xff] }
 0x14b   : > { %3365 = vmatpush.xpose.msk.msrb.mxu0 %vm744_vm1, %v709_v51  ;;  %3761 = vmatpush.xpose.msk.msra.mxu2 %vm744_vm1, %v709_v51  ;;  %v4772_v51 = vpop.f32.mrf.mxu3  ;;  %v596_v14 = vpop.f32.mrf.mxu0 }
 0x14c   : > { %v4762_v46 = vpop.f32.mrf.mxu1 }
 0x14f   : > { %3366 = vmatpush.xpose.msk.msrb.mxu0 %vm744_vm1, %v706_v17  ;;  %3762 = vmatpush.xpose.msk.msra.mxu2 %vm744_vm1, %v706_v17  ;;  %v4783_v17 = vld [vmem:[%s6563_s4] ss:$0 sm:$0xff] }
 0x150   : > { %v576_v38 = vadd.f32 %v4783_v17, %v4655_v22  ;;  %v3403_v22 = vld [vmem:[%s6562_s3 + $0x28] sm:$0xff]  ;;  %v579_v25 = vadd.f32 %v4783_v17, %v4676_v49  ;;  %v582_v49 = vadd.f32 %v4783_v17, %v4695_v47 }
 0x153   : > { %3367 = vmatpush.xpose.msk.msrb.mxu0 %vm744_vm1, %v703_v20  ;;  %3763 = vmatpush.xpose.msk.msra.mxu2 %vm744_vm1, %v703_v20  ;;  %v591_v20 = vadd.f32 %v4783_v17, %v590_v18  ;;  %v4792_v34 = vpop.f32.mrf.mxu3  ;;  %v3404_v18 = vld [vmem:[%s6562_s3 + $0x30] sm:$0xff] }
 0x154   : > { %v4774_v16 = vpop.f32.mrf.mxu1 }
 0x157   : > { %3368 = vmatpush.xpose.msk.msrb.mxu0 %vm744_vm1, %v700_v15  ;;  %3764 = vmatpush.xpose.msk.msra.mxu2 %vm744_vm1, %v700_v15 }
 0x15b   : > { %3369 = vmatpush.xpose.msk.msrb.mxu0 %vm744_vm1, %v697_v36  ;;  %3765 = vmatpush.xpose.msk.msra.mxu2 %vm744_vm1, %v697_v36  ;;  %v594_v36 = vadd.f32 %v4783_v17, %v593_v41  ;;  %v597_v41 = vadd.f32 %v4783_v17, %v596_v14  ;;  %v588_v14 = vadd.f32 %v4783_v17, %v4735_v57 }
 0x15c   : > { %v4794_v15 = vpop.f32.mrf.mxu1 }
 0x15e   : > { %3370 = vmatmul.msk.f32.vlgmr.msrb.gmra.mxu0 %vm744_vm1, %v576_v38  ;;  %3375 = vmatmul.msk.f32.vlgmr.msra.gmra.mxu2 %vm744_vm1, %v591_v20  ;;  %v4810_v38 = vpop.f32.mrf.mxu3 }
 0x15f   : > { %1205 = vmatpush.msra.mxu0 %v3405_v32  ;;  %v599_v32 = vpop.f32.mrf.mxu0 }
 0x161   : > { %1206 = vmatpush.msra.mxu0 %v3404_v18 }
 0x163   : > { %1207 = vmatpush.msra.mxu0 %v3403_v22 }
 0x164   : > { %v4812_v20 = vpop.f32.mrf.mxu1 }
 0x165   : > { %1208 = vmatpush.msra.mxu0 %v3402_v13 }
 0x166   : > { %3371 = vmatmul.msk.f32.gmra.mxu0 %vm744_vm1, %v579_v25  ;;  %3376 = vmatmul.msk.f32.gmra.mxu2 %vm744_vm1, %v594_v36  ;;  %v4822_v18 = vpop.f32.mrf.mxu3  ;;  %v585_v25 = vadd.f32 %v4783_v17, %v4713_v24  ;;  %v600_v36 = vadd.f32 %v4783_v17, %v599_v32 }
 0x167   : > { %v602_v12 = vpop.f32.mrf.mxu0 }
 0x168   : > { %v603_v47 = vadd.f32 %v4783_v17, %v602_v12 }
 0x16c   : > { %v1312_v22 = vpop.f32.mrf.mxu1 }
 0x16e   : > { %3372 = vmatmul.msk.f32.gmra.mxu0 %vm744_vm1, %v582_v49  ;;  %3377 = vmatmul.msk.f32.gmra.mxu2 %vm744_vm1, %v597_v41  ;;  %v4829_v11 = vpop.f32.mrf.mxu3 }
 0x16f   : > { %v605_v49 = vpop.f32.mrf.mxu0 }
 0x170   : > { %v606_v24 = vadd.f32 %v4783_v17, %v605_v49 }
 0x174   : > { %v1315_v13 = vpop.f32.mrf.mxu1 }
 0x176   : > { %3373 = vmatmul.msk.f32.gmra.mxu0 %vm744_vm1, %v585_v25  ;;  %3378 = vmatmul.msk.f32.gmra.mxu2 %vm744_vm1, %v600_v36  ;;  %v4836_v41 = vpop.f32.mrf.mxu3 }
 0x177   : > { %v608_v25 = vpop.f32.mrf.mxu0 }
 0x178   : > { %v609_v12 = vadd.f32 %v4783_v17, %v608_v25 }
 0x17c   : > { %v1318_v10 = vpop.f32.mrf.mxu1 }
 0x17e   : > { %3374 = vmatmul.msk.f32.gmra.mxu0 %vm744_vm1, %v588_v14  ;;  %3379 = vmatmul.msk.f32.gmra.mxu2 %vm744_vm1, %v603_v47  ;;  %v4841_v9 = vpop.f32.mrf.mxu3 }
 0x17f   : > { %v611_v14 = vpop.f32.mrf.mxu0 }
 0x180   : > { %v612_v47 = vadd.f32 %v4783_v17, %v611_v14 }
 0x184   : > { %v1321_v32 = vpop.f32.mrf.mxu1 }
 0x186   : > { %3380 = vmatmul.msk.f32.gmra.mxu2 %vm744_vm1, %v606_v24  ;;  %3407 = vmatmul.msk.f32.vlgmr.msra.gmra.mxu0 %vm509_vm0, %v4461_v28  ;;  %v4847_v36 = vpop.f32.mrf.mxu3  ;;  %v615_v28 = vadd.f32 %v4783_v17, %v4467_v29  ;;  %v4863_v24 = vld [vmem:[%s6565_s6 + $0x1] ss:$0 sm:$0xff]  ;;  %v618_v29 = vadd.f32 %v4783_v17, %v4743_v63 }
 0x18c   : > { %v1324_v57 = vpop.f32.mrf.mxu1 }
 0x18d   : > { %v1325_v14 = vadd.f32 %v4863_v24, %v1324_v57  ;;  %v1319_v57 = vadd.f32 %v4863_v24, %v1318_v10  ;;  %v1310_v10 = vadd.f32 %v4863_v24, %v4812_v20  ;;  %v3493_v20 = vld [vmem:[%s6566_s7 + $0x28] sm:$0xff] }
 0x18e   : > { %3381 = vmatmul.msk.f32.gmra.mxu2 %vm744_vm1, %v609_v12  ;;  %3408 = vmatmul.msk.f32.gmra.mxu0 %vm509_vm0, %v4473_v31  ;;  %v4853_v5 = vpop.f32.mrf.mxu3 }
 0x194   : > { %v1327_v49 = vpop.f32.mrf.mxu1 }
 0x196   : > { %3382 = vmatmul.msk.f32.gmra.mxu2 %vm744_vm1, %v612_v47  ;;  %3409 = vmatmul.msk.f32.gmra.mxu0 %vm509_vm0, %v4482_v33  ;;  %v4865_v31 = vpop.f32.mrf.mxu3  ;;  %v1328_v33 = vadd.f32 %v4863_v24, %v1327_v49  ;;  %v1313_v49 = vadd.f32 %v4863_v24, %v1312_v22  ;;  %v1304_v22 = vadd.f32 %v4863_v24, %v4774_v16 }
 0x197   : > { %v1298_v16 = vadd.f32 %v4863_v24, %v4745_v54 }
 0x19d   : > { %v1330_v25 = vpop.f32.mrf.mxu1 }
 0x19e   : > { %v1331_v12 = vadd.f32 %v4863_v24, %v1330_v25  ;;  %3383 = vmatmul.msk.f32.gmra.mxu2 %vm744_vm1, %v615_v28  ;;  %3410 = vmatmul.msk.f32.gmra.mxu0 %vm509_vm0, %v4491_v35  ;;  %v1165_v47 = vpop.f32.mrf.mxu3  ;;  %v1322_v28 = vadd.f32 %v4863_v24, %v1321_v32  ;;  %v621_v35 = vadd.f32 %v4783_v17, %v4760_v2  ;;  %v3495_v2 = vld [vmem:[%s6566_s7 + $0x38] sm:$0xff]  ;;  %v3494_v17 = vld [vmem:[%s6566_s7 + $0x30] sm:$0xff] }
 0x19f   : > { %1672 = vmatpush.msrb.mxu2 %v3495_v2 }
 0x1a0   : > { %3444 = vmatpush.xpose.msk.msra.mxu3 %vm744_vm1, %v1331_v12  ;;  %v3534_v12 = vld [vmem:[%s6564_s5 + $0x48] sm:$0xff] }
 0x1a1   : > { %1673 = vmatpush.msrb.mxu2 %v3494_v17 }
 0x1a3   : > { %1674 = vmatpush.msrb.mxu2 %v3493_v20 }
 0x1a4   : > { %3445 = vmatpush.xpose.msk.msra.mxu3 %vm744_vm1, %v1328_v33  ;;  %v3533_v33 = vld [vmem:[%s6564_s5 + $0x40] sm:$0xff] }
 0x1a6   : > { %3411 = vmatmul.msk.f32.gmra.mxu0 %vm509_vm0, %v4500_v37  ;;  %3384 = vmatmul.msk.f32.gmra.mxu2 %vm744_vm1, %v618_v29  ;;  %v1168_v63 = vpop.f32.mrf.mxu3  ;;  %v1316_v37 = vadd.f32 %v4863_v24, %v1315_v13  ;;  %v3492_v13 = vld [vmem:[%s6566_s7 + $0x20] sm:$0xff] }
 0x1a7   : > { %1675 = vmatpush.msrb.mxu2 %v3492_v13 }
 0x1a8   : > { %3446 = vmatpush.xpose.msk.msra.mxu3 %vm744_vm1, %v1325_v14 }
 0x1ac   : > { %3447 = vmatpush.xpose.msk.msra.mxu3 %vm744_vm1, %v1322_v28 }
 0x1ae   : > { %3412 = vmatmul.msk.f32.gmra.mxu0 %vm509_vm0, %v4509_v39  ;;  %3385 = vmatmul.msk.f32.gmra.mxu2 %vm744_vm1, %v621_v35  ;;  %v1171_v32 = vpop.f32.mrf.mxu3  ;;  %v6614_v35 = vld [vmem:[#allocation6_spill] sm:$0xff] }
 0x1b0   : > { %3448 = vmatpush.xpose.msk.msra.mxu3 %vm744_vm1, %v1319_v57  ;;  %v6615_v57 = vld [vmem:[#allocation7_spill] sm:$0xff] }
 0x1b4   : > { %3449 = vmatpush.xpose.msk.msra.mxu3 %vm744_vm1, %v1316_v37 }
 0x1b6   : > { %3413 = vmatmul.msk.f32.gmra.mxu0 %vm509_vm0, %v4523_v42  ;;  %v1174_v39 = vpop.f32.mrf.mxu3  ;;  %v1307_v42 = vadd.f32 %v4863_v24, %v4794_v15  ;;  %3496 = vmatmul.msk.f32.vlgmr.msrb.gmra.mxu2 %vm509_vm0, %v4562_v50  ;;  %v1295_v50 = vadd.f32 %v4863_v24, %v4726_v60 }
 0x1b8   : > { %3450 = vmatpush.xpose.msk.msra.mxu3 %vm744_vm1, %v1313_v49 }
 0x1bc   : > { %3451 = vmatpush.xpose.msk.msra.mxu3 %vm744_vm1, %v1310_v10 }
 0x1be   : > { %3414 = vmatmul.msk.f32.gmra.mxu0 %vm509_vm0, %v4552_v48  ;;  %v1177_v15 = vpop.f32.mrf.mxu3  ;;  %v1301_v48 = vadd.f32 %v4863_v24, %v4762_v46  ;;  %3497 = vmatmul.msk.f32.gmra.mxu2 %vm509_vm0, %v4576_v53  ;;  %v1289_v53 = vadd.f32 %v4863_v24, %v4697_v26 }
 0x1c0   : > { %3452 = vmatpush.xpose.msk.msra.mxu3 %vm744_vm1, %v1307_v42 }
 0x1c4   : > { %3453 = vmatpush.xpose.msk.msra.mxu3 %vm744_vm1, %v1304_v22  ;;  %v6618_v22 = vld [vmem:[#allocation10_spill] sm:$0xff] }
 0x1c6   : > { %3415 = vmatmul.msk.f32.gmra.mxu0 %vm509_vm0, %v4569_v52  ;;  %v1180_v25 = vpop.f32.mrf.mxu3  ;;  %v1292_v52 = vadd.f32 %v4863_v24, %v4710_v19  ;;  %3498 = vmatmul.msk.f32.gmra.mxu2 %vm509_vm0, %v4590_v56 }
 0x1c7   : > { %1790 = vmatpush.msrb.mxu1 %v1180_v25  ;;  %v6619_v25 = vld [vmem:[#allocation11_spill] sm:$0xff] }
 0x1c8   : > { %3454 = vmatpush.xpose.msk.msra.mxu3 %vm744_vm1, %v1301_v48 }
 0x1c9   : > { %1791 = vmatpush.msrb.mxu1 %v1177_v15 }
 0x1cb   : > { %1792 = vmatpush.msrb.mxu1 %v1174_v39  ;;  %v6617_v39 = vld [vmem:[#allocation9_spill] sm:$0xff] }
 0x1cc   : > { %3455 = vmatpush.xpose.msk.msra.mxu3 %vm744_vm1, %v1298_v16 }
 0x1cd   : > { %1793 = vmatpush.msrb.mxu1 %v1171_v32  ;;  %v6616_v32 = vld [vmem:[#allocation8_spill] sm:$0xff] }
 0x1ce   : > { %3416 = vmatmul.msk.f32.gmra.mxu0 %vm509_vm0, %v4583_v55  ;;  %v1286_v55 = vadd.f32 %v4863_v24, %v4682_v44  ;;  %3499 = vmatmul.msk.f32.gmra.mxu2 %vm509_vm0, %v4604_v59  ;;  %v6612_v24 = vld [vmem:[#allocation19_spill] sm:$0xff] }
 0x1cf   : > { %1794 = vmatpush.msrb.mxu1 %v1168_v63 }
 0x1d0   : > { %3456 = vmatpush.xpose.msk.msra.mxu3 %vm744_vm1, %v1295_v50 }
 0x1d1   : > { %1795 = vmatpush.msrb.mxu1 %v1165_v47  ;;  %v6613_v47 = vld [vmem:[#allocation5_spill] sm:$0xff] }
 0x1d3   : > { %1796 = vmatpush.msrb.mxu1 %v4865_v31 }
 0x1d4   : > { %3457 = vmatpush.xpose.msk.msra.mxu3 %vm744_vm1, %v1292_v52 }
 0x1d5   : > { %1797 = vmatpush.msrb.mxu1 %v4853_v5 }
 0x1d6   : > { %3417 = vmatmul.msk.f32.gmra.mxu0 %vm509_vm0, %v4597_v58  ;;  %3500 = vmatmul.msk.f32.gmra.mxu2 %vm509_vm0, %v4616_v62 }
 0x1d7   : > { %1798 = vmatpush.msrb.mxu1 %v4847_v36 }
 0x1d8   : > { %3458 = vmatpush.xpose.msk.msra.mxu3 %vm744_vm1, %v1289_v53 }
 0x1d9   : > { %1799 = vmatpush.msrb.mxu1 %v4841_v9 }
 0x1db   : > { %v4952_v19 = vpop.f32.mrf.mxu0  ;;  %1800 = vmatpush.msrb.mxu1 %v4836_v41 }
 0x1dc   : > { %906 = vst [vmem:[%s4955_s12] sm:$0xff] %v4952_v19  ;;  %3459 = vmatpush.xpose.msk.msra.mxu3 %vm744_vm1, %v1286_v55  ;;  %922 = vmax.xlane.f32.xlu0 %v4952_v19  ;;  %v6620_v55 = vld [vmem:[#allocation12_spill] sm:$0xff] }
 0x1dd   : > { %1801 = vmatpush.msrb.mxu1 %v4829_v11 }
 0x1de   : > { %3418 = vmatmul.msk.f32.gmra.mxu0 %vm509_vm0, %v4609_v61  ;;  %3501 = vmatmul.msk.f32.gmra.mxu2 %vm509_vm0, %v4628_v1 }
 0x1df   : > { %1802 = vmatpush.msrb.mxu1 %v4822_v18 }
 0x1e1   : > { %v4967_v26 = vpop.f32.mrf.mxu2  ;;  %1803 = vmatpush.msrb.mxu1 %v4810_v38 }
 0x1e2   : > { %911 = vst [vmem:[%s4955_s12 + $0x28] sm:$0xff] %v4967_v26  ;;  %932 = vmax.xlane.f32.xlu2 %v4967_v26 }
 0x1e3   : > { %v4973_v56 = vpop.f32.mrf.mxu0  ;;  %1804 = vmatpush.msrb.mxu1 %v4792_v34 }
 0x1e4   : > { %907 = vst [vmem:[%s4955_s12 + $0x8] sm:$0xff] %v4973_v56  ;;  %924 = vmax.xlane.f32.xlu0 %v4973_v56 }
 0x1e5   : > { %1805 = vmatpush.msrb.mxu1 %v4772_v51 }
 0x1e6   : > { %3419 = vmatmul.msk.f32.gmra.mxu0 %vm509_vm0, %v4621_v0  ;;  %3502 = vmatmul.msk.f32.gmra.mxu2 %vm509_vm0, %v4635_v3 }
 0x1e9   : > { %v4985_v9 = vpop.f32.mrf.mxu2 }
 0x1ea   : > { %912 = vst [vmem:[%s4955_s12 + $0x30] sm:$0xff] %v4985_v9  ;;  %934 = vmax.xlane.f32.xlu1 %v4985_v9 }
 0x1eb   : > { %v4991_v11 = vpop.f32.mrf.mxu0 }
 0x1ec   : > { %908 = vst [vmem:[%s4955_s12 + $0x10] sm:$0xff] %v4991_v11 }
 0x1ee   : > { %3420 = vmatmul.msk.f32.gmra.mxu0 %vm509_vm0, %v4353_v4  ;;  %3503 = vmatmul.msk.f32.gmra.mxu2 %vm509_vm0, %v4642_v6 }
 0x1f1   : > { %v5000_v58 = vpop.f32.mrf.mxu2 }
 0x1f2   : > { %913 = vst [vmem:[%s4955_s12 + $0x38] sm:$0xff] %v5000_v58  ;;  %926 = vmax.xlane.f32.xlu1 %v4991_v11 }
 0x1f3   : > { %v5005_v59 = vpop.f32.mrf.mxu0 }
 0x1f4   : > { %909 = vst [vmem:[%s4955_s12 + $0x18] sm:$0xff] %v5005_v59  ;;  %928 = vmax.xlane.f32.xlu2 %v5005_v59 }
 0x1f6   : > { %3421 = vmatmul.msk.f32.gmra.mxu0 %vm509_vm0, %v4516_v40  ;;  %v5030_v40 = vld [vmem:[%s6563_s4 + $0x1] ss:$0 sm:$0xff]  ;;  %3504 = vmatmul.msk.f32.gmra.mxu2 %vm509_vm0, %v4649_v8 }
 0x1f9   : > { %v5014_v4 = vpop.f32.mrf.mxu2 }
 0x1fa   : > { %914 = vst [vmem:[%s4955_s12 + $0x40] sm:$0xff] %v5014_v4 }
 0x1fb   : > { %v5018_v61 = vpop.f32.mrf.mxu0 }
 0x1fc   : > { %910 = vst [vmem:[%s4955_s12 + $0x20] sm:$0xff] %v5018_v61  ;;  %930 = vmax.xlane.f32.xlu0 %v5018_v61 }
 0x1fe   : > { %3422 = vmatmul.msk.f32.gmra.mxu0 %vm509_vm0, %v4530_v43  ;;  %3505 = vmatmul.msk.f32.gmra.mxu2 %vm509_vm0, %v4658_v23 }
 0x201   : > { %v5032_v62 = vpop.f32.mrf.mxu2 }
 0x202   : > { %915 = vst [vmem:[%s4955_s12 + $0x48] sm:$0xff] %v5032_v62 }
 0x203   : > { %v1210_v0 = vpop.f32.mrf.mxu0 }
 0x204   : > { %v1211_v1 = vadd.f32 %v5030_v40, %v1210_v0 }
 0x206   : > { %3460 = vmatmul.msk.f32.vlgmr.msra.gmra.mxu3 %vm744_vm1, %v1211_v1  ;;  %3506 = vmatmul.msk.f32.gmra.mxu2 %vm509_vm0, %v4671_v27 }
 0x209   : > { %v5040_v3 = vpop.f32.mrf.mxu2 }
 0x20a   : > { %916 = vst [vmem:[%s4955_s12 + $0x50] sm:$0xff] %v5040_v3 }
 0x20b   : > { %v1213_v43 = vpop.f32.mrf.mxu0 }
 0x20c   : > { %v1214_v6 = vadd.f32 %v5030_v40, %v1213_v43  ;;  %v6621_v43 = vld [vmem:[#allocation13_spill] sm:$0xff] }
 0x20e   : > { %3461 = vmatmul.msk.f32.gmra.mxu3 %vm744_vm1, %v1214_v6  ;;  %3507 = vmatmul.msk.f32.gmra.mxu2 %vm509_vm0, %v4688_v30 }
 0x211   : > { %v5048_v44 = vpop.f32.mrf.mxu2 }
 0x212   : > { %917 = vst [vmem:[%s4955_s12 + $0x58] sm:$0xff] %v5048_v44 }
 0x213   : > { %v1216_v8 = vpop.f32.mrf.mxu0 }
 0x214   : > { %v1217_v60 = vadd.f32 %v5030_v40, %v1216_v8 }
 0x216   : > { %3462 = vmatmul.msk.f32.gmra.mxu3 %vm744_vm1, %v1217_v60  ;;  %3508 = vmatmul.msk.f32.gmra.mxu2 %vm509_vm0, %v4703_v45 }
 0x219   : > { %v5056_v54 = vpop.f32.mrf.mxu2 }
 0x21a   : > { %918 = vst [vmem:[%s4955_s12 + $0x60] sm:$0xff] %v5056_v54 }
 0x21b   : > { %v1219_v5 = vpop.f32.mrf.mxu0 }
 0x21c   : > { %v1220_v23 = vadd.f32 %v5030_v40, %v1219_v5 }
 0x21e   : > { %3463 = vmatmul.msk.f32.gmra.mxu3 %vm744_vm1, %v1220_v23  ;;  %3509 = vmatmul.msk.f32.gmra.mxu2 %vm509_vm0, %v4718_v7  ;;  %v3536_v7 = vld [vmem:[%s6564_s5 + $0x58] sm:$0xff]  ;;  %v6622_v23 = vld [vmem:[#allocation14_spill] sm:$0xff] }
 0x21f   : > { %1952 = vmatpush.msra.mxu2 %v3536_v7 }
 0x221   : > { %v5064_v46 = vpop.f32.mrf.mxu2 }
 0x222   : > { %919 = vst [vmem:[%s4955_s12 + $0x68] sm:$0xff] %v5064_v46 }
 0x223   : > { %v1222_v27 = vpop.f32.mrf.mxu0 }
 0x224   : > { %v1223_v51 = vadd.f32 %v5030_v40, %v1222_v27 }
 0x226   : > { %3464 = vmatmul.msk.f32.gmra.mxu3 %vm744_vm1, %v1223_v51  ;;  %3510 = vmatmul.msk.f32.gmra.mxu2 %vm509_vm0, %v4731_v21  ;;  %v3535_v21 = vld [vmem:[%s6564_s5 + $0x50] sm:$0xff] }
 0x227   : > { %1953 = vmatpush.msra.mxu2 %v3535_v21 }
 0x229   : > { %v5080_v45 = vpop.f32.mrf.mxu2  ;;  %1954 = vmatpush.msra.mxu2 %v3534_v12 }
 0x22a   : > { %920 = vst [vmem:[%s4955_s12 + $0x70] sm:$0xff] %v5080_v45 }
 0x22b   : > { %v1225_v34 = vpop.f32.mrf.mxu0  ;;  %1955 = vmatpush.msra.mxu2 %v3533_v33 }
 0x22c   : > { %v1226_v38 = vadd.f32 %v5030_v40, %v1225_v34 }
 0x22e   : > { %3465 = vmatmul.msk.f32.gmra.mxu3 %vm744_vm1, %v1226_v38  ;;  %3511 = vmatmul.msk.f32.gmra.mxu2 %vm509_vm0, %v6612_v24 }
 0x231   : > { %v5094_v31 = vpop.f32.mrf.mxu2 }
 0x232   : > { %921 = vst [vmem:[%s4955_s12 + $0x78] sm:$0xff] %v5094_v31 }
 0x233   : > { %v1228_v30 = vpop.f32.mrf.mxu0 }
 0x234   : > { %v1229_v18 = vadd.f32 %v5030_v40, %v1228_v30 }
 0x236   : > { %3466 = vmatmul.msk.f32.gmra.mxu3 %vm744_vm1, %v1229_v18  ;;  %3538 = vmatmul.msk.f32.vlgmr.msra.gmra.mxu2 %vm509_vm0, %v6613_v47  ;;  %v6624_v47 = vld [vmem:[#allocation16_spill] sm:$0xff] }
 0x239   : > { %v5108_v28 = vpop.f32.mrf.mxu2 }
 0x23b   : > { %v1231_v41 = vpop.f32.mrf.mxu0 }
 0x23c   : > { %v1232_v36 = vadd.f32 %v5030_v40, %v1231_v41 }
 0x23e   : > { %3467 = vmatmul.msk.f32.gmra.mxu3 %vm744_vm1, %v1232_v36  ;;  %3539 = vmatmul.msk.f32.gmra.mxu2 %vm509_vm0, %v6614_v35  ;;  %v6623_v36 = vld [vmem:[#allocation15_spill] sm:$0xff] }
 0x241   : > { %v5112_v63 = vpop.f32.mrf.mxu2 }
 0x243   : > { %v1234_v29 = vpop.f32.mrf.mxu0 }
 0x244   : > { %v1235_v14 = vadd.f32 %v5030_v40, %v1234_v29 }
 0x246   : > { %3468 = vmatmul.msk.f32.gmra.mxu3 %vm744_vm1, %v1235_v14  ;;  %3540 = vmatmul.msk.f32.gmra.mxu2 %vm509_vm0, %v6615_v57 }
 0x249   : > { %v5116_v37 = vpop.f32.mrf.mxu2 }
 0x24b   : > { %v1237_v48 = vpop.f32.mrf.mxu0 }
 0x24c   : > { %v1238_v16 = vadd.f32 %v5030_v40, %v1237_v48 }
 0x24e   : > { %3541 = vmatmul.msk.f32.gmra.mxu2 %vm509_vm0, %v6616_v32  ;;  %3469 = vmatmul.msk.f32.gmra.mxu3 %vm744_vm1, %v1238_v16 }
 0x24f   : > { %v923_v6 = vpop.xlane.xlu0 %922 }
 0x250   : > { %v954_v5 = vsub.f32 %v4952_v19, %v923_v6 }
 0x251   : > { %v5122_v10 = vpop.f32.mrf.mxu2 }
 0x252   : > { %v970_v51 = vmul.f32 1.442695, %v954_v5 }
 0x253   : > { %v1240_v52 = vpop.f32.mrf.mxu0 }
 0x254   : > { %v1241_v53 = vadd.f32 %v5030_v40, %v1240_v52 }
 0x255   : > { %v5120_v49 = vpop.xlane.xlu2 %932 }
 0x256   : > { %3542 = vmatmul.msk.f32.gmra.mxu2 %vm509_vm0, %v6617_v39  ;;  %3470 = vmatmul.msk.f32.gmra.mxu3 %vm744_vm1, %v1241_v53 }
 0x257   : > { %v925_v34 = vpop.xlane.xlu0 %924 }
 0x258   : > { %v955_v19 = vsub.f32 %v4973_v56, %v925_v34 }
 0x259   : > { %v5127_v42 = vpop.f32.mrf.mxu2 }
 0x25a   : > { %v972_v7 = vmul.f32 1.442695, %v955_v19 }
 0x25b   : > { %v1243_v0 = vpop.f32.mrf.mxu0 }
 0x25c   : > { %v1244_v1 = vadd.f32 %v5030_v40, %v1243_v0 }
 0x25d   : > { %v5163_v27 = vpop.xlane.xlu1 %934 }
 0x25e   : > { %3543 = vmatmul.msk.f32.gmra.mxu2 %vm509_vm0, %v6618_v22  ;;  %3471 = vmatmul.msk.f32.gmra.mxu3 %vm744_vm1, %v1244_v1  ;;  %v6625_v22 = vld [vmem:[#allocation17_spill] sm:$0xff] }
 0x261   : > { %v5131_v13 = vpop.f32.mrf.mxu2 }
 0x263   : > { %v1246_v18 = vpop.f32.mrf.mxu0 }
 0x264   : > { %v1247_v41 = vadd.f32 %v5030_v40, %v1246_v18 }
 0x265   : > { %v927_v24 = vpop.xlane.xlu1 %926 }
 0x266   : > { %3544 = vmatmul.msk.f32.gmra.mxu2 %vm509_vm0, %v6619_v25  ;;  %3472 = vmatmul.msk.f32.gmra.mxu3 %vm744_vm1, %v1247_v41  ;;  %v956_v29 = vsub.f32 %v4991_v11, %v927_v24 }
 0x267   : > { %v929_v2 = vpop.xlane.xlu2 %928 }
 0x268   : > { %v957_v17 = vsub.f32 %v5005_v59, %v929_v2  ;;  %v974_v35 = vmul.f32 1.442695, %v956_v29 }
 0x269   : > { %v5140_v50 = vpop.f32.mrf.mxu2 }
 0x26a   : > { %v976_v20 = vmul.f32 1.442695, %v957_v17 }
 0x26b   : > { %v1249_v56 = vpop.f32.mrf.mxu0 }
 0x26c   : > { %3832 = vpow2.f32 %v976_v20  ;;  %v1250_v14 = vadd.f32 %v5030_v40, %v1249_v56 }
 0x26d   : > { %3834 = vpow2.f32 %v970_v51 }
 0x26e   : > { %3545 = vmatmul.msk.f32.gmra.mxu2 %vm509_vm0, %v6620_v55  ;;  %3836 = vpow2.f32 %v972_v7  ;;  %3473 = vmatmul.msk.f32.gmra.mxu3 %vm744_vm1, %v1250_v14  ;;  %v6626_v55 = vld [vmem:[#allocation18_spill] sm:$0xff] }
 0x26f   : > { %v931_v57 = vpop.xlane.xlu0 %930  ;;  %3838 = vpow2.f32 %v974_v35 }
 0x270   : > { %v958_v17 = vsub.f32 %v5018_v61, %v931_v57 }
 0x271   : > { %v5147_v59 = vpop.f32.mrf.mxu2 }
 0x272   : > { %v5133_v15 = vpop.eup %3832  ;;  %v978_v48 = vmul.f32 1.442695, %v958_v17 }
 0x273   : > { %1008 = vadd.xlane.f32.xlu0 %v5133_v15  ;;  %v5180_v12 = vpop.eup %3834  ;;  %v1252_v11 = vpop.f32.mrf.mxu0 }
 0x274   : > { %v5193_v39 = vpop.eup %3836  ;;  %v1253_v20 = vadd.f32 %v5030_v40, %v1252_v11  ;;  %3840 = vpow2.f32 %v978_v48  ;;  %v960_v48 = vsub.f32 %v4985_v9, %v5163_v27 }
 0x275   : > { %v5207_v25 = vpop.eup %3838 }
 0x276   : > { %3546 = vmatmul.msk.f32.gmra.mxu2 %vm509_vm0, %v6621_v43  ;;  %3474 = vmatmul.msk.f32.gmra.mxu3 %vm744_vm1, %v1253_v20 }
 0x279   : > { %v5153_v8 = vpop.f32.mrf.mxu2 }
 0x27a   : > { %v5220_v1 = vpop.eup %3840 }
 0x27b   : > { %944 = vmax.xlane.f32.xlu0 %v5048_v44  ;;  %v1255_v61 = vpop.f32.mrf.mxu0 }
 0x27c   : > { %v1256_v53 = vadd.f32 %v5030_v40, %v1255_v61  ;;  %v4088_v40 = vld [vmem:[%s4370_s30 + $0x70] sm:$0xff] }
 0x27e   : > { %3547 = vmatmul.msk.f32.gmra.mxu2 %vm509_vm0, %v6622_v23  ;;  %3475 = vmatmul.msk.f32.gmra.mxu3 %vm744_vm1, %v1256_v53  ;;  %v4089_v23 = vld [vmem:[%s4370_s30 + $0x78] sm:$0xff] }
 0x281   : > { %v5165_v38 = vpop.f32.mrf.mxu2 }
 0x286   : > { %3548 = vmatmul.msk.f32.gmra.mxu2 %vm509_vm0, %v6623_v36 }
 0x289   : > { %v5155_v60 = vpop.f32.mrf.mxu3  ;;  %v5178_v21 = vpop.f32.mrf.mxu2 }
 0x28a   : > { %3476 = vst [vmem:[%s4955_s12 + $0x80] sm:$0xff] %v5155_v60  ;;  %1511 = vmax.xlane.f32.xlu1 %v5155_v60 }
 0x28e   : > { %3549 = vmatmul.msk.f32.gmra.mxu2 %vm509_vm0, %v6624_v47 }
 0x291   : > { %v5167_v30 = vpop.f32.mrf.mxu3  ;;  %v1710_v32 = vpop.f32.mrf.mxu2 }
 0x292   : > { %3477 = vst [vmem:[%s4955_s12 + $0x88] sm:$0xff] %v5167_v30  ;;  %936 = vmax.xlane.f32.xlu1 %v5000_v58  ;;  %1513 = vmax.xlane.f32.xlu2 %v5167_v30 }
 0x296   : > { %3550 = vmatmul.msk.f32.gmra.mxu2 %vm509_vm0, %v6625_v22 }
 0x299   : > { %v5182_v33 = vpop.f32.mrf.mxu3  ;;  %v1713_v16 = vpop.f32.mrf.mxu2 }
 0x29a   : > { %3478 = vst [vmem:[%s4955_s12 + $0x90] sm:$0xff] %v5182_v33  ;;  %1002 = vadd.xlane.f32.xlu2 %v5180_v12  ;;  %1515 = vmax.xlane.f32.xlu1 %v5182_v33 }
 0x29e   : > { %3551 = vmatmul.msk.f32.gmra.mxu2 %vm509_vm0, %v6626_v55  ;;  %v982_v55 = vmul.f32 1.442695, %v960_v48 }
 0x2a1   : > { %v5195_v2 = vpop.f32.mrf.mxu3  ;;  %v1716_v0 = vpop.f32.mrf.mxu2 }
 0x2a2   : > { %3479 = vst [vmem:[%s4955_s12 + $0x98] sm:$0xff] %v5195_v2  ;;  %1004 = vadd.xlane.f32.xlu2 %v5193_v39  ;;  %938 = vmax.xlane.f32.xlu1 %v5014_v4 }
 0x2a3   : > { %1517 = vmax.xlane.f32.xlu0 %v5195_v2 }
 0x2a6   : > { %3552 = vmatmul.msk.f32.gmra.mxu2 %vm509_vm0, %v4088_v40 }
 0x2a9   : > { %v5209_v52 = vpop.f32.mrf.mxu3  ;;  %v1719_v6 = vpop.f32.mrf.mxu2 }
 0x2aa   : > { %3480 = vst [vmem:[%s4955_s12 + $0xa0] sm:$0xff] %v5209_v52  ;;  %1006 = vadd.xlane.f32.xlu2 %v5207_v25  ;;  %940 = vmax.xlane.f32.xlu1 %v5032_v62 }
 0x2ab   : > { %1519 = vmax.xlane.f32.xlu0 %v5209_v52 }
 0x2ae   : > { %3553 = vmatmul.msk.f32.gmra.mxu2 %vm509_vm0, %v4089_v23 }
 0x2b1   : > { %v5222_v43 = vpop.f32.mrf.mxu3  ;;  %v1722_v51 = vpop.f32.mrf.mxu2 }
 0x2b2   : > { %3481 = vst [vmem:[%s4955_s12 + $0xa8] sm:$0xff] %v5222_v43  ;;  %942 = vmax.xlane.f32.xlu2 %v5040_v3  ;;  %1010 = vadd.xlane.f32.xlu1 %v5220_v1 }
 0x2b3   : > { %1521 = vmax.xlane.f32.xlu0 %v5222_v43  ;;  %1725 = vmatpush.msrb.mxu0 %v1722_v51 }
 0x2b5   : > { %1726 = vmatpush.msrb.mxu0 %v1719_v6 }
 0x2b7   : > { %1727 = vmatpush.msrb.mxu0 %v1716_v0 }
 0x2b9   : > { %v5231_v5 = vpop.f32.mrf.mxu3  ;;  %1728 = vmatpush.msrb.mxu0 %v1713_v16  ;;  %v5243_v18 = vpop.f32.mrf.mxu2 }
 0x2ba   : > { %3482 = vst [vmem:[%s4955_s12 + $0xb0] sm:$0xff] %v5231_v5 }
 0x2bb   : > { %1523 = vmax.xlane.f32.xlu0 %v5231_v5  ;;  %1729 = vmatpush.msrb.mxu0 %v1710_v32 }
 0x2bd   : > { %1730 = vmatpush.msrb.mxu0 %v5178_v21 }
 0x2bf   : > { %1731 = vmatpush.msrb.mxu0 %v5165_v38 }
 0x2c1   : > { %v5238_v34 = vpop.f32.mrf.mxu3  ;;  %1732 = vmatpush.msrb.mxu0 %v5153_v8  ;;  %v5254_v41 = vpop.f32.mrf.mxu2 }
 0x2c2   : > { %3483 = vst [vmem:[%s4955_s12 + $0xb8] sm:$0xff] %v5238_v34  ;;  %1525 = vmax.xlane.f32.xlu1 %v5238_v34 }
 0x2c3   : > { %1733 = vmatpush.msrb.mxu0 %v5147_v59 }
 0x2c5   : > { %1734 = vmatpush.msrb.mxu0 %v5140_v50 }
 0x2c7   : > { %1735 = vmatpush.msrb.mxu0 %v5131_v13 }
 0x2c9   : > { %v5245_v19 = vpop.f32.mrf.mxu3  ;;  %1736 = vmatpush.msrb.mxu0 %v5127_v42  ;;  %v5260_v36 = vpop.f32.mrf.mxu2 }
 0x2ca   : > { %3484 = vst [vmem:[%s4955_s12 + $0xc0] sm:$0xff] %v5245_v19  ;;  %946 = vmax.xlane.f32.xlu1 %v5056_v54  ;;  %1527 = vmax.xlane.f32.xlu2 %v5245_v19 }
 0x2cb   : > { %1737 = vmatpush.msrb.mxu0 %v5122_v10 }
 0x2cd   : > { %1738 = vmatpush.msrb.mxu0 %v5116_v37 }
 0x2cf   : > { %1739 = vmatpush.msrb.mxu0 %v5112_v63  ;;  %v959_v63 = vsub.f32 %v4967_v26, %v5120_v49 }
 0x2d1   : > { %1740 = vmatpush.msrb.mxu0 %v5108_v28  ;;  %v5266_v8 = vpop.f32.mrf.mxu2  ;;  %v5274_v42 = vpop.f32.mrf.mxu3  ;;  %v980_v29 = vmul.f32 1.442695, %v959_v63 }
 0x2d2   : > { %3485 = vst [vmem:[%s4955_s12 + $0xc8] sm:$0xff] %v5274_v42 }
 0x2d9   : > { %v5268_v59 = vpop.f32.mrf.mxu2  ;;  %v5281_v28 = vpop.f32.mrf.mxu3 }
 0x2da   : > { %3486 = vst [vmem:[%s4955_s12 + $0xd0] sm:$0xff] %v5281_v28 }
 0x2e1   : > { %v5270_v50 = vpop.f32.mrf.mxu2  ;;  %v5295_v57 = vpop.f32.mrf.mxu3 }
 0x2e2   : > { %3487 = vst [vmem:[%s4955_s12 + $0xd8] sm:$0xff] %v5295_v57 }
 0x2e6   : > { %v5287_v24 = vpop.xlane.xlu0 %1008 }
 0x2e9   : > { %v5272_v13 = vpop.f32.mrf.mxu2 }
 0x2ee   : > { %v5299_v32 = vpop.xlane.xlu0 %944 }
 0x2f1   : > { %v5279_v7 = vpop.f32.mrf.mxu2 }
 0x2f9   : > { %v5292_v35 = vpop.f32.mrf.mxu2 }
 0x2fd   : > { %v1512_v10 = vpop.xlane.xlu1 %1511 }
 0x2fe   : > { %v1543_v37 = vsub.f32 %v5155_v60, %v1512_v10 }
 0x300   : > { %v1559_v38 = vmul.f32 1.442695, %v1543_v37 }
 0x301   : > { %v5304_v20 = vpop.f32.mrf.mxu2 }
 0x302   : > { %3842 = vpow2.f32 %v1559_v38 }
 0x303   : > { %3844 = vpow2.f32 %v980_v29 }
 0x305   : > { %v937_v21 = vpop.xlane.xlu1 %936  ;;  %v1514_v56 = vpop.xlane.xlu2 %1513 }
 0x306   : > { %v1544_v14 = vsub.f32 %v5167_v30, %v1514_v56  ;;  %v961_v27 = vsub.f32 %v5000_v58, %v937_v21 }
 0x308   : > { %v5290_v60 = vpop.eup %3842  ;;  %v1561_v47 = vmul.f32 1.442695, %v1544_v14  ;;  %v984_v37 = vmul.f32 1.442695, %v961_v27 }
 0x309   : > { %1591 = vadd.xlane.f32.xlu2 %v5290_v60  ;;  %v5302_v11 = vpop.eup %3844  ;;  %v5318_v9 = vpop.f32.mrf.mxu2 }
 0x30a   : > { %3846 = vpow2.f32 %v1561_v47 }
 0x30d   : > { %v1003_v26 = vpop.xlane.xlu2 %1002  ;;  %v1516_v49 = vpop.xlane.xlu1 %1515 }
 0x30e   : > { %3848 = vrcp.f32 %v1003_v26  ;;  %v1545_v30 = vsub.f32 %v5182_v33, %v1516_v49 }
 0x310   : > { %v1563_v17 = vmul.f32 1.442695, %v1545_v30  ;;  %v5306_v22 = vpop.eup %3846 }
 0x311   : > { %1012 = vadd.xlane.f32.xlu2 %v5302_v11  ;;  %1593 = vadd.xlane.f32.xlu0 %v5306_v22  ;;  %v5333_v14 = vpop.f32.mrf.mxu2 }
 0x312   : > { %3850 = vpow2.f32 %v1563_v17 }
 0x314   : > { %v3849_v16 = vpop.eup %3848 }
 0x315   : > { %v1050_v61 = vmul.f32 %v3849_v16, %v5180_v12  ;;  %v1005_v53 = vpop.xlane.xlu2 %1004  ;;  %v939_v33 = vpop.xlane.xlu1 %938 }
 0x316   : > { %3852 = vrcp.f32 %v1005_v53  ;;  %v1518_v0 = vpop.xlane.xlu0 %1517  ;;  %v5322_v12 = vpop.f32.mrf.mxu3 }
 0x317   : > { %v1546_v40 = vsub.f32 %v5195_v2, %v1518_v0  ;;  %1806 = vmatmul.f32.vlgmr.msrb.gmra.mxu1 %v1050_v61  ;;  %3854 = vpow2.f32 %v982_v55  ;;  %3488 = vst [vmem:[%s4955_s12 + $0xe0] sm:$0xff] %v5322_v12 }
 0x318   : > { %v5314_v6 = vpop.eup %3850 }
 0x319   : > { %v1565_v23 = vmul.f32 1.442695, %v1546_v40  ;;  %1595 = vadd.xlane.f32.xlu1 %v5314_v6  ;;  %948 = vmax.xlane.f32.xlu2 %v5064_v46  ;;  %v5350_v53 = vpop.f32.mrf.mxu2 }
 0x31a   : > { %1529 = vmax.xlane.f32.xlu0 %v5274_v42 }
 0x31b   : > { %3856 = vpow2.f32 %v1565_v23 }
 0x31c   : > { %v3853_v2 = vpop.eup %3852 }
 0x31d   : > { %v1007_v51 = vpop.xlane.xlu2 %1006  ;;  %v1051_v10 = vmul.f32 %v3853_v2, %v5193_v39  ;;  %v941_v63 = vpop.xlane.xlu1 %940  ;;  %v962_v39 = vsub.f32 %v5014_v4, %v939_v33 }
 0x31e   : > { %3858 = vrcp.f32 %v1007_v51  ;;  %v1520_v38 = vpop.xlane.xlu0 %1519  ;;  %v5328_v58 = vpop.eup %3854 }
 0x31f   : > { %v1547_v56 = vsub.f32 %v5209_v52, %v1520_v38  ;;  %1809 = vmatmul.f32.gmra.mxu1 %v1051_v10  ;;  %3860 = vpow2.f32 %v984_v37  ;;  %v5338_v47 = vpop.f32.mrf.mxu3  ;;  %v986_v49 = vmul.f32 1.442695, %v962_v39  ;;  %v963_v10 = vsub.f32 %v5032_v62, %v941_v63 }
 0x320   : > { %3489 = vst [vmem:[%s4955_s12 + $0xe8] sm:$0xff] %v5338_v47 }
 0x321   : > { %v5330_v21 = vpop.eup %3856  ;;  %v1567_v29 = vmul.f32 1.442695, %v1547_v56  ;;  %1531 = vmax.xlane.f32.xlu1 %v5281_v28  ;;  %v1996_v27 = vpop.f32.mrf.mxu2  ;;  %v988_v56 = vmul.f32 1.442695, %v963_v10 }
 0x322   : > { %1597 = vadd.xlane.f32.xlu2 %v5330_v21  ;;  %1014 = vadd.xlane.f32.xlu0 %v5328_v58 }
 0x323   : > { %3862 = vpow2.f32 %v1567_v29 }
 0x324   : > { %v3859_v52 = vpop.eup %3858  ;;  %3864 = vrcp.f32 %v5287_v24 }
 0x325   : > { %v1052_v26 = vmul.f32 %v3859_v52, %v5207_v25  ;;  %v5345_v4 = vpop.eup %3860  ;;  %v1011_v16 = vpop.xlane.xlu1 %1010  ;;  %3866 = vpow2.f32 %v986_v49 }
 0x326   : > { %v1522_v30 = vpop.xlane.xlu0 %1521 }
 0x327   : > { %v1548_v17 = vsub.f32 %v5222_v43, %v1522_v30  ;;  %1812 = vmatmul.f32.gmra.mxu1 %v1052_v26  ;;  %v5354_v25 = vpop.f32.mrf.mxu3 }
 0x328   : > { %3490 = vst [vmem:[%s4955_s12 + $0xf0] sm:$0xff] %v5354_v25 }
 0x329   : > { %v5347_v48 = vpop.eup %3862  ;;  %v1569_v61 = vmul.f32 1.442695, %v1548_v17  ;;  %1016 = vadd.xlane.f32.xlu1 %v5345_v4  ;;  %v1999_v52 = vpop.f32.mrf.mxu2 }
 0x32a   : > { %v3865_v33 = vpop.eup %3864  ;;  %1599 = vadd.xlane.f32.xlu0 %v5347_v48  ;;  %1533 = vmax.xlane.f32.xlu2 %v5295_v57 }
 0x32b   : > { %3868 = vpow2.f32 %v1569_v61  ;;  %v1053_v43 = vmul.f32 %v3865_v33, %v5133_v15  ;;  %v5360_v0 = vpop.eup %3866  ;;  %v943_v15 = vpop.xlane.xlu2 %942  ;;  %v965_v61 = vsub.f32 %v5048_v44, %v5299_v32 }
 0x32c   : > { %3870 = vrcp.f32 %v1011_v16  ;;  %v964_v26 = vsub.f32 %v5040_v3, %v943_v15 }
 0x32e   : > { %v1524_v24 = vpop.xlane.xlu0 %1523 }
 0x32f   : > { %v1549_v55 = vsub.f32 %v5231_v5, %v1524_v24  ;;  %1815 = vmatmul.f32.gmra.mxu1 %v1053_v43  ;;  %v5366_v51 = vpop.f32.mrf.mxu3 }
 0x330   : > { %3491 = vst [vmem:[%s4955_s12 + $0xf8] sm:$0xff] %v5366_v51 }
 0x331   : > { %v5362_v40 = vpop.eup %3868  ;;  %v1571_v23 = vmul.f32 1.442695, %v1549_v55  ;;  %v2002_v17 = vpop.f32.mrf.mxu2 }
 0x332   : > { %v3871_v2 = vpop.eup %3870  ;;  %950 = vmax.xlane.f32.xlu0 %v5080_v45  ;;  %1601 = vadd.xlane.f32.xlu1 %v5362_v40 }
 0x333   : > { %3872 = vpow2.f32 %v1571_v23  ;;  %1018 = vadd.xlane.f32.xlu2 %v5360_v0  ;;  %v1054_v37 = vmul.f32 %v3871_v2, %v5220_v1  ;;  %v3827_v1 = vld [vmem:[%s6565_s6 + $0x2] ss:$0 sm:$0xff] }
 0x334   : > { %v2003_v16 = vadd.f32 %v3827_v1, %v2002_v17  ;;  %v2000_v33 = vadd.f32 %v3827_v1, %v1999_v52  ;;  %v1997_v55 = vadd.f32 %v3827_v1, %v1996_v27  ;;  %v1994_v32 = vadd.f32 %v3827_v1, %v5350_v53 }
 0x335   : > { %v1526_v5 = vpop.xlane.xlu1 %1525  ;;  %v1991_v27 = vadd.f32 %v3827_v1, %v5333_v14  ;;  %v1985_v53 = vadd.f32 %v3827_v1, %v5304_v20  ;;  %v1982_v14 = vadd.f32 %v3827_v1, %v5292_v35  ;;  %v1973_v20 = vadd.f32 %v3827_v1, %v5270_v50 }
 0x336   : > { %v1550_v38 = vsub.f32 %v5238_v34, %v1526_v5  ;;  %v990_v34 = vmul.f32 1.442695, %v964_v26  ;;  %3554 = vmatpush.xpose.msk.msra.mxu0 %vm744_vm1, %v2003_v16  ;;  %v1979_v5 = vadd.f32 %v3827_v1, %v5279_v7  ;;  %v1967_v35 = vadd.f32 %v3827_v1, %v5266_v8 }
 0x337   : > { %1818 = vmatmul.f32.gmra.mxu1 %v1054_v37  ;;  %v1970_v37 = vadd.f32 %v3827_v1, %v5268_v59  ;;  %v1964_v7 = vadd.f32 %v3827_v1, %v5260_v36  ;;  %v1961_v50 = vadd.f32 %v3827_v1, %v5254_v41  ;;  %v1958_v59 = vadd.f32 %v3827_v1, %v5243_v18 }
 0x338   : > { %v1573_v29 = vmul.f32 1.442695, %v1550_v38 }
 0x339   : > { %v5374_v39 = vpop.eup %3872 }
 0x33a   : > { %3874 = vpow2.f32 %v1573_v29  ;;  %952 = vmax.xlane.f32.xlu1 %v5094_v31  ;;  %1535 = vmax.xlane.f32.xlu0 %v5322_v12 }
 0x33b   : > { %3876 = vpow2.f32 %v988_v56  ;;  %1603 = vadd.xlane.f32.xlu2 %v5374_v39  ;;  %3555 = vmatpush.xpose.msk.msra.mxu0 %vm744_vm1, %v2000_v33 }
 0x33c   : > { %3878 = vpow2.f32 %v990_v34 }
 0x33d   : > { %v1528_v62 = vpop.xlane.xlu2 %1527  ;;  %v947_v24 = vpop.xlane.xlu1 %946 }
 0x33e   : > { %v1551_v63 = vsub.f32 %v5245_v19, %v1528_v62  ;;  %v992_v19 = vmul.f32 1.442695, %v965_v61  ;;  %v966_v44 = vsub.f32 %v5056_v54, %v947_v24  ;;  %v1988_v54 = vadd.f32 %v3827_v1, %v5318_v9 }
 0x33f   : > { %3556 = vmatpush.xpose.msk.msra.mxu0 %vm744_vm1, %v1997_v55  ;;  %v1976_v9 = vadd.f32 %v3827_v1, %v5272_v13  ;;  %v3515_v13 = vld [vmem:[%s6562_s3 + $0x58] sm:$0xff] }
 0x340   : > { %v5384_v49 = vpop.eup %3874  ;;  %v1575_v30 = vmul.f32 1.442695, %v1551_v63  ;;  %v994_v2 = vmul.f32 1.442695, %v966_v44  ;;  %1877 = vmatpush.msrb.mxu3 %v3515_v13 }
 0x341   : > { %v5386_v3 = vpop.eup %3876 }
 0x342   : > { %1020 = vadd.xlane.f32.xlu0 %v5386_v3  ;;  %1537 = vmax.xlane.f32.xlu1 %v5338_v47  ;;  %3880 = vpow2.f32 %v1575_v30  ;;  %v5394_v43 = vpop.eup %3878 }
 0x343   : > { %1605 = vadd.xlane.f32.xlu2 %v5384_v49  ;;  %3882 = vpow2.f32 %v992_v19  ;;  %3557 = vmatpush.xpose.msk.msra.mxu0 %vm744_vm1, %v1994_v32 }
 0x344   : > { %3884 = vpow2.f32 %v994_v2 }
 0x347   : > { %3558 = vmatpush.xpose.msk.msra.mxu0 %vm744_vm1, %v1991_v27 }
 0x348   : > { %v5397_v23 = vpop.eup %3880 }
 0x349   : > { %v5407_v10 = vpop.eup %3882 }
 0x34a   : > { %1022 = vadd.xlane.f32.xlu0 %v5394_v43  ;;  %1539 = vmax.xlane.f32.xlu1 %v5354_v25  ;;  %v5415_v15 = vpop.eup %3884 }
 0x34b   : > { %1607 = vadd.xlane.f32.xlu2 %v5397_v23  ;;  %3559 = vmatpush.xpose.msk.msra.mxu0 %vm744_vm1, %v1988_v54 }
 0x34f   : > { %3560 = vmatpush.xpose.msk.msra.mxu0 %vm744_vm1, %v1985_v53 }
 0x352   : > { %1024 = vadd.xlane.f32.xlu0 %v5407_v10  ;;  %1541 = vmax.xlane.f32.xlu1 %v5366_v51 }
 0x353   : > { %3561 = vmatpush.xpose.msk.msra.mxu0 %vm744_vm1, %v1982_v14 }
 0x357   : > { %3562 = vmatpush.xpose.msk.msra.mxu0 %vm744_vm1, %v1979_v5 }
 0x35a   : > { %1026 = vadd.xlane.f32.xlu0 %v5415_v15 }
 0x35b   : > { %3563 = vmatpush.xpose.msk.msra.mxu0 %vm744_vm1, %v1976_v9 }
 0x35f   : > { %3564 = vmatpush.xpose.msk.msra.mxu0 %vm744_vm1, %v1973_v20 }
 0x363   : > { %3565 = vmatpush.xpose.msk.msra.mxu0 %vm744_vm1, %v1970_v37 }
 0x367   : > { %3566 = vmatpush.xpose.msk.msra.mxu0 %vm744_vm1, %v1967_v35 }
 0x36b   : > { %3567 = vmatpush.xpose.msk.msra.mxu0 %vm744_vm1, %v1964_v7 }
 0x36f   : > { %3568 = vmatpush.xpose.msk.msra.mxu0 %vm744_vm1, %v1961_v50 }
 0x373   : > { %3569 = vmatpush.xpose.msk.msra.mxu0 %vm744_vm1, %v1958_v59 }
 0x37c   : > { %v1592_v38 = vpop.xlane.xlu2 %1591 }
 0x37d   : > { %3886 = vrcp.f32 %v1592_v38 }
 0x383   : > { %v3887_v36 = vpop.eup %3886 }
 0x384   : > { %v1639_v8 = vmul.f32 %v3887_v36, %v5290_v60  ;;  %v1013_v56 = vpop.xlane.xlu2 %1012  ;;  %v1594_v29 = vpop.xlane.xlu0 %1593 }
 0x385   : > { %3888 = vrcp.f32 %v1013_v56 }
 0x386   : > { %3890 = vrcp.f32 %v1594_v29  ;;  %1741 = vmatmul.f32.vlgmr.msrb.gmra.mxu0 %v1639_v8 }
 0x38b   : > { %v3889_v52 = vpop.eup %3888 }
 0x38c   : > { %v3891_v41 = vpop.eup %3890  ;;  %v1596_v26 = vpop.xlane.xlu1 %1595  ;;  %v1055_v18 = vmul.f32 %v3889_v52, %v5302_v11  ;;  %v3514_v11 = vld [vmem:[%s6562_s3 + $0x50] sm:$0xff] }
 0x38d   : > { %v949_v62 = vpop.xlane.xlu2 %948  ;;  %3892 = vrcp.f32 %v1596_v26  ;;  %v1530_v1 = vpop.xlane.xlu0 %1529  ;;  %v1640_v34 = vmul.f32 %v3891_v41, %v5306_v22  ;;  %1878 = vmatpush.msrb.mxu3 %v3514_v11  ;;  %v3512_v41 = vld [vmem:[%s6562_s3 + $0x40] sm:$0xff] }
 0x38e   : > { %v1552_v63 = vsub.f32 %v5274_v42, %v1530_v1  ;;  %1821 = vmatmul.f32.gmra.mxu1 %v1055_v18  ;;  %v967_v30 = vsub.f32 %v5064_v46, %v949_v62 }
 0x38f   : > { %1744 = vmatmul.f32.gmra.mxu0 %v1640_v34 }
 0x390   : > { %v1577_v60 = vmul.f32 1.442695, %v1552_v63  ;;  %v996_v42 = vmul.f32 1.442695, %v967_v30 }
 0x392   : > { %3894 = vpow2.f32 %v1577_v60 }
 0x393   : > { %v3893_v17 = vpop.eup %3892 }
 0x394   : > { %v1532_v16 = vpop.xlane.xlu1 %1531  ;;  %v1641_v61 = vmul.f32 %v3893_v17, %v5314_v6 }
 0x395   : > { %v1598_v33 = vpop.xlane.xlu2 %1597  ;;  %v1015_v19 = vpop.xlane.xlu0 %1014  ;;  %v1553_v22 = vsub.f32 %v5281_v28, %v1532_v16  ;;  %v5494_v16 = vld [vmem:[%s4350_s29 + $0x8] sm:$0xff] }
 0x396   : > { %3896 = vrcp.f32 %v1598_v33 }
 0x397   : > { %3898 = vrcp.f32 %v1015_v19  ;;  %v1579_v24 = vmul.f32 1.442695, %v1553_v22  ;;  %1747 = vmatmul.f32.gmra.mxu0 %v1641_v61 }
 0x398   : > { %v5450_v46 = vpop.eup %3894 }
 0x399   : > { %3900 = vpow2.f32 %v1579_v24  ;;  %1609 = vadd.xlane.f32.xlu2 %v5450_v46 }
 0x39a   : > { %3902 = vpow2.f32 %v996_v42 }
 0x39c   : > { %v3897_v6 = vpop.eup %3896  ;;  %v1017_v55 = vpop.xlane.xlu1 %1016 }
 0x39d   : > { %v3899_v44 = vpop.eup %3898  ;;  %v1600_v32 = vpop.xlane.xlu0 %1599  ;;  %3904 = vrcp.f32 %v1017_v55  ;;  %v1642_v28 = vmul.f32 %v3897_v6, %v5330_v21  ;;  %v5506_v55 = vld [vmem:[%s4350_s29 + $0x10] sm:$0xff] }
 0x39e   : > { %v1534_v2 = vpop.xlane.xlu2 %1533  ;;  %3906 = vrcp.f32 %v1600_v32  ;;  %v1056_v54 = vmul.f32 %v3899_v44, %v5328_v58 }
 0x39f   : > { %v1554_v27 = vsub.f32 %v5295_v57, %v1534_v2  ;;  %v5456_v53 = vpop.eup %3900  ;;  %1750 = vmatmul.f32.gmra.mxu0 %v1642_v28 }
 0x3a0   : > { %v5458_v14 = vpop.eup %3902  ;;  %1824 = vmatmul.f32.gmra.mxu1 %v1056_v54  ;;  %1611 = vadd.xlane.f32.xlu1 %v5456_v53 }
 0x3a1   : > { %v1581_v5 = vmul.f32 1.442695, %v1554_v27  ;;  %1028 = vadd.xlane.f32.xlu2 %v5458_v14 }
 0x3a3   : > { %3908 = vpow2.f32 %v1581_v5  ;;  %v3905_v9 = vpop.eup %3904  ;;  %v5517_v5 = vld [vmem:[%s4350_s29 + $0x18] sm:$0xff] }
 0x3a4   : > { %v3907_v20 = vpop.eup %3906  ;;  %v1057_v21 = vmul.f32 %v3905_v9, %v5345_v4  ;;  %v3513_v4 = vld [vmem:[%s6562_s3 + $0x48] sm:$0xff] }
 0x3a5   : > { %v951_v37 = vpop.xlane.xlu0 %950  ;;  %v1602_v57 = vpop.xlane.xlu1 %1601  ;;  %v1643_v58 = vmul.f32 %v3907_v20, %v5347_v48  ;;  %1879 = vmatpush.msrb.mxu3 %v3513_v4  ;;  %v5526_v20 = vld [vmem:[%s4350_s29 + $0x20] sm:$0xff] }
 0x3a6   : > { %v968_v35 = vsub.f32 %v5080_v45, %v951_v37  ;;  %3910 = vrcp.f32 %v1602_v57  ;;  %v1019_v7 = vpop.xlane.xlu2 %1018  ;;  %v5537_v57 = vld [vmem:[%s4350_s29 + $0x30] sm:$0xff] }
 0x3a7   : > { %3912 = vrcp.f32 %v1019_v7  ;;  %1753 = vmatmul.f32.gmra.mxu0 %v1643_v58  ;;  %1880 = vmatpush.msrb.mxu3 %v3512_v41  ;;  %v5542_v58 = vld [vmem:[%s4350_s29 + $0x38] sm:$0xff]  ;;  %v5557_v7 = vld [vmem:[%s4350_s29 + $0x50] sm:$0xff] }
 0x3a8   : > { %v998_v50 = vmul.f32 1.442695, %v968_v35  ;;  %1827 = vmatmul.f32.gmra.mxu1 %v1057_v21  ;;  %v5547_v35 = vld [vmem:[%s4350_s29 + $0x40] sm:$0xff] }
 0x3a9   : > { %v5465_v13 = vpop.eup %3908 }
 0x3aa   : > { %1613 = vadd.xlane.f32.xlu0 %v5465_v13  ;;  %3914 = vpow2.f32 %v998_v50  ;;  %v5562_v50 = vld [vmem:[%s4350_s29 + $0x58] sm:$0xff] }
 0x3ac   : > { %v3911_v59 = vpop.eup %3910 }
 0x3ad   : > { %v3913_v48 = vpop.eup %3912  ;;  %v953_v38 = vpop.xlane.xlu1 %952  ;;  %v1644_v36 = vmul.f32 %v3911_v59, %v5362_v40  ;;  %v5567_v59 = vld [vmem:[%s4350_s29 + $0x60] sm:$0xff] }
 0x3ae   : > { %v1536_v45 = vpop.xlane.xlu0 %1535  ;;  %v969_v8 = vsub.f32 %v5094_v31, %v953_v38  ;;  %v1604_v56 = vpop.xlane.xlu2 %1603  ;;  %v1058_v52 = vmul.f32 %v3913_v48, %v5360_v0  ;;  %v5482_v31 = vld [vmem:[%s4350_s29] sm:$0xff] }
 0x3af   : > { %v1555_v29 = vsub.f32 %v5322_v12, %v1536_v45  ;;  %3916 = vrcp.f32 %v1604_v56  ;;  %1756 = vmatmul.f32.gmra.mxu0 %v1644_v36  ;;  %3517 = vmatmul.msk.f32.vlgmr.msrb.gmra.mxu3 %vm509_vm0, %v5482_v31 }
 0x3b0   : > { %v5478_v26 = vpop.eup %3914  ;;  %v1000_v62 = vmul.f32 1.442695, %v969_v8  ;;  %1830 = vmatmul.f32.gmra.mxu1 %v1058_v52  ;;  %v5573_v8 = vld [vmem:[%s4350_s29 + $0x68] sm:$0xff] }
 0x3b1   : > { %v1583_v18 = vmul.f32 1.442695, %v1555_v29  ;;  %1030 = vadd.xlane.f32.xlu1 %v5478_v26 }
 0x3b2   : > { %3918 = vpow2.f32 %v1000_v62 }
 0x3b3   : > { %3920 = vpow2.f32 %v1583_v18  ;;  %v5580_v18 = vld [vmem:[%s4350_s29 + $0x70] sm:$0xff] }
 0x3b5   : > { %v3917_v12 = vpop.eup %3916  ;;  %v1538_v40 = vpop.xlane.xlu1 %1537 }
 0x3b6   : > { %v1021_v0 = vpop.xlane.xlu0 %1020  ;;  %v1606_v1 = vpop.xlane.xlu2 %1605  ;;  %v1556_v34 = vsub.f32 %v5338_v47, %v1538_v40  ;;  %v1645_v63 = vmul.f32 %v3917_v12, %v5374_v39  ;;  %v5586_v40 = vld [vmem:[%s4350_s29 + $0x78] sm:$0xff] }
 0x3b7   : > { %3922 = vrcp.f32 %v1021_v0  ;;  %3518 = vmatmul.msk.f32.gmra.mxu3 %vm509_vm0, %v5494_v16 }
 0x3b8   : > { %3924 = vrcp.f32 %v1606_v1  ;;  %v5488_v60 = vpop.eup %3918  ;;  %v1585_v30 = vmul.f32 1.442695, %v1556_v34  ;;  %1759 = vmatmul.f32.gmra.mxu0 %v1645_v63 }
 0x3b9   : > { %v5490_v17 = vpop.eup %3920  ;;  %1032 = vadd.xlane.f32.xlu0 %v5488_v60 }
 0x3ba   : > { %3926 = vpow2.f32 %v1585_v30  ;;  %1615 = vadd.xlane.f32.xlu2 %v5490_v17 }
 0x3bd   : > { %v3923_v47 = vpop.eup %3922  ;;  %v1540_v11 = vpop.xlane.xlu1 %1539 }
 0x3be   : > { %v3925_v39 = vpop.eup %3924  ;;  %v1023_v61 = vpop.xlane.xlu0 %1022  ;;  %v1059_v33 = vmul.f32 %v3923_v47, %v5386_v3  ;;  %v1557_v22 = vsub.f32 %v5354_v25, %v1540_v11 }
 0x3bf   : > { %v1608_v19 = vpop.xlane.xlu2 %1607  ;;  %3928 = vrcp.f32 %v1023_v61  ;;  %v1646_v42 = vmul.f32 %v3925_v39, %v5384_v49  ;;  %3519 = vmatmul.msk.f32.gmra.mxu3 %vm509_vm0, %v5506_v55  ;;  %v5593_v11 = vpop.f32.mrf.mxu1 }
 0x3c0   : > { %3930 = vrcp.f32 %v1608_v19  ;;  %1833 = vmatmul.f32.gmra.mxu1 %v1059_v33  ;;  %v5502_v24 = vpop.eup %3926  ;;  %v1587_v6 = vmul.f32 1.442695, %v1557_v22  ;;  %6627 = vst [vmem:[#allocation19_spill] sm:$0xff] %v5593_v11 }
 0x3c1   : > { %1762 = vmatmul.f32.gmra.mxu0 %v1646_v42  ;;  %1617 = vadd.xlane.f32.xlu1 %v5502_v24  ;;  %v3605_v42 = vld [vmem:[%s6566_s7 + $0x58] sm:$0xff] }
 0x3c2   : > { %3932 = vpow2.f32 %v1587_v6  ;;  %2344 = vmatpush.msra.mxu1 %v3605_v42  ;;  %v5697_v42 = vld [vmem:[%s4549_s20 + $0x38] sm:$0xff] }
 0x3c5   : > { %v3929_v3 = vpop.eup %3928  ;;  %v1542_v32 = vpop.xlane.xlu1 %1541 }
 0x3c6   : > { %v3931_v44 = vpop.eup %3930  ;;  %v1025_v25 = vpop.xlane.xlu0 %1024  ;;  %v1060_v49 = vmul.f32 %v3929_v3, %v5394_v43  ;;  %v1558_v2 = vsub.f32 %v5366_v51, %v1542_v32  ;;  %v3603_v32 = vld [vmem:[%s6566_s7 + $0x48] sm:$0xff] }
 0x3c7   : > { %3934 = vrcp.f32 %v1025_v25  ;;  %v1647_v28 = vmul.f32 %v3931_v44, %v5397_v23  ;;  %3520 = vmatmul.msk.f32.gmra.mxu3 %vm509_vm0, %v5517_v5 }
 0x3c8   : > { %1836 = vmatmul.f32.gmra.mxu1 %v1060_v49  ;;  %v5513_v27 = vpop.eup %3932  ;;  %v1589_v54 = vmul.f32 1.442695, %v1558_v2  ;;  %v3602_v49 = vld [vmem:[%s6566_s7 + $0x40] sm:$0xff] }
 0x3c9   : > { %1765 = vmatmul.f32.gmra.mxu0 %v1647_v28  ;;  %1619 = vadd.xlane.f32.xlu2 %v5513_v27 }
 0x3ca   : > { %3936 = vpow2.f32 %v1589_v54 }
 0x3cd   : > { %v3935_v43 = vpop.eup %3934 }
 0x3ce   : > { %v1027_v51 = vpop.xlane.xlu0 %1026  ;;  %v1061_v23 = vmul.f32 %v3935_v43, %v5407_v10  ;;  %v5532_v10 = vld [vmem:[%s4350_s29 + $0x28] sm:$0xff]  ;;  %v5619_v43 = vld [vmem:[%s4549_s20] sm:$0xff] }
 0x3cf   : > { %3938 = vrcp.f32 %v1027_v51  ;;  %3521 = vmatmul.msk.f32.gmra.mxu3 %vm509_vm0, %v5526_v20  ;;  %v5626_v51 = vld [vmem:[%s6563_s4 + $0x2] ss:$0 sm:$0xff] }
 0x3d0   : > { %1839 = vmatmul.f32.gmra.mxu1 %v1061_v23  ;;  %v5522_v9 = vpop.eup %3936 }
 0x3d1   : > { %1621 = vadd.xlane.f32.xlu0 %v5522_v9 }
 0x3d5   : > { %v3939_v21 = vpop.eup %3938 }
 0x3d6   : > { %v1062_v37 = vmul.f32 %v3939_v21, %v5415_v15  ;;  %v5552_v15 = vld [vmem:[%s4350_s29 + $0x48] sm:$0xff] }
 0x3d7   : > { %3522 = vmatmul.msk.f32.gmra.mxu3 %vm509_vm0, %v5532_v10 }
 0x3d8   : > { %1842 = vmatmul.f32.gmra.mxu1 %v1062_v37 }
 0x3df   : > { %3523 = vmatmul.msk.f32.gmra.mxu3 %vm509_vm0, %v5537_v57 }
 0x3e7   : > { %3524 = vmatmul.msk.f32.gmra.mxu3 %vm509_vm0, %v5542_v58 }
 0x3ef   : > { %3525 = vmatmul.msk.f32.gmra.mxu3 %vm509_vm0, %v5547_v35 }
 0x3f7   : > { %3526 = vmatmul.msk.f32.gmra.mxu3 %vm509_vm0, %v5552_v15 }
 0x3ff   : > { %3527 = vmatmul.msk.f32.gmra.mxu3 %vm509_vm0, %v5557_v7 }
 0x403   : > { %v5601_v6 = vpop.f32.mrf.mxu0 }
 0x404   : > { %6629 = vst [vmem:[#allocation6_spill] sm:$0xff] %v5601_v6 }
 0x407   : > { %3528 = vmatmul.msk.f32.gmra.mxu3 %vm509_vm0, %v5562_v50 }
 0x40c   : > { %v1610_v4 = vpop.xlane.xlu2 %1609  ;;  %v5615_v28 = vpop.f32.mrf.mxu0 }
 0x40d   : > { %3940 = vrcp.f32 %v1610_v4  ;;  %6631 = vst [vmem:[#allocation8_spill] sm:$0xff] %v5615_v28  ;;  %v4134_v28 = vld [vmem:[%s4370_s30 + $0x60] sm:$0xff] }
 0x40f   : > { %3529 = vmatmul.msk.f32.gmra.mxu3 %vm509_vm0, %v5567_v59 }
 0x413   : > { %v3941_v48 = vpop.eup %3940  ;;  %v1612_v38 = vpop.xlane.xlu1 %1611 }
 0x414   : > { %v1029_v45 = vpop.xlane.xlu2 %1028  ;;  %3942 = vrcp.f32 %v1612_v38  ;;  %v1648_v36 = vmul.f32 %v3941_v48, %v5450_v46  ;;  %v5631_v4 = vpop.f32.mrf.mxu0 }
 0x415   : > { %3944 = vrcp.f32 %v1029_v45  ;;  %6633 = vst [vmem:[#allocation10_spill] sm:$0xff] %v5631_v4  ;;  %v5641_v45 = vld [vmem:[%s4549_s20 + $0x10] sm:$0xff]  ;;  %v4133_v4 = vld [vmem:[%s4370_s30 + $0x58] sm:$0xff] }
 0x416   : > { %1768 = vmatmul.f32.gmra.mxu0 %v1648_v36 }
 0x417   : > { %3530 = vmatmul.msk.f32.gmra.mxu3 %vm509_vm0, %v5573_v8 }
 0x41a   : > { %v3943_v56 = vpop.eup %3942 }
 0x41b   : > { %v3945_v29 = vpop.eup %3944  ;;  %v1649_v52 = vmul.f32 %v3943_v56, %v5456_v53 }
 0x41c   : > { %v1063_v62 = vmul.f32 %v3945_v29, %v5458_v14  ;;  %v5647_v56 = vpop.f32.mrf.mxu0 }
 0x41d   : > { %v1614_v41 = vpop.xlane.xlu0 %1613  ;;  %6635 = vst [vmem:[#allocation12_spill] sm:$0xff] %v5647_v56  ;;  %v4132_v56 = vld [vmem:[%s4370_s30 + $0x50] sm:$0xff] }
 0x41e   : > { %3946 = vrcp.f32 %v1614_v41  ;;  %1771 = vmatmul.f32.gmra.mxu0 %v1649_v52  ;;  %1845 = vmatmul.f32.gmra.mxu1 %v1063_v62  ;;  %v5652_v41 = vld [vmem:[%s4549_s20 + $0x18] sm:$0xff] }
 0x41f   : > { %3531 = vmatmul.msk.f32.gmra.mxu3 %vm509_vm0, %v5580_v18 }
 0x424   : > { %v3947_v46 = vpop.eup %3946  ;;  %v1031_v12 = vpop.xlane.xlu1 %1030 }
 0x425   : > { %v1650_v0 = vmul.f32 %v3947_v46, %v5465_v13  ;;  %3948 = vrcp.f32 %v1031_v12  ;;  %v5659_v46 = vpop.f32.mrf.mxu0 }
 0x426   : > { %6637 = vst [vmem:[#allocation14_spill] sm:$0xff] %v5659_v46  ;;  %v4131_v46 = vld [vmem:[%s4370_s30 + $0x48] sm:$0xff] }
 0x427   : > { %1774 = vmatmul.f32.gmra.mxu0 %v1650_v0  ;;  %3532 = vmatmul.msk.f32.gmra.mxu3 %vm509_vm0, %v5586_v40  ;;  %v5663_v0 = vld [vmem:[%s4549_s20 + $0x20] sm:$0xff] }
 0x42b   : > { %v3949_v53 = vpop.eup %3948 }
 0x42c   : > { %v1033_v14 = vpop.xlane.xlu0 %1032  ;;  %v1064_v1 = vmul.f32 %v3949_v53, %v5478_v26 }
 0x42d   : > { %v1616_v34 = vpop.xlane.xlu2 %1615  ;;  %3950 = vrcp.f32 %v1033_v14 }
 0x42e   : > { %3952 = vrcp.f32 %v1616_v34  ;;  %1848 = vmatmul.f32.gmra.mxu1 %v1064_v1  ;;  %v5670_v1 = vpop.f32.mrf.mxu0 }
 0x42f   : > { %6639 = vst [vmem:[#allocation16_spill] sm:$0xff] %v5670_v1 }
 0x432   : > { %v1882_v39 = vpop.f32.mrf.mxu3 }
 0x433   : > { %v3951_v63 = vpop.eup %3950  ;;  %v1883_v21 = vadd.f32 %v5626_v51, %v1882_v39 }
 0x434   : > { %v3953_v30 = vpop.eup %3952  ;;  %v1618_v47 = vpop.xlane.xlu1 %1617  ;;  %v1065_v13 = vmul.f32 %v3951_v63, %v5488_v60  ;;  %v5674_v63 = vld [vmem:[%s4549_s20 + $0x28] sm:$0xff] }
 0x435   : > { %3954 = vrcp.f32 %v1618_v47  ;;  %v1651_v61 = vmul.f32 %v3953_v30, %v5490_v17  ;;  %v5599_v60 = vpop.f32.mrf.mxu1 }
 0x436   : > { %1851 = vmatmul.f32.gmra.mxu1 %v1065_v13  ;;  %6628 = vst [vmem:[#allocation5_spill] sm:$0xff] %v5599_v60  ;;  %v5682_v39 = vpop.f32.mrf.mxu0 }
 0x437   : > { %1777 = vmatmul.f32.gmra.mxu0 %v1651_v61  ;;  %6641 = vst [vmem:[#allocation18_spill] sm:$0xff] %v5682_v39  ;;  %v3646_v61 = vld [vmem:[%s6564_s5 + $0x78] sm:$0xff] }
 0x438   : > { %2575 = vmatpush.msrb.mxu0 %v3646_v61 }
 0x43a   : > { %v1885_v22 = vpop.f32.mrf.mxu3 }
 0x43b   : > { %v3955_v33 = vpop.eup %3954  ;;  %v1886_v38 = vadd.f32 %v5626_v51, %v1885_v22 }
 0x43c   : > { %v1620_v19 = vpop.xlane.xlu2 %1619  ;;  %v1652_v26 = vmul.f32 %v3955_v33, %v5502_v24  ;;  %v3604_v24 = vld [vmem:[%s6566_s7 + $0x50] sm:$0xff] }
 0x43d   : > { %3956 = vrcp.f32 %v1620_v19  ;;  %2345 = vmatpush.msra.mxu1 %v3604_v24  ;;  %v5613_v2 = vpop.f32.mrf.mxu1  ;;  %v5688_v33 = vld [vmem:[%s4549_s20 + $0x30] sm:$0xff]  ;;  %v5708_v24 = vld [vmem:[%s4549_s20 + $0x40] sm:$0xff] }
 0x43e   : > { %6630 = vst [vmem:[#allocation7_spill] sm:$0xff] %v5613_v2 }
 0x43f   : > { %1780 = vmatmul.f32.gmra.mxu0 %v1652_v26  ;;  %2346 = vmatpush.msra.mxu1 %v3603_v32 }
 0x441   : > { %2347 = vmatpush.msra.mxu1 %v3602_v49 }
 0x442   : > { %v1888_v25 = vpop.f32.mrf.mxu3  ;;  %3606 = vmatmul.msk.f32.vlgmr.msra.gmra.mxu1 %vm509_vm0, %v5619_v43 }
 0x443   : > { %v3957_v17 = vpop.eup %3956  ;;  %v1889_v29 = vadd.f32 %v5626_v51, %v1888_v25 }
 0x444   : > { %v1622_v3 = vpop.xlane.xlu0 %1621  ;;  %v1653_v44 = vmul.f32 %v3957_v17, %v5513_v27  ;;  %v5701_v17 = vpop.f32.mrf.mxu0 }
 0x445   : > { %3958 = vrcp.f32 %v1622_v3  ;;  %v5629_v37 = vpop.f32.mrf.mxu1  ;;  %6643 = vst [vmem:[#allocation21_spill] sm:$0xff] %v5701_v17 }
 0x446   : > { %6632 = vst [vmem:[#allocation9_spill] sm:$0xff] %v5629_v37 }
 0x447   : > { %1783 = vmatmul.f32.gmra.mxu0 %v1653_v44 }
 0x44a   : > { %v1891_v23 = vpop.f32.mrf.mxu3 }
 0x44b   : > { %v3959_v27 = vpop.eup %3958  ;;  %v1892_v12 = vadd.f32 %v5626_v51, %v1891_v23 }
 0x44c   : > { %v1654_v54 = vmul.f32 %v3959_v27, %v5522_v9  ;;  %v5634_v9 = vld [vmem:[%s4549_s20 + $0x8] sm:$0xff]  ;;  %v5713_v32 = vpop.f32.mrf.mxu0 }
 0x44d   : > { %3607 = vmatmul.msk.f32.gmra.mxu1 %vm509_vm0, %v5634_v9  ;;  %v5645_v36 = vpop.f32.mrf.mxu1  ;;  %6645 = vst [vmem:[#allocation23_spill] sm:$0xff] %v5713_v32 }
 0x44e   : > { %6634 = vst [vmem:[#allocation11_spill] sm:$0xff] %v5645_v36 }
 0x44f   : > { %1786 = vmatmul.f32.gmra.mxu0 %v1654_v54  ;;  %v5719_v54 = vld [vmem:[%s4549_s20 + $0x48] sm:$0xff] }
 0x452   : > { %v1894_v48 = vpop.f32.mrf.mxu3 }
 0x453   : > { %v1895_v34 = vadd.f32 %v5626_v51, %v1894_v48 }
 0x455   : > { %3608 = vmatmul.msk.f32.gmra.mxu1 %vm509_vm0, %v5641_v45  ;;  %v5656_v62 = vpop.f32.mrf.mxu1 }
 0x456   : > { %6636 = vst [vmem:[#allocation13_spill] sm:$0xff] %v5656_v62 }
 0x457   : > { %3570 = vmatmul.msk.f32.vlgmr.msra.gmra.mxu0 %vm744_vm1, %v1883_v21 }
 0x45a   : > { %v1897_v52 = vpop.f32.mrf.mxu3 }
 0x45b   : > { %v1898_v13 = vadd.f32 %v5626_v51, %v1897_v52 }
 0x45d   : > { %3609 = vmatmul.msk.f32.gmra.mxu1 %vm509_vm0, %v5652_v41  ;;  %v5667_v53 = vpop.f32.mrf.mxu1 }
 0x45e   : > { %6638 = vst [vmem:[#allocation15_spill] sm:$0xff] %v5667_v53 }
 0x45f   : > { %3571 = vmatmul.msk.f32.gmra.mxu0 %vm744_vm1, %v1886_v38  ;;  %v3645_v38 = vld [vmem:[%s6564_s5 + $0x70] sm:$0xff] }
 0x460   : > { %2576 = vmatpush.msrb.mxu0 %v3645_v38 }
 0x462   : > { %v1900_v14 = vpop.f32.mrf.mxu3 }
 0x463   : > { %v1901_v22 = vadd.f32 %v5626_v51, %v1900_v14 }
 0x465   : > { %3610 = vmatmul.msk.f32.gmra.mxu1 %vm509_vm0, %v5663_v0  ;;  %v5679_v30 = vpop.f32.mrf.mxu1 }
 0x466   : > { %6640 = vst [vmem:[#allocation17_spill] sm:$0xff] %v5679_v30 }
 0x467   : > { %3572 = vmatmul.msk.f32.gmra.mxu0 %vm744_vm1, %v1889_v29  ;;  %v5731_v29 = vld [vmem:[%s4549_s20 + $0x50] sm:$0xff] }
 0x46a   : > { %v1903_v47 = vpop.f32.mrf.mxu3 }
 0x46b   : > { %v1904_v44 = vadd.f32 %v5626_v51, %v1903_v47  ;;  %v5742_v47 = vld [vmem:[%s4549_s20 + $0x58] sm:$0xff] }
 0x46c   : > { %6650 = vst [vmem:[#allocation28_spill] sm:$0xff] %v5742_v47 }
 0x46d   : > { %3611 = vmatmul.msk.f32.gmra.mxu1 %vm509_vm0, %v5674_v63  ;;  %v5693_v19 = vpop.f32.mrf.mxu1 }
 0x46e   : > { %6642 = vst [vmem:[#allocation20_spill] sm:$0xff] %v5693_v19 }
 0x46f   : > { %3573 = vmatmul.msk.f32.gmra.mxu0 %vm744_vm1, %v1892_v12 }
 0x472   : > { %v1906_v26 = vpop.f32.mrf.mxu3 }
 0x473   : > { %v1907_v49 = vadd.f32 %v5626_v51, %v1906_v26 }
 0x475   : > { %3612 = vmatmul.msk.f32.gmra.mxu1 %vm509_vm0, %v5688_v33  ;;  %v5704_v3 = vpop.f32.mrf.mxu1 }
 0x476   : > { %6644 = vst [vmem:[#allocation22_spill] sm:$0xff] %v5704_v3 }
 0x477   : > { %3574 = vmatmul.msk.f32.gmra.mxu0 %vm744_vm1, %v1895_v34 }
 0x47a   : > { %v1909_v25 = vpop.f32.mrf.mxu3 }
 0x47b   : > { %v1910_v48 = vadd.f32 %v5626_v51, %v1909_v25 }
 0x47d   : > { %3613 = vmatmul.msk.f32.gmra.mxu1 %vm509_vm0, %v5697_v42  ;;  %v5716_v27 = vpop.f32.mrf.mxu1 }
 0x47e   : > { %6646 = vst [vmem:[#allocation24_spill] sm:$0xff] %v5716_v27 }
 0x47f   : > { %3575 = vmatmul.msk.f32.gmra.mxu0 %vm744_vm1, %v1898_v13 }
 0x482   : > { %v1912_v23 = vpop.f32.mrf.mxu3 }
 0x483   : > { %v1913_v34 = vadd.f32 %v5626_v51, %v1912_v23  ;;  %v3644_v23 = vld [vmem:[%s6564_s5 + $0x68] sm:$0xff] }
 0x484   : > { %2577 = vmatpush.msrb.mxu0 %v3644_v23  ;;  %v5781_v23 = vld [vmem:[%s4549_s20 + $0x70] sm:$0xff] }
 0x485   : > { %3614 = vmatmul.msk.f32.gmra.mxu1 %vm509_vm0, %v5708_v24  ;;  %v5735_v52 = vpop.f32.mrf.mxu1  ;;  %6659 = vst [vmem:[#allocation37_spill] sm:$0xff] %v5781_v23 }
 0x486   : > { %6648 = vst [vmem:[#allocation26_spill] sm:$0xff] %v5735_v52 }
 0x487   : > { %3576 = vmatmul.msk.f32.gmra.mxu0 %vm744_vm1, %v1901_v22 }
 0x48a   : > { %v1915_v12 = vpop.f32.mrf.mxu3 }
 0x48b   : > { %v1916_v26 = vadd.f32 %v5626_v51, %v1915_v12  ;;  %v5767_v12 = vld [vmem:[%s4549_s20 + $0x68] sm:$0xff] }
 0x48c   : > { %6656 = vst [vmem:[#allocation34_spill] sm:$0xff] %v5767_v12 }
 0x48d   : > { %3615 = vmatmul.msk.f32.gmra.mxu1 %vm509_vm0, %v5719_v54  ;;  %v5747_v13 = vpop.f32.mrf.mxu1 }
 0x48e   : > { %6651 = vst [vmem:[#allocation29_spill] sm:$0xff] %v5747_v13 }
 0x48f   : > { %3577 = vmatmul.msk.f32.gmra.mxu0 %vm744_vm1, %v1904_v44  ;;  %v5753_v44 = vld [vmem:[%s4549_s20 + $0x60] sm:$0xff] }
 0x490   : > { %6653 = vst [vmem:[#allocation31_spill] sm:$0xff] %v5753_v44 }
 0x492   : > { %v1918_v61 = vpop.f32.mrf.mxu3 }
 0x493   : > { %v5724_v21 = vpop.f32.mrf.mxu0 }
 0x494   : > { %6647 = vst [vmem:[#allocation25_spill] sm:$0xff] %v5724_v21 }
 0x495   : > { %3616 = vmatmul.msk.f32.gmra.mxu1 %vm509_vm0, %v5731_v29 }
 0x497   : > { %3578 = vmatmul.msk.f32.gmra.mxu0 %vm744_vm1, %v1907_v49  ;;  %v1919_v49 = vadd.f32 %v5626_v51, %v1918_v61 }
 0x49a   : > { %v1921_v38 = vpop.f32.mrf.mxu3 }
 0x49b   : > { %v5738_v14 = vpop.f32.mrf.mxu0  ;;  %v5758_v25 = vpop.f32.mrf.mxu1 }
 0x49c   : > { %6649 = vst [vmem:[#allocation27_spill] sm:$0xff] %v5738_v14 }
 0x49d   : > { %3617 = vmatmul.msk.f32.gmra.mxu1 %vm509_vm0, %v5742_v47  ;;  %6654 = vst [vmem:[#allocation32_spill] sm:$0xff] %v5758_v25 }
 0x49f   : > { %3579 = vmatmul.msk.f32.gmra.mxu0 %vm744_vm1, %v1910_v48 }
 0x4a2   : > { %v1924_v13 = vpop.f32.mrf.mxu3 }
 0x4a4   : > { %v5750_v22 = vpop.f32.mrf.mxu0 }
 0x4a5   : > { %6652 = vst [vmem:[#allocation30_spill] sm:$0xff] %v5750_v22  ;;  %3618 = vmatmul.msk.f32.gmra.mxu1 %vm509_vm0, %v5753_v44 }
 0x4a7   : > { %3580 = vmatmul.msk.f32.gmra.mxu0 %vm744_vm1, %v1913_v34  ;;  %v3643_v34 = vld [vmem:[%s6564_s5 + $0x60] sm:$0xff] }
 0x4a8   : > { %2578 = vmatpush.msrb.mxu0 %v3643_v34 }
 0x4ab   : > { %v5775_v61 = vpop.f32.mrf.mxu1 }
 0x4ac   : > { %6657 = vst [vmem:[#allocation35_spill] sm:$0xff] %v5775_v61  ;;  %v5792_v61 = vld [vmem:[%s4549_s20 + $0x78] sm:$0xff]  ;;  %s3164_s20 = scalar_lea.hbm %s6569_s10, %s3741_s24 }
 0x4ad   : > { %3619 = vmatmul.msk.f32.gmra.mxu1 %vm509_vm0, %v5767_v12  ;;  %6662 = vst [vmem:[#allocation40_spill] sm:$0xff] %v5792_v61  ;;  %s3167_s19 = sshll.u32 %s3164_s20, 4  ;;  %s3168_s19 = int_to_ptr.hbm [resolvable:$true] %s3167_s19 }
 0x4ae   : > { %s4152_s29 = sshra.s32 %s3168_s19, 4  ;;  %s4153_s29 = int_to_ptr.hbm [resolvable:$true] %s4152_s29 }
 0x4af   : > { %3581 = vmatmul.msk.f32.gmra.mxu0 %vm744_vm1, %v1916_v26  ;;  %v1922_v26 = vadd.f32 %v5626_v51, %v1921_v38  ;;  %v1927_v38 = vpop.f32.mrf.mxu3  ;;  %s4154_s1 = scalar_lea.hbm %s4153_s29, 512  ;;  %p4159_p1 = scmp.lt.s32.totalorder %s4153_s29, %s6569_s10 }
 0x4b0   : > { %p4155_p12 = scmp.ne.s32.totalorder %s4153_s29, %s4154_s1 }
 0x4b2   : > { %p4156_p13 = pnand %p4155_p12, %p4315_p4 }
 0x4b4   : > { %v5764_v48 = vpop.f32.mrf.mxu0  ;;  %p4157_p0 = pneg %p4156_p13 }
 0x4b5   : > { %6655 = vst [vmem:[#allocation33_spill] sm:$0xff] %v5764_v48  ;;  %3620 = vmatmul.msk.f32.gmra.mxu1 %vm509_vm0, %v5781_v23  ;;  %v5786_v48 = vpop.f32.mrf.mxu1  ;;  %v4136_v23 = vld [vmem:[%s4370_s30 + $0x70] sm:$0xff] }
 0x4b6   : > { %6660 = vst [vmem:[#allocation38_spill] sm:$0xff] %v5786_v48 }
 0x4b7   : > { %3582 = vmatmul.msk.f32.gmra.mxu0 %vm744_vm1, %v1919_v49  ;;  %v1925_v49 = vadd.f32 %v5626_v51, %v1924_v13 }
 0x4bc   : > { %v5778_v25 = vpop.f32.mrf.mxu0 }
 0x4bd   : > { %6658 = vst [vmem:[#allocation36_spill] sm:$0xff] %v5778_v25  ;;  %3621 = vmatmul.msk.f32.gmra.mxu1 %vm509_vm0, %v5792_v61  ;;  %v4135_v61 = vld [vmem:[%s4370_s30 + $0x68] sm:$0xff] }
 0x4bf   : > { %3583 = vmatmul.msk.f32.gmra.mxu0 %vm744_vm1, %v1922_v26  ;;  %v5797_v25 = vpop.f32.mrf.mxu1  ;;  %v1928_v26 = vadd.f32 %v5626_v51, %v1927_v38  ;;  %v4123_v38 = vld [vmem:[%s4370_s30 + $0x8] sm:$0xff] }
 0x4c4   : > { %v5789_v34 = vpop.f32.mrf.mxu0 }
 0x4c5   : > { %6661 = vst [vmem:[#allocation39_spill] sm:$0xff] %v5789_v34 }
 0x4c7   : > { %3584 = vmatmul.msk.f32.gmra.mxu0 %vm744_vm1, %v1925_v49  ;;  %v4122_v49 = vld [vmem:[%s4370_s30] sm:$0xff] }
 0x4ca   : > { %v5803_v13 = vpop.f32.mrf.mxu1 }
 0x4cc   : > { %v5800_v52 = vpop.f32.mrf.mxu0 }
 0x4cd   : > { %6663 = vst [vmem:[#allocation41_spill] sm:$0xff] %v5800_v52 }
 0x4cf   : > { %3585 = vmatmul.msk.f32.gmra.mxu0 %vm744_vm1, %v1928_v26 }
 0x4d2   : > { %v5812_v34 = vpop.f32.mrf.mxu1 }
 0x4d4   : > { %v5805_v48 = vpop.f32.mrf.mxu0 }
 0x4d5   : > { %3586 = vst [vmem:[%s4955_s12 + $0x100] sm:$0xff] %v5805_v48  ;;  %2183 = vmax.xlane.f32.xlu1 %v5805_v48 }
 0x4d7   : > { %3648 = vmatmul.msk.f32.vlgmr.msrb.gmra.mxu0 %vm509_vm0, %v4122_v49  ;;  %v4124_v49 = vld [vmem:[%s4370_s30 + $0x10] sm:$0xff] }
 0x4da   : > { %v5821_v26 = vpop.f32.mrf.mxu1 }
 0x4dc   : > { %v5814_v51 = vpop.f32.mrf.mxu0 }
 0x4dd   : > { %3587 = vst [vmem:[%s4955_s12 + $0x108] sm:$0xff] %v5814_v51  ;;  %2185 = vmax.xlane.f32.xlu2 %v5814_v51 }
 0x4df   : > { %3649 = vmatmul.msk.f32.gmra.mxu0 %vm509_vm0, %v4123_v38  ;;  %v4125_v38 = vld [vmem:[%s4370_s30 + $0x18] sm:$0xff] }
 0x4e2   : > { %v5830_v22 = vpop.f32.mrf.mxu1 }
 0x4e4   : > { %v5823_v52 = vpop.f32.mrf.mxu0 }
 0x4e5   : > { %3588 = vst [vmem:[%s4955_s12 + $0x110] sm:$0xff] %v5823_v52  ;;  %2187 = vmax.xlane.f32.xlu0 %v5823_v52 }
 0x4e7   : > { %3650 = vmatmul.msk.f32.gmra.mxu0 %vm509_vm0, %v4124_v49  ;;  %v4126_v49 = vld [vmem:[%s4370_s30 + $0x20] sm:$0xff] }
 0x4ea   : > { %v5839_v14 = vpop.f32.mrf.mxu1 }
 0x4ec   : > { %v5832_v27 = vpop.f32.mrf.mxu0 }
 0x4ed   : > { %3589 = vst [vmem:[%s4955_s12 + $0x118] sm:$0xff] %v5832_v27  ;;  %2189 = vmax.xlane.f32.xlu1 %v5832_v27 }
 0x4ef   : > { %3651 = vmatmul.msk.f32.gmra.mxu0 %vm509_vm0, %v4125_v38  ;;  %v4127_v38 = vld [vmem:[%s4370_s30 + $0x28] sm:$0xff] }
 0x4f2   : > { %v5848_v21 = vpop.f32.mrf.mxu1 }
 0x4f4   : > { %v5841_v3 = vpop.f32.mrf.mxu0 }
 0x4f5   : > { %3590 = vst [vmem:[%s4955_s12 + $0x120] sm:$0xff] %v5841_v3  ;;  %2191 = vmax.xlane.f32.xlu2 %v5841_v3 }
 0x4f7   : > { %3652 = vmatmul.msk.f32.gmra.mxu0 %vm509_vm0, %v4126_v49  ;;  %v4128_v49 = vld [vmem:[%s4370_s30 + $0x30] sm:$0xff] }
 0x4fa   : > { %v5857_v32 = vpop.f32.mrf.mxu1 }
 0x4fc   : > { %v5850_v19 = vpop.f32.mrf.mxu0 }
 0x4fd   : > { %3591 = vst [vmem:[%s4955_s12 + $0x128] sm:$0xff] %v5850_v19  ;;  %2193 = vmax.xlane.f32.xlu0 %v5850_v19 }
 0x4ff   : > { %3653 = vmatmul.msk.f32.gmra.mxu0 %vm509_vm0, %v4127_v38  ;;  %v4129_v38 = vld [vmem:[%s4370_s30 + $0x38] sm:$0xff] }
 0x502   : > { %v5866_v17 = vpop.f32.mrf.mxu1 }
 0x504   : > { %v5859_v30 = vpop.f32.mrf.mxu0 }
 0x505   : > { %3592 = vst [vmem:[%s4955_s12 + $0x130] sm:$0xff] %v5859_v30  ;;  %2195 = vmax.xlane.f32.xlu1 %v5859_v30 }
 0x507   : > { %3654 = vmatmul.msk.f32.gmra.mxu0 %vm509_vm0, %v4128_v49  ;;  %v4130_v49 = vld [vmem:[%s4370_s30 + $0x40] sm:$0xff] }
 0x50a   : > { %v2376_v39 = vpop.f32.mrf.mxu1 }
 0x50c   : > { %v5868_v53 = vpop.f32.mrf.mxu0 }
 0x50d   : > { %3593 = vst [vmem:[%s4955_s12 + $0x138] sm:$0xff] %v5868_v53  ;;  %2197 = vmax.xlane.f32.xlu0 %v5868_v53 }
 0x50f   : > { %3655 = vmatmul.msk.f32.gmra.mxu0 %vm509_vm0, %v4129_v38 }
 0x512   : > { %v2379_v1 = vpop.f32.mrf.mxu1 }
 0x514   : > { %v5875_v62 = vpop.f32.mrf.mxu0 }
 0x515   : > { %3594 = vst [vmem:[%s4955_s12 + $0x140] sm:$0xff] %v5875_v62 }
 0x517   : > { %3656 = vmatmul.msk.f32.gmra.mxu0 %vm509_vm0, %v4130_v49 }
 0x51a   : > { %v2382_v38 = vpop.f32.mrf.mxu1 }
 0x51c   : > { %v5881_v36 = vpop.f32.mrf.mxu0 }
 0x51d   : > { %3595 = vst [vmem:[%s4955_s12 + $0x148] sm:$0xff] %v5881_v36 }
 0x51f   : > { %3657 = vmatmul.msk.f32.gmra.mxu0 %vm509_vm0, %v4131_v46  ;;  %v3625_v46 = vld [vmem:[%s6562_s3 + $0x78] sm:$0xff] }
 0x520   : > { %2500 = vmatpush.msrb.mxu2 %v3625_v46 }
 0x522   : > { %v2385_v2 = vpop.f32.mrf.mxu1 }
 0x524   : > { %v5887_v37 = vpop.f32.mrf.mxu0 }
 0x525   : > { %3596 = vst [vmem:[%s4955_s12 + $0x150] sm:$0xff] %v5887_v37 }
 0x527   : > { %3658 = vmatmul.msk.f32.gmra.mxu0 %vm509_vm0, %v4132_v56 }
 0x52a   : > { %v2388_v56 = vpop.f32.mrf.mxu1 }
 0x52c   : > { %v5893_v49 = vpop.f32.mrf.mxu0 }
 0x52d   : > { %3597 = vst [vmem:[%s4955_s12 + $0x158] sm:$0xff] %v5893_v49 }
 0x52f   : > { %3659 = vmatmul.msk.f32.gmra.mxu0 %vm509_vm0, %v4133_v4 }
 0x532   : > { %v2391_v6 = vpop.f32.mrf.mxu1 }
 0x534   : > { %v5902_v60 = vpop.f32.mrf.mxu0 }
 0x535   : > { %3598 = vst [vmem:[%s4955_s12 + $0x160] sm:$0xff] %v5902_v60 }
 0x537   : > { %3660 = vmatmul.msk.f32.gmra.mxu0 %vm509_vm0, %v4134_v28 }
 0x53a   : > { %v2394_v4 = vpop.f32.mrf.mxu1 }
 0x53b   : > { %2397 = vmatpush.msra.mxu3 %v2394_v4  ;;  %v4137_v4 = vld [vmem:[%s4370_s30 + $0x78] sm:$0xff]  ;;  %s3147_s30 = scalar_lea.sflag [#allocation3], %s6677_s22 }
 0x53c   : > { %v5908_v11 = vpop.f32.mrf.mxu0 }
 0x53d   : > { %3599 = vst [vmem:[%s4955_s12 + $0x168] sm:$0xff] %v5908_v11  ;;  %2398 = vmatpush.msra.mxu3 %v2391_v6 }
 0x53f   : > { %3661 = vmatmul.msk.f32.gmra.mxu0 %vm509_vm0, %v4135_v61  ;;  %2399 = vmatpush.msra.mxu3 %v2388_v56  ;;  %v3624_v61 = vld [vmem:[%s6562_s3 + $0x70] sm:$0xff] }
 0x540   : > { %2501 = vmatpush.msrb.mxu2 %v3624_v61 }
 0x541   : > { %2400 = vmatpush.msra.mxu3 %v2385_v2 }
 0x543   : > { %2401 = vmatpush.msra.mxu3 %v2382_v38 }
 0x544   : > { %v5914_v46 = vpop.f32.mrf.mxu0 }
 0x545   : > { %3600 = vst [vmem:[%s4955_s12 + $0x170] sm:$0xff] %v5914_v46  ;;  %2402 = vmatpush.msra.mxu3 %v2379_v1 }
 0x547   : > { %3662 = vmatmul.msk.f32.gmra.mxu0 %vm509_vm0, %v4136_v23  ;;  %2403 = vmatpush.msra.mxu3 %v2376_v39 }
 0x548   : > { %v2184_v28 = vpop.xlane.xlu1 %2183 }
 0x549   : > { %v2215_v12 = vsub.f32 %v5805_v48, %v2184_v28  ;;  %2404 = vmatpush.msra.mxu3 %v5866_v17 }
 0x54b   : > { %v2231_v44 = vmul.f32 1.442695, %v2215_v12  ;;  %2405 = vmatpush.msra.mxu3 %v5857_v32 }
 0x54c   : > { %v5921_v47 = vpop.f32.mrf.mxu0 }
 0x54d   : > { %3960 = vpow2.f32 %v2231_v44  ;;  %3601 = vst [vmem:[%s4955_s12 + $0x178] sm:$0xff] %v5921_v47  ;;  %2406 = vmatpush.msra.mxu3 %v5848_v21 }
 0x54f   : > { %3663 = vmatmul.msk.f32.gmra.mxu0 %vm509_vm0, %v4137_v4  ;;  %2407 = vmatpush.msra.mxu3 %v5839_v14 }
 0x550   : > { %v2186_v6 = vpop.xlane.xlu2 %2185 }
 0x551   : > { %v2216_v48 = vsub.f32 %v5814_v51, %v2186_v6  ;;  %2408 = vmatpush.msra.mxu3 %v5830_v22  ;;  %v3623_v22 = vld [vmem:[%s6562_s3 + $0x68] sm:$0xff] }
 0x552   : > { %2502 = vmatpush.msrb.mxu2 %v3623_v22 }
 0x553   : > { %v5931_v12 = vpop.eup %3960  ;;  %v2233_v2 = vmul.f32 1.442695, %v2216_v48  ;;  %2409 = vmatpush.msra.mxu3 %v5821_v26 }
 0x554   : > { %2263 = vadd.xlane.f32.xlu2 %v5931_v12  ;;  %v5934_v44 = vpop.f32.mrf.mxu0 }
 0x555   : > { %3962 = vpow2.f32 %v2233_v2  ;;  %2410 = vmatpush.msra.mxu3 %v5812_v34 }
 0x557   : > { %2411 = vmatpush.msra.mxu3 %v5803_v13 }
 0x558   : > { %v2188_v23 = vpop.xlane.xlu0 %2187 }
 0x559   : > { %v2217_v1 = vsub.f32 %v5823_v52, %v2188_v23  ;;  %2412 = vmatpush.msra.mxu3 %v5797_v25 }
 0x55b   : > { %v5941_v39 = vpop.eup %3962  ;;  %v2235_v51 = vmul.f32 1.442695, %v2217_v1 }
 0x55c   : > { %2265 = vadd.xlane.f32.xlu1 %v5941_v39  ;;  %2199 = vmax.xlane.f32.xlu2 %v5875_v62  ;;  %v5945_v38 = vpop.f32.mrf.mxu0 }
 0x55d   : > { %3964 = vpow2.f32 %v2235_v51 }
 0x560   : > { %v2190_v17 = vpop.xlane.xlu1 %2189 }
 0x561   : > { %v2218_v32 = vsub.f32 %v5832_v27, %v2190_v17  ;;  %v3622_v27 = vld [vmem:[%s6562_s3 + $0x60] sm:$0xff] }
 0x562   : > { %2503 = vmatpush.msrb.mxu2 %v3622_v27 }
 0x563   : > { %v5951_v21 = vpop.eup %3964  ;;  %v2237_v52 = vmul.f32 1.442695, %v2218_v32  ;;  %3627 = vmatmul.msk.f32.vlgmr.msrb.gmra.mxu2 %vm509_vm0, %v5482_v31 }
 0x564   : > { %2267 = vadd.xlane.f32.xlu0 %v5951_v21  ;;  %2201 = vmax.xlane.f32.xlu1 %v5881_v36  ;;  %v5956_v14 = vpop.f32.mrf.mxu0 }
 0x565   : > { %3966 = vpow2.f32 %v2237_v52 }
 0x568   : > { %v2192_v34 = vpop.xlane.xlu2 %2191 }
 0x569   : > { %v2219_v13 = vsub.f32 %v5841_v3, %v2192_v34 }
 0x56b   : > { %v5968_v26 = vpop.eup %3966  ;;  %v2239_v56 = vmul.f32 1.442695, %v2219_v13  ;;  %3628 = vmatmul.msk.f32.gmra.mxu2 %vm509_vm0, %v5494_v16 }
 0x56c   : > { %2269 = vadd.xlane.f32.xlu2 %v5968_v26  ;;  %2203 = vmax.xlane.f32.xlu0 %v5887_v37  ;;  %v5972_v25 = vpop.f32.mrf.mxu0 }
 0x56d   : > { %3968 = vpow2.f32 %v2239_v56 }
 0x570   : > { %v2194_v28 = vpop.xlane.xlu0 %2193 }
 0x571   : > { %v2220_v61 = vsub.f32 %v5850_v19, %v2194_v28 }
 0x573   : > { %v5977_v4 = vpop.eup %3968  ;;  %v2241_v31 = vmul.f32 1.442695, %v2220_v61  ;;  %3629 = vmatmul.msk.f32.gmra.mxu2 %vm509_vm0, %v5506_v55 }
 0x574   : > { %2271 = vadd.xlane.f32.xlu1 %v5977_v4  ;;  %2205 = vmax.xlane.f32.xlu2 %v5893_v49  ;;  %v5981_v3 = vpop.f32.mrf.mxu0 }
 0x575   : > { %3970 = vpow2.f32 %v2241_v31 }
 0x578   : > { %v2196_v6 = vpop.xlane.xlu1 %2195 }
 0x579   : > { %v2221_v48 = vsub.f32 %v5859_v30, %v2196_v6 }
 0x57b   : > { %v5986_v2 = vpop.eup %3970  ;;  %v2243_v16 = vmul.f32 1.442695, %v2221_v48  ;;  %3630 = vmatmul.msk.f32.gmra.mxu2 %vm509_vm0, %v5517_v5 }
 0x57c   : > { %2273 = vadd.xlane.f32.xlu0 %v5986_v2  ;;  %2207 = vmax.xlane.f32.xlu1 %v5902_v60  ;;  %v5990_v19 = vpop.f32.mrf.mxu0 }
 0x57d   : > { %3972 = vpow2.f32 %v2243_v16 }
 0x580   : > { %v2198_v23 = vpop.xlane.xlu0 %2197 }
 0x581   : > { %v2222_v1 = vsub.f32 %v5868_v53, %v2198_v23 }
 0x583   : > { %v5995_v51 = vpop.eup %3972  ;;  %v2245_v55 = vmul.f32 1.442695, %v2222_v1  ;;  %3631 = vmatmul.msk.f32.gmra.mxu2 %vm509_vm0, %v5526_v20 }
 0x584   : > { %2275 = vadd.xlane.f32.xlu2 %v5995_v51  ;;  %2209 = vmax.xlane.f32.xlu0 %v5908_v11  ;;  %v5999_v30 = vpop.f32.mrf.mxu0 }
 0x585   : > { %3974 = vpow2.f32 %v2245_v55 }
 0x58b   : > { %v6003_v17 = vpop.eup %3974  ;;  %3632 = vmatmul.msk.f32.gmra.mxu2 %vm509_vm0, %v5532_v10 }
 0x58c   : > { %2277 = vadd.xlane.f32.xlu1 %v6003_v17  ;;  %2211 = vmax.xlane.f32.xlu2 %v5914_v46  ;;  %v6007_v5 = vpop.f32.mrf.mxu0 }
 0x593   : > { %3633 = vmatmul.msk.f32.gmra.mxu2 %vm509_vm0, %v5537_v57 }
 0x594   : > { %2213 = vmax.xlane.f32.xlu1 %v5921_v47  ;;  %v6012_v53 = vpop.f32.mrf.mxu0 }
 0x59b   : > { %3634 = vmatmul.msk.f32.gmra.mxu2 %vm509_vm0, %v5542_v58  ;;  %v6031_v58 = vld [vmem:[%s6565_s6 + $0x3] ss:$0 sm:$0xff] }
 0x59c   : > { %v2607_v32 = vpop.f32.mrf.mxu0 }
 0x5a3   : > { %3635 = vmatmul.msk.f32.gmra.mxu2 %vm509_vm0, %v5547_v35 }
 0x5a4   : > { %v2610_v20 = vpop.f32.mrf.mxu0 }
 0x5ab   : > { %3636 = vmatmul.msk.f32.gmra.mxu2 %vm509_vm0, %v5552_v15 }
 0x5ac   : > { %v2613_v52 = vpop.f32.mrf.mxu0 }
 0x5ad   : > { %v2614_v1 = vadd.f32 %v6031_v58, %v2613_v52  ;;  %v2608_v52 = vadd.f32 %v6031_v58, %v2607_v32  ;;  %v2602_v32 = vadd.f32 %v6031_v58, %v6007_v5  ;;  %v2596_v5 = vadd.f32 %v6031_v58, %v5990_v19 }
 0x5ae   : > { %v2590_v19 = vadd.f32 %v6031_v58, %v5972_v25 }
 0x5b3   : > { %3637 = vmatmul.msk.f32.gmra.mxu2 %vm509_vm0, %v5557_v7 }
 0x5b4   : > { %v2616_v10 = vpop.f32.mrf.mxu0 }
 0x5bb   : > { %3638 = vmatmul.msk.f32.gmra.mxu2 %vm509_vm0, %v5562_v50 }
 0x5bc   : > { %v2619_v22 = vpop.f32.mrf.mxu0 }
 0x5bd   : > { %v2620_v61 = vadd.f32 %v6031_v58, %v2619_v22 }
 0x5c3   : > { %3639 = vmatmul.msk.f32.gmra.mxu2 %vm509_vm0, %v5567_v59 }
 0x5c4   : > { %v2622_v57 = vpop.f32.mrf.mxu0 }
 0x5c5   : > { %v2623_v59 = vadd.f32 %v6031_v58, %v2622_v57 }
 0x5c7   : > { %v2264_v27 = vpop.xlane.xlu2 %2263 }
 0x5c8   : > { %3976 = vrcp.f32 %v2264_v27 }
 0x5cb   : > { %3640 = vmatmul.msk.f32.gmra.mxu2 %vm509_vm0, %v5573_v8  ;;  %v2617_v8 = vadd.f32 %v6031_v58, %v2616_v10  ;;  %v2611_v10 = vadd.f32 %v6031_v58, %v2610_v20  ;;  %v2605_v20 = vadd.f32 %v6031_v58, %v6012_v53 }
 0x5cc   : > { %v2625_v35 = vpop.f32.mrf.mxu0 }
 0x5cd   : > { %v2626_v15 = vadd.f32 %v6031_v58, %v2625_v35 }
 0x5ce   : > { %v3977_v34 = vpop.eup %3976 }
 0x5cf   : > { %v2311_v7 = vmul.f32 %v3977_v34, %v5931_v12  ;;  %v2266_v13 = vpop.xlane.xlu1 %2265  ;;  %v2200_v56 = vpop.xlane.xlu2 %2199  ;;  %3664 = vmatpush.xpose.msk.msrb.mxu1 %vm744_vm1, %v2626_v15 }
 0x5d0   : > { %3978 = vrcp.f32 %v2266_v13  ;;  %v2223_v50 = vsub.f32 %v5875_v62, %v2200_v56 }
 0x5d1   : > { %2413 = vmatmul.f32.vlgmr.msra.gmra.mxu3 %v2311_v7 }
 0x5d2   : > { %v2247_v28 = vmul.f32 1.442695, %v2223_v50  ;;  %v2599_v50 = vadd.f32 %v6031_v58, %v5999_v30 }
 0x5d3   : > { %3665 = vmatpush.xpose.msk.msrb.mxu1 %vm744_vm1, %v2623_v59  ;;  %3641 = vmatmul.msk.f32.gmra.mxu2 %vm509_vm0, %v5580_v18 }
 0x5d4   : > { %3980 = vpow2.f32 %v2247_v28 }
 0x5d6   : > { %v3979_v12 = vpop.eup %3978 }
 0x5d7   : > { %v2268_v31 = vpop.xlane.xlu0 %2267  ;;  %v2202_v6 = vpop.xlane.xlu1 %2201  ;;  %3666 = vmatpush.xpose.msk.msrb.mxu1 %vm744_vm1, %v2620_v61  ;;  %v2312_v48 = vmul.f32 %v3979_v12, %v5941_v39 }
 0x5d8   : > { %3982 = vrcp.f32 %v2268_v31  ;;  %v2224_v62 = vsub.f32 %v5881_v36, %v2202_v6  ;;  %v2593_v31 = vadd.f32 %v6031_v58, %v5981_v3 }
 0x5d9   : > { %2416 = vmatmul.f32.gmra.mxu3 %v2312_v48 }
 0x5da   : > { %v6048_v16 = vpop.eup %3980  ;;  %v2249_v23 = vmul.f32 1.442695, %v2224_v62 }
 0x5db   : > { %2279 = vadd.xlane.f32.xlu0 %v6048_v16  ;;  %3667 = vmatpush.xpose.msk.msrb.mxu1 %vm744_vm1, %v2617_v8 }
 0x5dc   : > { %3984 = vpow2.f32 %v2249_v23  ;;  %3642 = vmatmul.msk.f32.gmra.mxu2 %vm509_vm0, %v5586_v40 }
 0x5de   : > { %v3983_v39 = vpop.eup %3982 }
 0x5df   : > { %v2270_v55 = vpop.xlane.xlu2 %2269  ;;  %v2204_v22 = vpop.xlane.xlu0 %2203  ;;  %3668 = vmatpush.xpose.msk.msrb.mxu1 %vm744_vm1, %v2614_v1  ;;  %v2313_v18 = vmul.f32 %v3983_v39, %v5951_v21  ;;  %v2587_v1 = vadd.f32 %v6031_v58, %v5956_v14 }
 0x5e0   : > { %3986 = vrcp.f32 %v2270_v55  ;;  %v2225_v36 = vsub.f32 %v5887_v37, %v2204_v22  ;;  %v2584_v22 = vadd.f32 %v6031_v58, %v5945_v38 }
 0x5e1   : > { %2419 = vmatmul.f32.gmra.mxu3 %v2313_v18 }
 0x5e2   : > { %v6059_v57 = vpop.eup %3984  ;;  %v2251_v27 = vmul.f32 1.442695, %v2225_v36 }
 0x5e3   : > { %2281 = vadd.xlane.f32.xlu2 %v6059_v57  ;;  %3669 = vmatpush.xpose.msk.msrb.mxu1 %vm744_vm1, %v2611_v10  ;;  %v2581_v10 = vadd.f32 %v6031_v58, %v5934_v44 }
 0x5e4   : > { %3988 = vpow2.f32 %v2251_v27 }
 0x5e6   : > { %v3987_v21 = vpop.eup %3986  ;;  %v2505_v6 = vpop.f32.mrf.mxu2 }
 0x5e7   : > { %v2272_v35 = vpop.xlane.xlu1 %2271  ;;  %v2206_v15 = vpop.xlane.xlu2 %2205  ;;  %3670 = vmatpush.xpose.msk.msrb.mxu1 %vm744_vm1, %v2608_v52  ;;  %v2314_v40 = vmul.f32 %v3987_v21, %v5968_v26 }
 0x5e8   : > { %3990 = vrcp.f32 %v2272_v35  ;;  %v2226_v37 = vsub.f32 %v5893_v49, %v2206_v15 }
 0x5e9   : > { %2422 = vmatmul.f32.gmra.mxu3 %v2314_v40 }
 0x5ea   : > { %v6069_v34 = vpop.eup %3988  ;;  %v2253_v7 = vmul.f32 1.442695, %v2226_v37 }
 0x5eb   : > { %2283 = vadd.xlane.f32.xlu0 %v6069_v34  ;;  %3671 = vmatpush.xpose.msk.msrb.mxu1 %vm744_vm1, %v2605_v20 }
 0x5ec   : > { %3992 = vpow2.f32 %v2253_v7 }
 0x5ee   : > { %v3991_v13 = vpop.eup %3990  ;;  %v2508_v25 = vpop.f32.mrf.mxu2 }
 0x5ef   : > { %v2274_v26 = vpop.xlane.xlu0 %2273  ;;  %v2208_v56 = vpop.xlane.xlu1 %2207  ;;  %3672 = vmatpush.xpose.msk.msrb.mxu1 %vm744_vm1, %v2602_v32  ;;  %v2315_v49 = vmul.f32 %v3991_v13, %v5977_v4 }
 0x5f0   : > { %3994 = vrcp.f32 %v2274_v26  ;;  %v2227_v53 = vsub.f32 %v5902_v60, %v2208_v56 }
 0x5f1   : > { %2425 = vmatmul.f32.gmra.mxu3 %v2315_v49 }
 0x5f2   : > { %v6080_v59 = vpop.eup %3992  ;;  %v2255_v28 = vmul.f32 1.442695, %v2227_v53 }
 0x5f3   : > { %2285 = vadd.xlane.f32.xlu1 %v6080_v59  ;;  %3673 = vmatpush.xpose.msk.msrb.mxu1 %vm744_vm1, %v2599_v50 }
 0x5f4   : > { %3996 = vpow2.f32 %v2255_v28  ;;  %v3715_v28 = vld [vmem:[%s6566_s7 + $0x78] sm:$0xff] }
 0x5f5   : > { %2967 = vmatpush.msrb.mxu3 %v3715_v28 }
 0x5f6   : > { %v3995_v61 = vpop.eup %3994  ;;  %v2511_v21 = vpop.f32.mrf.mxu2 }
 0x5f7   : > { %v2276_v4 = vpop.xlane.xlu2 %2275  ;;  %v2210_v12 = vpop.xlane.xlu0 %2209  ;;  %3674 = vmatpush.xpose.msk.msrb.mxu1 %vm744_vm1, %v2596_v5  ;;  %v2316_v60 = vmul.f32 %v3995_v61, %v5986_v2 }
 0x5f8   : > { %3998 = vrcp.f32 %v2276_v4  ;;  %v2228_v30 = vsub.f32 %v5908_v11, %v2210_v12 }
 0x5f9   : > { %2428 = vmatmul.f32.gmra.mxu3 %v2316_v60 }
 0x5fa   : > { %v6091_v48 = vpop.eup %3996  ;;  %v2257_v62 = vmul.f32 1.442695, %v2228_v30 }
 0x5fb   : > { %2287 = vadd.xlane.f32.xlu2 %v6091_v48  ;;  %3675 = vmatpush.xpose.msk.msrb.mxu1 %vm744_vm1, %v2593_v31 }
 0x5fc   : > { %4000 = vpow2.f32 %v2257_v62 }
 0x5fe   : > { %v3999_v2 = vpop.eup %3998  ;;  %v2514_v44 = vpop.f32.mrf.mxu2 }
 0x5ff   : > { %v2278_v8 = vpop.xlane.xlu1 %2277  ;;  %v2212_v23 = vpop.xlane.xlu2 %2211  ;;  %3676 = vmatpush.xpose.msk.msrb.mxu1 %vm744_vm1, %v2590_v19  ;;  %v2317_v11 = vmul.f32 %v3999_v2, %v5995_v51 }
 0x600   : > { %4002 = vrcp.f32 %v2278_v8  ;;  %v2229_v3 = vsub.f32 %v5914_v46, %v2212_v23  ;;  %v6111_v46 = vld [vmem:[%s6563_s4 + $0x3] ss:$0 sm:$0xff] }
 0x601   : > { %2431 = vmatmul.f32.gmra.mxu3 %v2317_v11  ;;  %v2506_v52 = vadd.f32 %v6111_v46, %v2505_v6  ;;  %v2512_v58 = vadd.f32 %v6111_v46, %v2511_v21  ;;  %v2515_v15 = vadd.f32 %v6111_v46, %v2514_v44 }
 0x602   : > { %v6102_v39 = vpop.eup %4000  ;;  %v2259_v55 = vmul.f32 1.442695, %v2229_v3 }
 0x603   : > { %2289 = vadd.xlane.f32.xlu0 %v6102_v39  ;;  %3677 = vmatpush.xpose.msk.msrb.mxu1 %vm744_vm1, %v2587_v1 }
 0x604   : > { %4004 = vpow2.f32 %v2259_v55 }
 0x606   : > { %v4003_v51 = vpop.eup %4002  ;;  %v2517_v35 = vpop.f32.mrf.mxu2 }
 0x607   : > { %v2214_v14 = vpop.xlane.xlu1 %2213  ;;  %3678 = vmatpush.xpose.msk.msrb.mxu1 %vm744_vm1, %v2584_v22  ;;  %v2318_v18 = vmul.f32 %v4003_v51, %v6003_v17  ;;  %v2518_v40 = vadd.f32 %v6111_v46, %v2517_v35 }
 0x608   : > { %v2230_v36 = vsub.f32 %v5921_v47, %v2214_v14  ;;  %v2509_v47 = vadd.f32 %v6111_v46, %v2508_v25 }
 0x609   : > { %2434 = vmatmul.f32.gmra.mxu3 %v2318_v18 }
 0x60a   : > { %v6118_v27 = vpop.eup %4004  ;;  %v2261_v38 = vmul.f32 1.442695, %v2230_v36 }
 0x60b   : > { %2291 = vadd.xlane.f32.xlu1 %v6118_v27  ;;  %3679 = vmatpush.xpose.msk.msrb.mxu1 %vm744_vm1, %v2581_v10 }
 0x60c   : > { %4006 = vpow2.f32 %v2261_v38 }
 0x60e   : > { %3680 = vmatmul.msk.f32.vlgmr.msrb.gmra.mxu1 %vm744_vm1, %v2506_v52  ;;  %v2520_v37 = vpop.f32.mrf.mxu2 }
 0x60f   : > { %v2521_v20 = vadd.f32 %v6111_v46, %v2520_v37 }
 0x612   : > { %v6124_v17 = vpop.eup %4006 }
 0x613   : > { %2293 = vadd.xlane.f32.xlu2 %v6124_v17 }
 0x616   : > { %3681 = vmatmul.msk.f32.gmra.mxu1 %vm744_vm1, %v2509_v47  ;;  %v2523_v7 = vpop.f32.mrf.mxu2 }
 0x617   : > { %v2524_v32 = vadd.f32 %v6111_v46, %v2523_v7 }
 0x61e   : > { %3682 = vmatmul.msk.f32.gmra.mxu1 %vm744_vm1, %v2512_v58  ;;  %v2526_v13 = vpop.f32.mrf.mxu2 }
 0x61f   : > { %v2527_v26 = vadd.f32 %v6111_v46, %v2526_v13 }
 0x626   : > { %3683 = vmatmul.msk.f32.gmra.mxu1 %vm744_vm1, %v2515_v15  ;;  %v2529_v62 = vpop.f32.mrf.mxu2 }
 0x627   : > { %v2530_v19 = vadd.f32 %v6111_v46, %v2529_v62 }
 0x62e   : > { %3684 = vmatmul.msk.f32.gmra.mxu1 %vm744_vm1, %v2518_v40  ;;  %v2532_v11 = vpop.f32.mrf.mxu2 }
 0x62f   : > { %v2533_v3 = vadd.f32 %v6111_v46, %v2532_v11 }
 0x636   : > { %3685 = vmatmul.msk.f32.gmra.mxu1 %vm744_vm1, %v2521_v20  ;;  %v2535_v22 = vpop.f32.mrf.mxu2 }
 0x637   : > { %v2536_v51 = vadd.f32 %v6111_v46, %v2535_v22 }
 0x63e   : > { %3686 = vmatmul.msk.f32.gmra.mxu1 %vm744_vm1, %v2524_v32  ;;  %v2538_v36 = vpop.f32.mrf.mxu2 }
 0x63f   : > { %v2539_v10 = vadd.f32 %v6111_v46, %v2538_v36 }
 0x646   : > { %3687 = vmatmul.msk.f32.gmra.mxu1 %vm744_vm1, %v2527_v26  ;;  %v2541_v21 = vpop.f32.mrf.mxu2 }
 0x647   : > { %v2542_v47 = vadd.f32 %v6111_v46, %v2541_v21 }
 0x64e   : > { %v2280_v56 = vpop.xlane.xlu0 %2279  ;;  %3688 = vmatmul.msk.f32.gmra.mxu1 %vm744_vm1, %v2530_v19  ;;  %v2544_v35 = vpop.f32.mrf.mxu2 }
 0x64f   : > { %4008 = vrcp.f32 %v2280_v56 }
 0x654   : > { %v6173_v52 = vpop.f32.mrf.mxu3 }
 0x655   : > { %v4009_v49 = vpop.eup %4008 }
 0x656   : > { %v2282_v53 = vpop.xlane.xlu2 %2281  ;;  %v2319_v50 = vmul.f32 %v4009_v49, %v6048_v16  ;;  %3689 = vmatmul.msk.f32.gmra.mxu1 %vm744_vm1, %v2533_v3  ;;  %v2547_v40 = vpop.f32.mrf.mxu2 }
 0x657   : > { %4010 = vrcp.f32 %v2282_v53 }
 0x658   : > { %2437 = vmatmul.f32.gmra.mxu3 %v2319_v50  ;;  %v6664_v50 = vld [vmem:[#allocation28_spill] sm:$0xff] }
 0x65c   : > { %v6183_v58 = vpop.f32.mrf.mxu3 }
 0x65d   : > { %v4011_v5 = vpop.eup %4010 }
 0x65e   : > { %v2284_v61 = vpop.xlane.xlu0 %2283  ;;  %v2320_v4 = vmul.f32 %v4011_v5, %v6059_v57  ;;  %v3714_v57 = vld [vmem:[%s6566_s7 + $0x70] sm:$0xff]  ;;  %3690 = vmatmul.msk.f32.gmra.mxu1 %vm744_vm1, %v2536_v51 }
 0x65f   : > { %4012 = vrcp.f32 %v2284_v61  ;;  %2968 = vmatpush.msrb.mxu3 %v3714_v57  ;;  %v2550_v7 = vpop.f32.mrf.mxu2 }
 0x660   : > { %2440 = vmatmul.f32.gmra.mxu3 %v2320_v4  ;;  %v6666_v4 = vld [vmem:[#allocation34_spill] sm:$0xff] }
 0x664   : > { %v6196_v37 = vpop.f32.mrf.mxu3 }
 0x665   : > { %v4013_v12 = vpop.eup %4012 }
 0x666   : > { %v2286_v60 = vpop.xlane.xlu1 %2285  ;;  %v2321_v30 = vmul.f32 %v4013_v12, %v6069_v34  ;;  %v3713_v34 = vld [vmem:[%s6566_s7 + $0x68] sm:$0xff]  ;;  %3691 = vmatmul.msk.f32.gmra.mxu1 %vm744_vm1, %v2539_v10 }
 0x667   : > { %4014 = vrcp.f32 %v2286_v60  ;;  %2969 = vmatpush.msrb.mxu3 %v3713_v34 }
 0x668   : > { %2443 = vmatmul.f32.gmra.mxu3 %v2321_v30 }
 0x66c   : > { %v6208_v32 = vpop.f32.mrf.mxu3 }
 0x66d   : > { %v4015_v16 = vpop.eup %4014 }
 0x66e   : > { %v2288_v31 = vpop.xlane.xlu2 %2287  ;;  %v2322_v6 = vmul.f32 %v4015_v16, %v6080_v59  ;;  %v3712_v59 = vld [vmem:[%s6566_s7 + $0x60] sm:$0xff]  ;;  %3692 = vmatmul.msk.f32.gmra.mxu1 %vm744_vm1, %v2542_v47 }
 0x66f   : > { %4016 = vrcp.f32 %v2288_v31  ;;  %2970 = vmatpush.msrb.mxu3 %v3712_v59 }
 0x670   : > { %2446 = vmatmul.f32.gmra.mxu3 %v2322_v6  ;;  %v6667_v6 = vld [vmem:[#allocation37_spill] sm:$0xff] }
 0x675   : > { %v4017_v2 = vpop.eup %4016 }
 0x676   : > { %v2290_v8 = vpop.xlane.xlu0 %2289  ;;  %v2323_v23 = vmul.f32 %v4017_v2, %v6091_v48 }
 0x677   : > { %4018 = vrcp.f32 %v2290_v8  ;;  %v6668_v8 = vld [vmem:[#allocation40_spill] sm:$0xff] }
 0x678   : > { %2449 = vmatmul.f32.gmra.mxu3 %v2323_v23 }
 0x67d   : > { %v4019_v1 = vpop.eup %4018 }
 0x67e   : > { %v2292_v55 = vpop.xlane.xlu1 %2291  ;;  %v2324_v25 = vmul.f32 %v4019_v1, %v6102_v39 }
 0x67f   : > { %4020 = vrcp.f32 %v2292_v55 }
 0x680   : > { %2452 = vmatmul.f32.gmra.mxu3 %v2324_v25 }
 0x685   : > { %v4021_v48 = vpop.eup %4020 }
 0x686   : > { %v2294_v14 = vpop.xlane.xlu2 %2293  ;;  %v2325_v18 = vmul.f32 %v4021_v48, %v6118_v27 }
 0x687   : > { %4022 = vrcp.f32 %v2294_v14 }
 0x688   : > { %2455 = vmatmul.f32.gmra.mxu3 %v2325_v18 }
 0x68b   : > { %v6167_v38 = vpop.f32.mrf.mxu1 }
 0x68c   : > { %3696 = vst [vmem:[%s4955_s12 + $0x180] sm:$0xff] %v6167_v38  ;;  %2806 = vmax.xlane.f32.xlu0 %v6167_v38 }
 0x68d   : > { %v4023_v39 = vpop.eup %4022 }
 0x68e   : > { %v2326_v27 = vmul.f32 %v4023_v39, %v6124_v17  ;;  %v2545_v17 = vadd.f32 %v6111_v46, %v2544_v35 }
 0x690   : > { %2458 = vmatmul.f32.gmra.mxu3 %v2326_v27  ;;  %3693 = vmatmul.msk.f32.gmra.mxu1 %vm744_vm1, %v2545_v17 }
 0x693   : > { %v6177_v44 = vpop.f32.mrf.mxu1 }
 0x694   : > { %3697 = vst [vmem:[%s4955_s12 + $0x188] sm:$0xff] %v6177_v44  ;;  %2808 = vmax.xlane.f32.xlu1 %v6177_v44 }
 0x698   : > { %3716 = vmatmul.msk.f32.vlgmr.msrb.gmra.mxu3 %vm509_vm0, %v5619_v43  ;;  %v2548_v43 = vadd.f32 %v6111_v46, %v2547_v40 }
 0x69a   : > { %3694 = vmatmul.msk.f32.gmra.mxu1 %vm744_vm1, %v2548_v43 }
 0x69b   : > { %v6188_v15 = vpop.f32.mrf.mxu1 }
 0x69c   : > { %3698 = vst [vmem:[%s4955_s12 + $0x190] sm:$0xff] %v6188_v15  ;;  %2810 = vmax.xlane.f32.xlu2 %v6188_v15 }
 0x6a0   : > { %3717 = vmatmul.msk.f32.gmra.mxu3 %vm509_vm0, %v5634_v9  ;;  %v2551_v9 = vadd.f32 %v6111_v46, %v2550_v7 }
 0x6a2   : > { %3695 = vmatmul.msk.f32.gmra.mxu1 %vm744_vm1, %v2551_v9 }
 0x6a3   : > { %v6199_v20 = vpop.f32.mrf.mxu1 }
 0x6a4   : > { %3699 = vst [vmem:[%s4955_s12 + $0x198] sm:$0xff] %v6199_v20  ;;  %2812 = vmax.xlane.f32.xlu0 %v6199_v20 }
 0x6a8   : > { %3718 = vmatmul.msk.f32.gmra.mxu3 %vm509_vm0, %v5641_v45  ;;  %v6223_v45 = vpop.f32.mrf.mxu3 }
 0x6ab   : > { %v6210_v13 = vpop.f32.mrf.mxu1 }
 0x6ac   : > { %3700 = vst [vmem:[%s4955_s12 + $0x1a0] sm:$0xff] %v6210_v13  ;;  %2814 = vmax.xlane.f32.xlu1 %v6210_v13 }
 0x6b0   : > { %3719 = vmatmul.msk.f32.gmra.mxu3 %vm509_vm0, %v5652_v41  ;;  %v6232_v56 = vpop.f32.mrf.mxu3 }
 0x6b3   : > { %v6218_v26 = vpop.f32.mrf.mxu1 }
 0x6b4   : > { %3701 = vst [vmem:[%s4955_s12 + $0x1a8] sm:$0xff] %v6218_v26  ;;  %2816 = vmax.xlane.f32.xlu2 %v6218_v26 }
 0x6b8   : > { %3720 = vmatmul.msk.f32.gmra.mxu3 %vm509_vm0, %v5663_v0  ;;  %v6243_v0 = vpop.f32.mrf.mxu3 }
 0x6bb   : > { %v6227_v46 = vpop.f32.mrf.mxu1 }
 0x6bc   : > { %3702 = vst [vmem:[%s4955_s12 + $0x1b0] sm:$0xff] %v6227_v46  ;;  %2818 = vmax.xlane.f32.xlu0 %v6227_v46 }
 0x6c0   : > { %3721 = vmatmul.msk.f32.gmra.mxu3 %vm509_vm0, %v5674_v63  ;;  %v6247_v49 = vpop.f32.mrf.mxu3 }
 0x6c3   : > { %v6236_v41 = vpop.f32.mrf.mxu1 }
 0x6c4   : > { %3703 = vst [vmem:[%s4955_s12 + $0x1b8] sm:$0xff] %v6236_v41  ;;  %2820 = vmax.xlane.f32.xlu2 %v6236_v41 }
 0x6c8   : > { %3722 = vmatmul.msk.f32.gmra.mxu3 %vm509_vm0, %v5688_v33 }
 0x6d0   : > { %3723 = vmatmul.msk.f32.gmra.mxu3 %vm509_vm0, %v5697_v42  ;;  %v6263_v42 = vpop.f32.mrf.mxu1 }
 0x6d1   : > { %3704 = vst [vmem:[%s4955_s12 + $0x1c0] sm:$0xff] %v6263_v42 }
 0x6d8   : > { %3724 = vmatmul.msk.f32.gmra.mxu3 %vm509_vm0, %v5708_v24  ;;  %v6665_v24 = vld [vmem:[#allocation31_spill] sm:$0xff] }
 0x6db   : > { %v6251_v63 = vpop.f32.mrf.mxu3 }
 0x6e0   : > { %3725 = vmatmul.msk.f32.gmra.mxu3 %vm509_vm0, %v5719_v54  ;;  %v6271_v54 = vpop.f32.mrf.mxu1 }
 0x6e1   : > { %3705 = vst [vmem:[%s4955_s12 + $0x1c8] sm:$0xff] %v6271_v54 }
 0x6e3   : > { %v6255_v53 = vpop.f32.mrf.mxu3 }
 0x6e8   : > { %3726 = vmatmul.msk.f32.gmra.mxu3 %vm509_vm0, %v5731_v29  ;;  %v6280_v60 = vpop.f32.mrf.mxu1 }
 0x6e9   : > { %3706 = vst [vmem:[%s4955_s12 + $0x1d0] sm:$0xff] %v6280_v60 }
 0x6eb   : > { %v6259_v33 = vpop.f32.mrf.mxu3 }
 0x6f0   : > { %3727 = vmatmul.msk.f32.gmra.mxu3 %vm509_vm0, %v6664_v50  ;;  %v6291_v57 = vpop.f32.mrf.mxu1 }
 0x6f1   : > { %3707 = vst [vmem:[%s4955_s12 + $0x1d8] sm:$0xff] %v6291_v57 }
 0x6f3   : > { %v6265_v28 = vpop.f32.mrf.mxu3 }
 0x6f8   : > { %3728 = vmatmul.msk.f32.gmra.mxu3 %vm509_vm0, %v6665_v24  ;;  %v6303_v3 = vpop.f32.mrf.mxu1 }
 0x6f9   : > { %3708 = vst [vmem:[%s4955_s12 + $0x1e0] sm:$0xff] %v6303_v3 }
 0x6fb   : > { %v6273_v5 = vpop.f32.mrf.mxu3 }
 0x6ff   : > { %v2807_v29 = vpop.xlane.xlu0 %2806 }
 0x700   : > { %v2838_v61 = vsub.f32 %v6167_v38, %v2807_v29  ;;  %3729 = vmatmul.msk.f32.gmra.mxu3 %vm509_vm0, %v6666_v4 }
 0x702   : > { %v2854_v12 = vmul.f32 1.442695, %v2838_v61 }
 0x703   : > { %v6282_v30 = vpop.f32.mrf.mxu3 }
 0x704   : > { %4024 = vpow2.f32 %v2854_v12 }
 0x707   : > { %v2809_v16 = vpop.xlane.xlu1 %2808 }
 0x708   : > { %v2839_v31 = vsub.f32 %v6177_v44, %v2809_v16  ;;  %3730 = vmatmul.msk.f32.gmra.mxu3 %vm509_vm0, %v6667_v6 }
 0x70a   : > { %v6289_v62 = vpop.eup %4024  ;;  %v2856_v19 = vmul.f32 1.442695, %v2839_v31 }
 0x70b   : > { %v6293_v34 = vpop.f32.mrf.mxu3  ;;  %2886 = vadd.xlane.f32.xlu1 %v6289_v62 }
 0x70c   : > { %4026 = vpow2.f32 %v2856_v19 }
 0x70d   : > { %v6314_v48 = vpop.f32.mrf.mxu1 }
 0x70e   : > { %3709 = vst [vmem:[%s4955_s12 + $0x1e8] sm:$0xff] %v6314_v48 }
 0x70f   : > { %v2811_v59 = vpop.xlane.xlu2 %2810 }
 0x710   : > { %v2840_v2 = vsub.f32 %v6188_v15, %v2811_v59  ;;  %3731 = vmatmul.msk.f32.gmra.mxu3 %vm509_vm0, %v6668_v8 }
 0x712   : > { %v6301_v23 = vpop.eup %4026  ;;  %v2858_v11 = vmul.f32 1.442695, %v2840_v2 }
 0x713   : > { %v6305_v1 = vpop.f32.mrf.mxu3  ;;  %2888 = vadd.xlane.f32.xlu0 %v6301_v23  ;;  %2822 = vmax.xlane.f32.xlu1 %v6263_v42 }
 0x714   : > { %4028 = vpow2.f32 %v2858_v11 }
 0x717   : > { %v2813_v55 = vpop.xlane.xlu0 %2812  ;;  %v6325_v39 = vpop.f32.mrf.mxu1 }
 0x718   : > { %v2841_v25 = vsub.f32 %v6199_v20, %v2813_v55  ;;  %3710 = vst [vmem:[%s4955_s12 + $0x1f0] sm:$0xff] %v6325_v39 }
 0x71a   : > { %v6312_v22 = vpop.eup %4028  ;;  %v2860_v51 = vmul.f32 1.442695, %v2841_v25 }
 0x71b   : > { %v6316_v14 = vpop.f32.mrf.mxu3  ;;  %2890 = vadd.xlane.f32.xlu2 %v6312_v22  ;;  %2824 = vmax.xlane.f32.xlu0 %v6271_v54 }
 0x71c   : > { %4030 = vpow2.f32 %v2860_v51 }
 0x71f   : > { %v2815_v18 = vpop.xlane.xlu1 %2814  ;;  %v6336_v17 = vpop.f32.mrf.mxu1 }
 0x720   : > { %v2842_v36 = vsub.f32 %v6210_v13, %v2815_v18  ;;  %3711 = vst [vmem:[%s4955_s12 + $0x1f8] sm:$0xff] %v6336_v17  ;;  %s4158_s12 = scalar_lea.hbm %s6569_s10, 1024 }
 0x721   : > { %p4160_p2 = scmp.lt.s32.totalorder %s4158_s12, %s4154_s1 }
 0x722   : > { %v6323_v10 = vpop.eup %4030  ;;  %v2862_v38 = vmul.f32 1.442695, %v2842_v36 }
 0x723   : > { %v6327_v27 = vpop.f32.mrf.mxu3  ;;  %2892 = vadd.xlane.f32.xlu1 %v6323_v10  ;;  %2826 = vmax.xlane.f32.xlu2 %v6280_v60  ;;  %p4161_p3 = por %p4160_p2, %p4159_p1 }
 0x724   : > { %4032 = vpow2.f32 %v2862_v38 }
 0x725   : > { %p4162_p5 = pnand %p4161_p3, %p4157_p0 }
 0x727   : > { %v2817_v21 = vpop.xlane.xlu2 %2816 }
 0x728   : > { %v2843_v47 = vsub.f32 %v6218_v26, %v2817_v21 }
 0x72a   : > { %v6334_v44 = vpop.eup %4032  ;;  %v2864_v35 = vmul.f32 1.442695, %v2843_v47 }
 0x72b   : > { %v6338_v15 = vpop.f32.mrf.mxu3  ;;  %2894 = vadd.xlane.f32.xlu0 %v6334_v44  ;;  %2828 = vmax.xlane.f32.xlu1 %v6291_v57 }
 0x72c   : > { %4034 = vpow2.f32 %v2864_v35 }
 0x72f   : > { %v2819_v40 = vpop.xlane.xlu0 %2818 }
 0x730   : > { %v2844_v43 = vsub.f32 %v6227_v46, %v2819_v40 }
 0x732   : > { %v6345_v20 = vpop.eup %4034  ;;  %v2866_v7 = vmul.f32 1.442695, %v2844_v43 }
 0x733   : > { %v6347_v9 = vpop.f32.mrf.mxu3  ;;  %2896 = vadd.xlane.f32.xlu2 %v6345_v20  ;;  %2830 = vmax.xlane.f32.xlu0 %v6303_v3 }
 0x734   : > { %4036 = vpow2.f32 %v2866_v7 }
 0x737   : > { %v2821_v13 = vpop.xlane.xlu2 %2820 }
 0x738   : > { %v2845_v26 = vsub.f32 %v6236_v41, %v2821_v13 }
 0x73a   : > { %v6352_v50 = vpop.eup %4036  ;;  %v2868_v24 = vmul.f32 1.442695, %v2845_v26 }
 0x73b   : > { %v2984_v29 = vpop.f32.mrf.mxu3  ;;  %2898 = vadd.xlane.f32.xlu1 %v6352_v50  ;;  %2832 = vmax.xlane.f32.xlu2 %v6314_v48 }
 0x73c   : > { %4038 = vpow2.f32 %v2868_v24 }
 0x742   : > { %v6356_v46 = vpop.eup %4038 }
 0x743   : > { %v2987_v61 = vpop.f32.mrf.mxu3  ;;  %2900 = vadd.xlane.f32.xlu0 %v6356_v46  ;;  %2834 = vmax.xlane.f32.xlu1 %v6325_v39 }
 0x74b   : > { %v2990_v4 = vpop.f32.mrf.mxu3  ;;  %2836 = vmax.xlane.f32.xlu0 %v6336_v17 }
 0x753   : > { %v2993_v41 = vpop.f32.mrf.mxu3 }
 0x75b   : > { %v2996_v12 = vpop.f32.mrf.mxu3 }
 0x763   : > { %v2999_v16 = vpop.f32.mrf.mxu3 }
 0x76b   : > { %v3002_v31 = vpop.f32.mrf.mxu3 }
 0x773   : > { %v3005_v6 = vpop.f32.mrf.mxu3 }
 0x77b   : > { %v3008_v19 = vpop.f32.mrf.mxu3 }
 0x77e   : > { %v2887_v59 = vpop.xlane.xlu1 %2886 }
 0x783   : > { %v3011_v2 = vpop.f32.mrf.mxu3 }
 0x786   : > { %v2889_v8 = vpop.xlane.xlu0 %2888  ;;  %v2823_v11 = vpop.xlane.xlu1 %2822 }
 0x787   : > { %v2846_v55 = vsub.f32 %v6263_v42, %v2823_v11 }
 0x789   : > { %v2870_v25 = vmul.f32 1.442695, %v2846_v55 }
 0x78b   : > { %4040 = vpow2.f32 %v2870_v25  ;;  %v3014_v51 = vpop.f32.mrf.mxu3 }
 0x78e   : > { %v2891_v18 = vpop.xlane.xlu2 %2890  ;;  %v2825_v36 = vpop.xlane.xlu0 %2824 }
 0x78f   : > { %v2847_v38 = vsub.f32 %v6271_v54, %v2825_v36 }
 0x791   : > { %v6363_v21 = vpop.eup %4040  ;;  %v2872_v47 = vmul.f32 1.442695, %v2847_v38 }
 0x792   : > { %2902 = vadd.xlane.f32.xlu2 %v6363_v21 }
 0x793   : > { %4042 = vpow2.f32 %v2872_v47  ;;  %v3017_v35 = vpop.f32.mrf.mxu3 }
 0x794   : > { %3020 = vmatpush.msra.mxu2 %v3017_v35 }
 0x796   : > { %3021 = vmatpush.msra.mxu2 %v3014_v51  ;;  %v2893_v40 = vpop.xlane.xlu1 %2892  ;;  %v2827_v43 = vpop.xlane.xlu2 %2826 }
 0x797   : > { %v2848_v42 = vsub.f32 %v6280_v60, %v2827_v43 }
 0x798   : > { %3022 = vmatpush.msra.mxu2 %v3011_v2 }
 0x799   : > { %v6367_v7 = vpop.eup %4042  ;;  %v2874_v13 = vmul.f32 1.442695, %v2848_v42 }
 0x79a   : > { %3023 = vmatpush.msra.mxu2 %v3008_v19  ;;  %2904 = vadd.xlane.f32.xlu1 %v6367_v7 }
 0x79b   : > { %4044 = vpow2.f32 %v2874_v13 }
 0x79c   : > { %3024 = vmatpush.msra.mxu2 %v3005_v6 }
 0x79e   : > { %3025 = vmatpush.msra.mxu2 %v3002_v31  ;;  %v2895_v54 = vpop.xlane.xlu0 %2894  ;;  %v2829_v26 = vpop.xlane.xlu1 %2828 }
 0x79f   : > { %v2849_v24 = vsub.f32 %v6291_v57, %v2829_v26 }
 0x7a0   : > { %3026 = vmatpush.msra.mxu2 %v2999_v16 }
 0x7a1   : > { %v6371_v11 = vpop.eup %4044  ;;  %v2876_v55 = vmul.f32 1.442695, %v2849_v24 }
 0x7a2   : > { %3027 = vmatpush.msra.mxu2 %v2996_v12  ;;  %2906 = vadd.xlane.f32.xlu2 %v6371_v11 }
 0x7a3   : > { %4046 = vpow2.f32 %v2876_v55 }
 0x7a4   : > { %3028 = vmatpush.msra.mxu2 %v2993_v41  ;;  %4048 = vrcp.f32 %v2887_v59 }
 0x7a6   : > { %3029 = vmatpush.msra.mxu2 %v2990_v4  ;;  %v2897_v60 = vpop.xlane.xlu2 %2896  ;;  %v2831_v19 = vpop.xlane.xlu0 %2830 }
 0x7a7   : > { %v2850_v2 = vsub.f32 %v6303_v3, %v2831_v19 }
 0x7a8   : > { %3030 = vmatpush.msra.mxu2 %v2987_v61 }
 0x7a9   : > { %v6375_v31 = vpop.eup %4046  ;;  %v2878_v6 = vmul.f32 1.442695, %v2850_v2 }
 0x7aa   : > { %3031 = vmatpush.msra.mxu2 %v2984_v29  ;;  %2908 = vadd.xlane.f32.xlu0 %v6375_v31  ;;  %v4049_v57 = vpop.eup %4048 }
 0x7ab   : > { %4050 = vpow2.f32 %v2878_v6  ;;  %v2934_v61 = vmul.f32 %v4049_v57, %v6289_v62 }
 0x7ac   : > { %3032 = vmatpush.msra.mxu2 %v6347_v9  ;;  %4052 = vrcp.f32 %v2889_v8 }
 0x7ae   : > { %3033 = vmatpush.msra.mxu2 %v6338_v15  ;;  %v2899_v41 = vpop.xlane.xlu1 %2898  ;;  %v2833_v4 = vpop.xlane.xlu2 %2832 }
 0x7af   : > { %v2851_v12 = vsub.f32 %v6314_v48, %v2833_v4  ;;  %v6670_v4 = vld [vmem:[#allocation19_spill] sm:$0xff] }
 0x7b0   : > { %3034 = vmatpush.msra.mxu2 %v6327_v27 }
 0x7b1   : > { %v6382_v3 = vpop.eup %4050  ;;  %v2880_v29 = vmul.f32 1.442695, %v2851_v12 }
 0x7b2   : > { %3035 = vmatpush.msra.mxu2 %v6316_v14  ;;  %2910 = vadd.xlane.f32.xlu1 %v6382_v3  ;;  %v4053_v9 = vpop.eup %4052 }
 0x7b3   : > { %4054 = vpow2.f32 %v2880_v29  ;;  %3036 = vmatmul.f32.vlgmr.msra.gmra.mxu2 %v2934_v61  ;;  %v2935_v8 = vmul.f32 %v4053_v9, %v6301_v23 }
 0x7b4   : > { %4056 = vrcp.f32 %v2891_v18 }
 0x7b6   : > { %v2901_v15 = vpop.xlane.xlu0 %2900  ;;  %v2835_v16 = vpop.xlane.xlu1 %2834 }
 0x7b7   : > { %v2852_v59 = vsub.f32 %v6325_v39, %v2835_v16 }
 0x7b9   : > { %v6388_v48 = vpop.eup %4054  ;;  %v2882_v27 = vmul.f32 1.442695, %v2852_v59  ;;  %v6672_v59 = vld [vmem:[#allocation5_spill] sm:$0xff] }
 0x7ba   : > { %2912 = vadd.xlane.f32.xlu2 %v6388_v48  ;;  %v4057_v62 = vpop.eup %4056 }
 0x7bb   : > { %4058 = vpow2.f32 %v2882_v27  ;;  %3039 = vmatmul.f32.gmra.mxu2 %v2935_v8  ;;  %v2936_v39 = vmul.f32 %v4057_v62, %v6312_v22 }
 0x7bc   : > { %4060 = vrcp.f32 %v2893_v40 }
 0x7be   : > { %v2837_v14 = vpop.xlane.xlu0 %2836 }
 0x7bf   : > { %v2853_v25 = vsub.f32 %v6336_v17, %v2837_v14 }
 0x7c1   : > { %v6393_v51 = vpop.eup %4058  ;;  %v2884_v36 = vmul.f32 1.442695, %v2853_v25 }
 0x7c2   : > { %2914 = vadd.xlane.f32.xlu0 %v6393_v51  ;;  %v4061_v18 = vpop.eup %4060 }
 0x7c3   : > { %4062 = vpow2.f32 %v2884_v36  ;;  %3042 = vmatmul.f32.gmra.mxu2 %v2936_v39  ;;  %v2937_v38 = vmul.f32 %v4061_v18, %v6323_v10  ;;  %v6673_v18 = vld [vmem:[#allocation10_spill] sm:$0xff] }
 0x7c4   : > { %4064 = vrcp.f32 %v2895_v54 }
 0x7c5   : > { %4066 = vrcp.f32 %v2897_v60 }
 0x7c6   : > { %4068 = vrcp.f32 %v2899_v41 }
 0x7c7   : > { %4070 = vrcp.f32 %v2901_v15 }
 0x7c9   : > { %v6397_v23 = vpop.eup %4062 }
 0x7ca   : > { %2916 = vadd.xlane.f32.xlu1 %v6397_v23  ;;  %v4065_v17 = vpop.eup %4064 }
 0x7cb   : > { %3045 = vmatmul.f32.gmra.mxu2 %v2937_v38  ;;  %v2938_v47 = vmul.f32 %v4065_v17, %v6334_v44  ;;  %v4067_v35 = vpop.eup %4066  ;;  %v6674_v38 = vld [vmem:[#allocation7_spill] sm:$0xff] }
 0x7cc   : > { %v2939_v22 = vmul.f32 %v4067_v35, %v6345_v20  ;;  %v4069_v40 = vpop.eup %4068  ;;  %v1814_v17 = vadd.f32 %v6674_v38, %v6673_v18 }
 0x7cd   : > { %v2940_v43 = vmul.f32 %v4069_v40, %v6352_v50  ;;  %v4071_v42 = vpop.eup %4070 }
 0x7ce   : > { %v2941_v10 = vmul.f32 %v4071_v42, %v6356_v46  ;;  %v6676_v42 = vld [vmem:[#allocation9_spill] sm:$0xff] }
 0x7d3   : > { %3048 = vmatmul.f32.gmra.mxu2 %v2938_v47 }
 0x7db   : > { %3051 = vmatmul.f32.gmra.mxu2 %v2939_v22 }
 0x7e3   : > { %3054 = vmatmul.f32.gmra.mxu2 %v2940_v43  ;;  %v6675_v43 = vld [vmem:[#allocation12_spill] sm:$0xff] }
 0x7eb   : > { %3057 = vmatmul.f32.gmra.mxu2 %v2941_v10  ;;  %v1817_v10 = vadd.f32 %v6676_v42, %v6675_v43 }
 0x805   : > { %v2903_v13 = vpop.xlane.xlu2 %2902 }
 0x806   : > { %4072 = vrcp.f32 %v2903_v13 }
 0x80c   : > { %v4073_v54 = vpop.eup %4072 }
 0x80d   : > { %v2905_v26 = vpop.xlane.xlu1 %2904  ;;  %v2942_v44 = vmul.f32 %v4073_v54, %v6363_v21 }
 0x80e   : > { %4074 = vrcp.f32 %v2905_v26 }
 0x80f   : > { %3060 = vmatmul.f32.gmra.mxu2 %v2942_v44 }
 0x814   : > { %v4075_v24 = vpop.eup %4074 }
 0x815   : > { %v2907_v20 = vpop.xlane.xlu2 %2906  ;;  %v2943_v55 = vmul.f32 %v4075_v24, %v6367_v7  ;;  %v6669_v7 = vld [vmem:[#allocation6_spill] sm:$0xff] }
 0x816   : > { %4076 = vrcp.f32 %v2907_v20  ;;  %v1808_v12 = vadd.f32 %v6670_v4, %v6669_v7 }
 0x817   : > { %3063 = vmatmul.f32.gmra.mxu2 %v2943_v55 }
 0x81c   : > { %v4077_v50 = vpop.eup %4076 }
 0x81d   : > { %v2909_v60 = vpop.xlane.xlu0 %2908  ;;  %v2944_v19 = vmul.f32 %v4077_v50, %v6371_v11  ;;  %v2462_v11 = vadd.f32 %v6173_v52, %v1808_v12 }
 0x81e   : > { %4078 = vrcp.f32 %v2909_v60 }
 0x81f   : > { %3066 = vmatmul.f32.gmra.mxu2 %v2944_v19 }
 0x824   : > { %v4079_v46 = vpop.eup %4078 }
 0x825   : > { %v2911_v2 = vpop.xlane.xlu1 %2910  ;;  %v2945_v6 = vmul.f32 %v4079_v46, %v6375_v31  ;;  %v6416_v31 = vld [vmem:[%s6567_s8] ss:$0 sm:$0xff] }
 0x826   : > { %4080 = vrcp.f32 %v2911_v2 }
 0x827   : > { %3069 = vmatmul.f32.gmra.mxu2 %v2945_v6 }
 0x82c   : > { %v4081_v21 = vpop.eup %4080 }
 0x82d   : > { %v2913_v57 = vpop.xlane.xlu2 %2912  ;;  %v2946_v41 = vmul.f32 %v4081_v21, %v6382_v3  ;;  %v6671_v3 = vld [vmem:[#allocation8_spill] sm:$0xff] }
 0x82e   : > { %4082 = vrcp.f32 %v2913_v57  ;;  %v1811_v27 = vadd.f32 %v6672_v59, %v6671_v3 }
 0x82f   : > { %3072 = vmatmul.f32.gmra.mxu2 %v2946_v41 }
 0x834   : > { %v4083_v61 = vpop.eup %4082 }
 0x835   : > { %v2915_v29 = vpop.xlane.xlu0 %2914  ;;  %v2947_v9 = vmul.f32 %v4083_v61, %v6388_v48  ;;  %v2463_v48 = vadd.f32 %v6183_v58, %v1811_v27  ;;  %v2464_v58 = vadd.f32 %v6196_v37, %v1814_v17  ;;  %v2465_v37 = vadd.f32 %v6208_v32, %v1817_v10 }
 0x836   : > { %4084 = vrcp.f32 %v2915_v29  ;;  %v3037_v15 = vpop.f32.mrf.mxu2 }
 0x837   : > { %v3085_v16 = vadd.f32 %v3037_v15, %v2462_v11  ;;  %3075 = vmatmul.f32.gmra.mxu2 %v2947_v9 }
 0x839   : > { %v3105_v52 = vadd.f32 %v6416_v31, %v3085_v16 }
 0x83b   : > { %3121 = vst.msk [vmem:[%s6423_s27] sm:$0xff] %vm509_vm0, %v3105_v52 }
 0x83c   : > { %v4085_v8 = vpop.eup %4084 }
 0x83d   : > { %v2917_v62 = vpop.xlane.xlu1 %2916  ;;  %v2948_v14 = vmul.f32 %v4085_v8, %v6393_v51 }
 0x83e   : > { %4086 = vrcp.f32 %v2917_v62  ;;  %v3040_v25 = vpop.f32.mrf.mxu2 }
 0x83f   : > { %v3086_v36 = vadd.f32 %v3040_v25, %v2463_v48  ;;  %3078 = vmatmul.f32.gmra.mxu2 %v2948_v14 }
 0x841   : > { %v3106_v39 = vadd.f32 %v6416_v31, %v3086_v36 }
 0x843   : > { %3122 = vst.msk [vmem:[%s6423_s27 + $0x8] sm:$0xff] %vm509_vm0, %v3106_v39 }
 0x844   : > { %v4087_v47 = vpop.eup %4086 }
 0x845   : > { %v2949_v35 = vmul.f32 %v4087_v47, %v6397_v23 }
 0x846   : > { %v3043_v51 = vpop.f32.mrf.mxu2 }
 0x847   : > { %v3087_v22 = vadd.f32 %v3043_v51, %v2464_v58  ;;  %3081 = vmatmul.f32.gmra.mxu2 %v2949_v35 }
 0x849   : > { %v3107_v40 = vadd.f32 %v6416_v31, %v3087_v22 }
 0x84b   : > { %3123 = vst.msk [vmem:[%s6423_s27 + $0x10] sm:$0xff] %vm509_vm0, %v3107_v40 }
 0x84e   : > { %v3046_v23 = vpop.f32.mrf.mxu2 }
 0x84f   : > { %v3088_v13 = vadd.f32 %v3046_v23, %v2465_v37 }
 0x851   : > { %v3108_v54 = vadd.f32 %v6416_v31, %v3088_v13 }
 0x852   : > { %4165 = shalt.err (!%p4162_p5)
}
 0x853   : > { %s4218_s20 = smov 128   ;;  %s4219_s22 = smov 8   ;;  %v6678_v32 = vld [vmem:[#allocation14_spill] sm:$0xff]  ;;  %v6679_v26 = vld [vmem:[#allocation11_spill] sm:$0xff]  ;;  %3124 = vst.msk [vmem:[%s6423_s27 + $0x18] sm:$0xff] %vm509_vm0, %v3108_v54  ;;  %v6680_v60 = vld [vmem:[#allocation16_spill] sm:$0xff] }
 0x854   : > { %3766 = dma.vmem_to_hbm [thread:$0]  (%p4315_p4), %s3166_s11, 8192, %s3168_s19, %s3147_s30, %s4218_s20, %s4218_s20, %s4219_s22   ;;  %v1820_v44 = vadd.f32 %v6679_v26, %v6678_v32  ;;  %v6681_v19 = vld [vmem:[#allocation13_spill] sm:$0xff]  ;;  %v6682_v41 = vld [vmem:[#allocation18_spill] sm:$0xff]  ;;  %v6683_v7 = vld [vmem:[#allocation15_spill] sm:$0xff] }
 0x855   : > { %v1823_v46 = vadd.f32 %v6681_v19, %v6680_v60  ;;  %v6684_v29 = vld [vmem:[#allocation21_spill] sm:$0xff]  ;;  %v6687_v59 = vld [vmem:[#allocation20_spill] sm:$0xff]  ;;  %v6689_v36 = vld [vmem:[#allocation22_spill] sm:$0xff] }
 0x856   : > { %v2466_v24 = vadd.f32 %v6223_v45, %v1820_v44  ;;  %v3049_v20 = vpop.f32.mrf.mxu2  ;;  %v1826_v45 = vadd.f32 %v6683_v7, %v6682_v41  ;;  %v6685_v9 = vld [vmem:[#allocation17_spill] sm:$0xff]  ;;  %v6690_v47 = vld [vmem:[#allocation27_spill] sm:$0xff]  ;;  %v6691_v58 = vld [vmem:[#allocation24_spill] sm:$0xff] }
 0x857   : > { %v2467_v2 = vadd.f32 %v6232_v56, %v1823_v46  ;;  %v1829_v56 = vadd.f32 %v6685_v9, %v6684_v29  ;;  %v6688_v25 = vld [vmem:[#allocation25_spill] sm:$0xff]  ;;  %v6692_v43 = vld [vmem:[#allocation30_spill] sm:$0xff] }
 0x858   : > { %v3089_v55 = vadd.f32 %v3049_v20, %v2466_v24  ;;  %v2468_v4 = vadd.f32 %v6243_v0, %v1826_v45  ;;  %v6686_v0 = vld [vmem:[#allocation23_spill] sm:$0xff]  ;;  %v6693_v42 = vld [vmem:[#allocation26_spill] sm:$0xff]  ;;  %v6694_v54 = vld [vmem:[#allocation33_spill] sm:$0xff] }
 0x859   : > { %v2469_v15 = vadd.f32 %v6247_v49, %v1829_v56  ;;  %v1832_v27 = vadd.f32 %v6687_v59, %v6686_v0  ;;  %v1835_v49 = vadd.f32 %v6689_v36, %v6688_v25  ;;  %v6695_v32 = vld [vmem:[#allocation29_spill] sm:$0xff] }
 0x85a   : > { %v3109_v50 = vadd.f32 %v6416_v31, %v3089_v55  ;;  %v6696_v55 = vld [vmem:[#allocation36_spill] sm:$0xff] }
 0x85b   : > { %v2470_v8 = vadd.f32 %v6251_v63, %v1832_v27  ;;  %v2471_v39 = vadd.f32 %v6255_v53, %v1835_v49  ;;  %v1838_v63 = vadd.f32 %v6691_v58, %v6690_v47  ;;  %v1841_v53 = vadd.f32 %v6693_v42, %v6692_v43 }
 0x85c   : > { %3125 = vst.msk [vmem:[%s6423_s27 + $0x20] sm:$0xff] %vm509_vm0, %v3109_v50  ;;  %v6697_v50 = vld [vmem:[#allocation32_spill] sm:$0xff] }
 0x85d   : > { %v2472_v35 = vadd.f32 %v6259_v33, %v1838_v63  ;;  %v2473_v10 = vadd.f32 %v6265_v28, %v1841_v53  ;;  %v1844_v33 = vadd.f32 %v6695_v32, %v6694_v54  ;;  %v1847_v28 = vadd.f32 %v6697_v50, %v6696_v55 }
 0x85e   : > { %v3052_v6 = vpop.f32.mrf.mxu2 }
 0x85f   : > { %v3090_v21 = vadd.f32 %v3052_v6, %v2467_v2  ;;  %v2474_v26 = vadd.f32 %v6273_v5, %v1844_v33  ;;  %v2475_v60 = vadd.f32 %v6282_v30, %v1847_v28  ;;  %v6698_v6 = vld [vmem:[#allocation39_spill] sm:$0xff] }
 0x861   : > { %v3110_v57 = vadd.f32 %v6416_v31, %v3090_v21  ;;  %v6699_v21 = vld [vmem:[#allocation35_spill] sm:$0xff] }
 0x862   : > { %v1850_v5 = vadd.f32 %v6699_v21, %v6698_v6 }
 0x863   : > { %3126 = vst.msk [vmem:[%s6423_s27 + $0x28] sm:$0xff] %vm509_vm0, %v3110_v57 }
 0x864   : > { %v2476_v57 = vadd.f32 %v6293_v34, %v1850_v5 }
 0x866   : > { %v3055_v12 = vpop.f32.mrf.mxu2 }
 0x867   : > { %v3091_v61 = vadd.f32 %v3055_v12, %v2468_v4  ;;  %v6700_v4 = vld [vmem:[#allocation41_spill] sm:$0xff]  ;;  %v6701_v12 = vld [vmem:[#allocation38_spill] sm:$0xff] }
 0x869   : > { %v3111_v11 = vadd.f32 %v6416_v31, %v3091_v61  ;;  %v1853_v61 = vadd.f32 %v6701_v12, %v6700_v4 }
 0x86b   : > { %3127 = vst.msk [vmem:[%s6423_s27 + $0x30] sm:$0xff] %vm509_vm0, %v3111_v11  ;;  %v2477_v30 = vadd.f32 %v6305_v1, %v1853_v61 }
 0x86e   : > { %v3058_v16 = vpop.f32.mrf.mxu2 }
 0x86f   : > { %v3092_v52 = vadd.f32 %v3058_v16, %v2469_v15 }
 0x871   : > { %v3112_v3 = vadd.f32 %v6416_v31, %v3092_v52 }
 0x873   : > { %3128 = vst.msk [vmem:[%s6423_s27 + $0x38] sm:$0xff] %vm509_vm0, %v3112_v3 }
 0x892   : > { %v3061_v48 = vpop.f32.mrf.mxu2 }
 0x893   : > { %v3093_v62 = vadd.f32 %v3061_v48, %v2470_v8 }
 0x895   : > { %v3113_v14 = vadd.f32 %v6416_v31, %v3093_v62 }
 0x897   : > { %3129 = vst.msk [vmem:[%s6423_s27 + $0x40] sm:$0xff] %vm509_vm0, %v3113_v14 }
 0x89a   : > { %v3064_v18 = vpop.f32.mrf.mxu2 }
 0x89b   : > { %v3094_v38 = vadd.f32 %v3064_v18, %v2471_v39 }
 0x89d   : > { %v3114_v17 = vadd.f32 %v6416_v31, %v3094_v38 }
 0x89f   : > { %3130 = vst.msk [vmem:[%s6423_s27 + $0x48] sm:$0xff] %vm509_vm0, %v3114_v17 }
 0x8a2   : > { %v3067_v51 = vpop.f32.mrf.mxu2 }
 0x8a3   : > { %v3095_v22 = vadd.f32 %v3067_v51, %v2472_v35 }
 0x8a5   : > { %v3115_v40 = vadd.f32 %v6416_v31, %v3095_v22 }
 0x8a7   : > { %3131 = vst.msk [vmem:[%s6423_s27 + $0x50] sm:$0xff] %vm509_vm0, %v3115_v40 }
 0x8aa   : > { %v3070_v37 = vpop.f32.mrf.mxu2 }
 0x8ab   : > { %v3096_v23 = vadd.f32 %v3070_v37, %v2473_v10 }
 0x8ad   : > { %v3116_v13 = vadd.f32 %v6416_v31, %v3096_v23 }
 0x8af   : > { %3132 = vst.msk [vmem:[%s6423_s27 + $0x58] sm:$0xff] %vm509_vm0, %v3116_v13 }
 0x8b2   : > { %v3073_v44 = vpop.f32.mrf.mxu2 }
 0x8b3   : > { %v3097_v24 = vadd.f32 %v3073_v44, %v2474_v26 }
 0x8b5   : > { %v3117_v20 = vadd.f32 %v6416_v31, %v3097_v24 }
 0x8b7   : > { %3133 = vst.msk [vmem:[%s6423_s27 + $0x60] sm:$0xff] %vm509_vm0, %v3117_v20 }
 0x8ba   : > { %v3076_v19 = vpop.f32.mrf.mxu2 }
 0x8bb   : > { %v3098_v46 = vadd.f32 %v3076_v19, %v2475_v60 }
 0x8bd   : > { %v3118_v2 = vadd.f32 %v6416_v31, %v3098_v46 }
 0x8bf   : > { %3134 = vst.msk [vmem:[%s6423_s27 + $0x68] sm:$0xff] %vm509_vm0, %v3118_v2 }
 0x8c2   : > { %v3079_v41 = vpop.f32.mrf.mxu2 }
 0x8c3   : > { %v3099_v7 = vadd.f32 %v3079_v41, %v2476_v57 }
 0x8c5   : > { %v3119_v45 = vadd.f32 %v6416_v31, %v3099_v7 }
 0x8c7   : > { %3135 = vst.msk [vmem:[%s6423_s27 + $0x70] sm:$0xff] %vm509_vm0, %v3119_v45 }
 0x8ca   : > { %v3082_v11 = vpop.f32.mrf.mxu2 }
 0x8cb   : > { %v3100_v29 = vadd.f32 %v3082_v11, %v2477_v30 }
 0x8cd   : > { %v3120_v9 = vadd.f32 %v6416_v31, %v3100_v29 }
 0x8cf   : > { %3136 = vst.msk [vmem:[%s6423_s27 + $0x78] sm:$0xff] %vm509_vm0, %v3120_v9 }
 0x8d0 PF: > { %p3772_p4 = scmp.ge.s32.totalorder %s4216_s18, 2  ;;  %s3194_s1 = sand.u32 1, %s4196_s13  }
 0x8d1   : > { %s3195_s23 = scalar_lea.sflag [#allocation3], %s3194_s1 }
 0x8d2   : > { %p3769_p6 = pnand %p3772_p4, %p4322_p8 }
 0x8d4   : > { %p3770_p7 = pneg %p3769_p6 }
 0x8d6   : > { %4191 = dma.done.wait (%p3770_p7), %s3195_s23, 8192  }
 0x8d7   : > { %4193 = vsyncadd (%p3770_p7), %s3195_s23, 4294959104  ;;  %s24_s18 = sadd.s32 1, %s4216_s18   ;;  %s6702_s13 = smov %s4200_s14 }
 0x8d8   : > { %p21_p9 = scmp.ge.s32.totalorder %s24_s18, 4   ;;  %s6703_s14 = smov %s4204_s15 }
 0x8d9   : > { %s6704_s15 = smov %s4328_s26  ;;  %s6705_s16 = smov %s4212_s17 }
 0x8da   : > { %s6706_s17 = smov %s6708_s21  ;;  %23 = sbr.rel (!%p21_p9) target bundleno = 7 (0x7), region = 127 }
 0x8df   :  { %3201 = vsyncpa [#allocation3], 1 }
 0x8e0   :  { %3203 = vsyncpa [#allocation3 + $0x1], 1 }

</bundles_post_ra>
